<compile_context>
chip_gen: v7x
topology: tpu7x:2x2x1
jax: 0.10.0
libtpu: 0.0.40
codegen_flags: <defaults>
</compile_context>

<pallas_src>
import functools

import jax
import jax.numpy as jnp
from jax.experimental import pallas as pl
from jax.experimental.pallas import tpu as pltpu

# cfg used to build the fc head (A3C actor: 256 hidden, 4 Breakout actions).
CFG = [256, "ReLU", 4, "Softmax"]

_NC1, _NC2 = 16, 32      # conv output channels
_K1, _K2 = 256, 256      # conv patch features (4*8*8 and 16*4*4)
_NGROUPS = 4             # 2x2 parity groups of conv1 output positions
_GCOLS = 128             # lanes reserved per (sample, parity group)
_CHUNK = 96              # fc1 weight rows per conv2 channel (81 real + 15 zero)


# --------------------------------------------------------------------------
# Fused kernel: conv1 -> conv2 (in-kernel im2col) -> fc head, per sample.
# --------------------------------------------------------------------------
def _apply_act(h, act):
    if act == "relu":
        return jnp.maximum(h, 0.0)
    if act == "softmax":
        h = h - jnp.max(h, axis=-1, keepdims=True)
        e = jnp.exp(h)
        return e / jnp.sum(e, axis=-1, keepdims=True)
    return h


def _net_kernel(p1t_ref, w1_ref, b1_ref, w2_ref, b2_ref, *rest, fc_acts, chunk):
    out_ref = rest[-1]
    fc_refs = rest[:-1]

    # ---- conv1 (lane-dense, transposed): [16,256] @ [256,512] --------------
    # c1 column layout: g*128 + Y*10 + X, where output pos (y,x) = (2Y+py, 2X+px)
    # and g = py*2 + px; lanes 100..127 of each group are zero-pad columns.
    c1 = jnp.dot(w1_ref[...], p1t_ref[0], preferred_element_type=jnp.float32)
    c1 = jnp.maximum(c1 + b1_ref[...], 0.0).astype(jnp.bfloat16)      # [16, 512]

    # ---- conv2 im2col in-kernel: 16 static lane-shifted slices --------------
    # Patch row group (dy, dx, py, px): c1[:, g*128 + dy*10+dx : ... + 100].
    # Valid conv2 outputs (oy,ox <= 8) only ever read c1 lanes < 100 per group.
    blocks = []
    for dy in range(2):
        for dx in range(2):
            shift = dy * 10 + dx
            for g in range(_NGROUPS):
                s = g * _GCOLS + shift
                blocks.append(c1[:, s:s + 100])
    p2 = jnp.concatenate(blocks, axis=0)                              # [256, 100]

    # ---- conv2: [32,256] @ [256,100]  (columns = oy*10 + ox, 81 valid) ------
    c2 = jnp.dot(w2_ref[...], p2, preferred_element_type=jnp.float32)
    c2 = jnp.maximum(c2 + b2_ref[...], 0.0)                           # [32, 100]

    # ---- fc1 with the PyTorch (C,H,W) flatten folded in ---------------------
    # Per channel: [1, 96] slice of c2 @ [96, N] weight block; the garbage
    # spatial columns (ox==9 / oy==9) hit zero weight rows.
    w1fc, b1fc = fc_refs[0], fc_refs[1]
    h = b1fc[...]                                                     # [1, N] f32
    for c in range(_NC2):
        lhs = c2[c:c + 1, 0:chunk].astype(jnp.bfloat16)               # [1, 96]
        rhs = w1fc[c * chunk:(c + 1) * chunk, :]                      # [96, N]
        h = h + jnp.dot(lhs, rhs, preferred_element_type=jnp.float32)
    h = _apply_act(h, fc_acts[0])

    # ---- remaining fc layers -------------------------------------------------
    for li in range(1, len(fc_acts)):
        w = fc_refs[2 * li][...]
        bia = fc_refs[2 * li + 1][...]
        h = jnp.dot(h.astype(w.dtype), w, preferred_element_type=jnp.float32) + bia
        h = _apply_act(h, fc_acts[li])

    out_ref[0] = h.astype(out_ref.dtype)


def fused_net(p1t, kp, fc_acts):
    """p1t: [B, 256, 512] bf16 parity-grouped conv1 patches (transposed)."""
    B = p1t.shape[0]
    out_dim = kp["fc"][-1][0].shape[1]

    in_specs = [
        pl.BlockSpec((1, _K1, _NGROUPS * _GCOLS), lambda b: (b, 0, 0)),
        pl.BlockSpec(kp["w1t"].shape, lambda b: (0, 0)),
        pl.BlockSpec(kp["b1"].shape, lambda b: (0, 0)),
        pl.BlockSpec(kp["w2t"].shape, lambda b: (0, 0)),
        pl.BlockSpec(kp["b2"].shape, lambda b: (0, 0)),
    ]
    args = [p1t, kp["w1t"], kp["b1"], kp["w2t"], kp["b2"]]
    for w, b in kp["fc"]:
        in_specs.append(pl.BlockSpec(w.shape, lambda b_: (0, 0)))
        in_specs.append(pl.BlockSpec(b.shape, lambda b_: (0, 0)))
        args += [w, b]

    flops_per_sample = (2 * _NC1 * _K1 * (_NGROUPS * _GCOLS)
                        + 2 * _NC2 * _K2 * 100
                        + sum(2 * wi * wo for wi, wo in
                              (w.shape for w, _ in kp["fc"])))
    bytes_accessed = (sum(int(a.size) * a.dtype.itemsize for a in args)
                      + B * out_dim * 4)

    kernel = functools.partial(_net_kernel, fc_acts=tuple(fc_acts), chunk=_CHUNK)
    out = pl.pallas_call(
        kernel,
        out_shape=jax.ShapeDtypeStruct((B, 1, out_dim), jnp.float32),
        grid=(B,),
        in_specs=in_specs,
        out_specs=pl.BlockSpec((1, 1, out_dim), lambda b: (b, 0, 0)),
        compiler_params=pltpu.CompilerParams(
            dimension_semantics=("parallel",)),
        cost_estimate=pl.CostEstimate(
            flops=int(B * flops_per_sample),
            transcendentals=int(B * out_dim),
            bytes_accessed=int(bytes_accessed)),
    )(*args)
    return out.reshape(B, out_dim)


# --------------------------------------------------------------------------
# Host-side structured im2col for conv1 (input-side only; a few XLA reshapes).
# --------------------------------------------------------------------------
def _space_to_depth(x_nhwc, f):
    """[B,H,W,C] -> [B,H/f,W/f,f*f*C], feature order (sy, sx, c)."""
    B, H, W, C = x_nhwc.shape
    x = x_nhwc.reshape(B, H // f, f, W // f, f, C)
    x = x.transpose(0, 1, 3, 2, 4, 5)
    return x.reshape(B, H // f, W // f, f * f * C)


def _window_concat(xs):
    """2x2 window of stride-cells -> patches; feature order (dy, dx, cell-feat)."""
    return jnp.concatenate(
        [xs[:, 0:-1, 0:-1], xs[:, 0:-1, 1:], xs[:, 1:, 0:-1], xs[:, 1:, 1:]],
        axis=-1)


# --------------------------------------------------------------------------
# Parameters
# --------------------------------------------------------------------------
def init_params(key, cfg):
    """PyTorch-layout parameters for Net(cfg)."""
    keys = jax.random.split(key, 8)
    params = {
        "conv1_w": jax.random.normal(keys[0], (16, 4, 8, 8), jnp.float32)
        * (1.0 / jnp.sqrt(4 * 8 * 8)),
        "conv1_b": jnp.zeros((16,), jnp.float32),
        "conv2_w": jax.random.normal(keys[1], (32, 16, 4, 4), jnp.float32)
        * (1.0 / jnp.sqrt(16 * 4 * 4)),
        "conv2_b": jnp.zeros((32,), jnp.float32),
    }
    fc = []
    in_size = 9 * 9 * 32
    ki = 2
    for v in cfg:
        if v in ("ReLU", "Softmax"):
            continue
        w = jax.random.normal(keys[ki], (in_size, v), jnp.float32) * (1.0 / jnp.sqrt(in_size))
        b = jnp.full((v,), 0.01, jnp.float32)
        fc.append((w, b))          # stored as [in, out]
        in_size = v
        ki += 1
    params["fc"] = fc
    return params


def prepare_params(params, cfg):
    """One-time repack: permute conv weights to the kernel's patch order,
    repack fc1 rows to 96/channel (81 real + 15 zero), cast MXU operands bf16."""
    bf16, f32 = jnp.bfloat16, jnp.float32

    # conv1: feature order (dy, dx, sy, sx, c), ky = 4*dy + sy, kx = 4*dx + sx
    w1 = params["conv1_w"]                           # [16, 4, 8, 8]
    w1t = (w1.reshape(16, 4, 2, 4, 2, 4)
             .transpose(0, 2, 4, 3, 5, 1)
             .reshape(16, 256)).astype(bf16)
    b1 = params["conv1_b"].reshape(16, 1).astype(f32)

    # conv2: feature order (dy, dx, py, px, c), ky = 2*dy + py, kx = 2*dx + px
    w2 = params["conv2_w"]                           # [32, 16, 4, 4]
    w2t = (w2.reshape(32, 16, 2, 2, 2, 2)
             .transpose(0, 2, 4, 3, 5, 1)
             .reshape(32, 256)).astype(bf16)
    b2 = params["conv2_b"].reshape(32, 1).astype(f32)

    fc = []
    first = True
    for w, b in params["fc"]:
        if first:
            win, wout = w.shape
            assert win == 32 * 81
            # PyTorch flatten index c*81 + oy*9 + ox  ->  kernel row
            # c*96 + oy*10 + ox; ox==9 and tail rows are zero (they pair with
            # the garbage spatial columns of the in-kernel conv2 output).
            wr = w.reshape(32, 9, 9, wout)
            wr = jnp.pad(wr, ((0, 0), (0, 0), (0, 1), (0, 0)))     # ox: 9 -> 10
            wr = wr.reshape(32, 90, wout)
            wr = jnp.pad(wr, ((0, 0), (0, _CHUNK - 90), (0, 0)))   # 90 -> 96
            wk = wr.reshape(32 * _CHUNK, wout).astype(bf16)
            first = False
        else:
            wk = w.astype(bf16)
        fc.append((wk, b.reshape(1, -1).astype(f32)))
    return {"w1t": w1t, "b1": b1, "w2t": w2t, "b2": b2, "fc": fc}


def fc_activations(cfg):
    acts, i = [], 0
    while i < len(cfg):
        v = cfg[i]
        if v in ("ReLU", "Softmax"):
            i += 1
            continue
        act = "none"
        if i + 1 < len(cfg) and cfg[i + 1] == "ReLU":
            act = "relu"
        elif i + 1 < len(cfg) and cfg[i + 1] == "Softmax":
            act = "softmax"
        acts.append(act)
        i += 1
    return tuple(acts)


# --------------------------------------------------------------------------
# Forward pass
# --------------------------------------------------------------------------
def net_forward(kparams, x, fc_acts):
    B = x.shape[0]

    # conv1 patches: structured space-to-depth im2col (input-side glue only).
    xh = x.transpose(0, 2, 3, 1)                       # NHWC [B,84,84,4]
    xs = _space_to_depth(xh, 4)                        # [B,21,21,64]
    p1 = _window_concat(xs)                            # [B,20,20,256]

    # Regroup conv1-output positions by (y%2, x%2) parity, 128 lanes per group,
    # so conv2's im2col becomes static lane-shifted slices inside the kernel.
    p1 = p1.reshape(B, 10, 2, 10, 2, _K1).transpose(0, 2, 4, 1, 3, 5)
    p1 = p1.reshape(B, _NGROUPS, 100, _K1)
    p1 = jnp.pad(p1, ((0, 0), (0, 0), (0, _GCOLS - 100), (0, 0)))
    p1t = (p1.reshape(B, _NGROUPS * _GCOLS, _K1)
             .transpose(0, 2, 1).astype(jnp.bfloat16))  # [B, 256, 512]

    # Everything else (conv1, conv2, fc head) is one fused Pallas kernel.
    return fused_net(p1t, kparams, fc_acts)


# --------------------------------------------------------------------------
# Pure-JAX reference (f32) used only to validate the Pallas path.
# --------------------------------------------------------------------------
def net_forward_reference(params, x, cfg):
    def conv(x, w, b, stride):
        y = jax.lax.conv_general_dilated(
            x, w, window_strides=(stride, stride), padding="VALID",
            dimension_numbers=("NCHW", "OIHW", "NCHW"))
        return jax.nn.relu(y + b[None, :, None, None])

    x = conv(x, params["conv1_w"], params["conv1_b"], 4)
    x = conv(x, params["conv2_w"], params["conv2_b"], 2)
    x = x.reshape(x.shape[0], -1)
    li, i = 0, 0
    while i < len(cfg):
        v = cfg[i]
        if v in ("ReLU", "Softmax"):
            i += 1
            continue
        w, b = params["fc"][li]
        x = x @ w + b
        if i + 1 < len(cfg) and cfg[i + 1] == "ReLU":
            x = jax.nn.relu(x)
        elif i + 1 < len(cfg) and cfg[i + 1] == "Softmax":
            x = jax.nn.softmax(x, axis=1)
        li += 1
        i += 1
    return x


if __name__ == "__main__":
    key = jax.random.PRNGKey(0)
    pkey, xkey = jax.random.split(key)
    params = init_params(pkey, CFG)
    kparams = prepare_params(params, CFG)      # one-time repack (bf16, permuted)
    acts = fc_activations(CFG)

    # batch=2; spatial must be 84x84 because the module hard-codes 9*9*32.
    x = jax.random.normal(xkey, (2, 4, 84, 84), jnp.float32)

    fwd = jax.jit(functools.partial(net_forward, fc_acts=acts))
    out = fwd(kparams, x)
    jax.block_until_ready(out)

    assert out.shape == (2, 4), out.shape
    assert bool(jnp.all(jnp.isfinite(out)))
    # softmax rows must sum to 1
    assert bool(jnp.allclose(jnp.sum(out, axis=1), 1.0, atol=1e-5))

    # compare against the pure-JAX f32 reference (bf16 MXU inputs -> loose tol)
    ref = jax.jit(functools.partial(net_forward_reference, cfg=tuple(CFG)))(params, x)
    jax.block_until_ready(ref)
    assert bool(jnp.allclose(out, ref, atol=5e-2)), (out, ref)

    print("KERNEL_OK")
</pallas_src>

<mosaic_0001>
module attributes {stable_mosaic.version = 11 : i64} {
  func.func @_net_kernel(%arg0: i32, %arg1: memref<1x256x512xbf16, #tpu.memory_space<vmem>>, %arg2: memref<16x256xbf16, #tpu.memory_space<vmem>>, %arg3: memref<16x1xf32, #tpu.memory_space<vmem>>, %arg4: memref<32x256xbf16, #tpu.memory_space<vmem>>, %arg5: memref<32x1xf32, #tpu.memory_space<vmem>>, %arg6: memref<3072x256xbf16, #tpu.memory_space<vmem>>, %arg7: memref<1x256xf32, #tpu.memory_space<vmem>>, %arg8: memref<256x4xbf16, #tpu.memory_space<vmem>>, %arg9: memref<1x4xf32, #tpu.memory_space<vmem>>, %arg10: memref<1x1x4xf32, #tpu.memory_space<vmem>>) attributes {dimension_semantics = [#tpu.dimension_semantics<parallel>], iteration_bounds = array<i64: 2>, scalar_prefetch = 0 : i64, scratch_operands = 0 : i64, tpu.core_type = #tpu.core_type<tc>, window_params = [{transform_indices = @transform_0, window_bounds = array<i64: 1, 256, 512>}, {pipeline_mode = #tpu.pipeline_mode<synchronous>, transform_indices = @transform_1, window_bounds = array<i64: 16, 256>}, {pipeline_mode = #tpu.pipeline_mode<synchronous>, transform_indices = @transform_2, window_bounds = array<i64: 16, 1>}, {pipeline_mode = #tpu.pipeline_mode<synchronous>, transform_indices = @transform_3, window_bounds = array<i64: 32, 256>}, {pipeline_mode = #tpu.pipeline_mode<synchronous>, transform_indices = @transform_4, window_bounds = array<i64: 32, 1>}, {pipeline_mode = #tpu.pipeline_mode<synchronous>, transform_indices = @transform_5, window_bounds = array<i64: 3072, 256>}, {pipeline_mode = #tpu.pipeline_mode<synchronous>, transform_indices = @transform_6, window_bounds = array<i64: 1, 256>}, {pipeline_mode = #tpu.pipeline_mode<synchronous>, transform_indices = @transform_7, window_bounds = array<i64: 256, 4>}, {pipeline_mode = #tpu.pipeline_mode<synchronous>, transform_indices = @transform_8, window_bounds = array<i64: 1, 4>}, {transform_indices = @transform_9, window_bounds = array<i64: 1, 1, 4>}]} {
    %c0 = arith.constant 0 : index
    %c0_0 = arith.constant 0 : index
    %0 = vector.load %arg2[%c0, %c0_0] : memref<16x256xbf16, #tpu.memory_space<vmem>>, vector<16x256xbf16>
    %c0_1 = arith.constant 0 : index
    %c0_2 = arith.constant 0 : index
    %c0_3 = arith.constant 0 : index
    %1 = vector.load %arg1[%c0_1, %c0_2, %c0_3] : memref<1x256x512xbf16, #tpu.memory_space<vmem>>, vector<1x256x512xbf16>
    %2 = vector.shape_cast %1 : vector<1x256x512xbf16> to vector<256x512xbf16>
    %cst = arith.constant dense<0.000000e+00> : vector<16x512xf32>
    %3 = tpu.matmul %0, %2, %cst {dimension_numbers = #tpu.dot_dimension_numbers<[1], [0], [0], [1], [0, 0, 1, 1], [], []>} : vector<16x256xbf16>, vector<256x512xbf16>, vector<16x512xf32> -> vector<16x512xf32>
    %c0_4 = arith.constant 0 : index
    %c0_5 = arith.constant 0 : index
    %4 = vector.load %arg3[%c0_4, %c0_5] : memref<16x1xf32, #tpu.memory_space<vmem>>, vector<16x1xf32>
    %5 = vector.broadcast %4 : vector<16x1xf32> to vector<16x512xf32>
    %6 = arith.addf %3, %5 : vector<16x512xf32>
    %cst_6 = arith.constant 0.000000e+00 : f32
    %7 = vector.broadcast %cst_6 : f32 to vector<16x512xf32>
    %8 = arith.maximumf %6, %7 : vector<16x512xf32>
    %9 = arith.truncf %8 : vector<16x512xf32> to vector<16x512xbf16>
    %10 = vector.extract_strided_slice %9 {offsets = [0, 0], sizes = [16, 100], strides = [1, 1]} : vector<16x512xbf16> to vector<16x100xbf16>
    %11 = vector.extract_strided_slice %9 {offsets = [0, 128], sizes = [16, 100], strides = [1, 1]} : vector<16x512xbf16> to vector<16x100xbf16>
    %12 = vector.extract_strided_slice %9 {offsets = [0, 256], sizes = [16, 100], strides = [1, 1]} : vector<16x512xbf16> to vector<16x100xbf16>
    %13 = vector.extract_strided_slice %9 {offsets = [0, 384], sizes = [16, 100], strides = [1, 1]} : vector<16x512xbf16> to vector<16x100xbf16>
    %14 = vector.extract_strided_slice %9 {offsets = [0, 1], sizes = [16, 100], strides = [1, 1]} : vector<16x512xbf16> to vector<16x100xbf16>
    %15 = vector.extract_strided_slice %9 {offsets = [0, 129], sizes = [16, 100], strides = [1, 1]} : vector<16x512xbf16> to vector<16x100xbf16>
    %16 = vector.extract_strided_slice %9 {offsets = [0, 257], sizes = [16, 100], strides = [1, 1]} : vector<16x512xbf16> to vector<16x100xbf16>
    %17 = vector.extract_strided_slice %9 {offsets = [0, 385], sizes = [16, 100], strides = [1, 1]} : vector<16x512xbf16> to vector<16x100xbf16>
    %18 = vector.extract_strided_slice %9 {offsets = [0, 10], sizes = [16, 100], strides = [1, 1]} : vector<16x512xbf16> to vector<16x100xbf16>
    %19 = vector.extract_strided_slice %9 {offsets = [0, 138], sizes = [16, 100], strides = [1, 1]} : vector<16x512xbf16> to vector<16x100xbf16>
    %20 = vector.extract_strided_slice %9 {offsets = [0, 266], sizes = [16, 100], strides = [1, 1]} : vector<16x512xbf16> to vector<16x100xbf16>
    %21 = vector.extract_strided_slice %9 {offsets = [0, 394], sizes = [16, 100], strides = [1, 1]} : vector<16x512xbf16> to vector<16x100xbf16>
    %22 = vector.extract_strided_slice %9 {offsets = [0, 11], sizes = [16, 100], strides = [1, 1]} : vector<16x512xbf16> to vector<16x100xbf16>
    %23 = vector.extract_strided_slice %9 {offsets = [0, 139], sizes = [16, 100], strides = [1, 1]} : vector<16x512xbf16> to vector<16x100xbf16>
    %24 = vector.extract_strided_slice %9 {offsets = [0, 267], sizes = [16, 100], strides = [1, 1]} : vector<16x512xbf16> to vector<16x100xbf16>
    %25 = vector.extract_strided_slice %9 {offsets = [0, 395], sizes = [16, 100], strides = [1, 1]} : vector<16x512xbf16> to vector<16x100xbf16>
    %26 = tpu.concatenate %10, %11, %12, %13, %14, %15, %16, %17, %18, %19, %20, %21, %22, %23, %24, %25 in 0 : vector<16x100xbf16>, vector<16x100xbf16>, vector<16x100xbf16>, vector<16x100xbf16>, vector<16x100xbf16>, vector<16x100xbf16>, vector<16x100xbf16>, vector<16x100xbf16>, vector<16x100xbf16>, vector<16x100xbf16>, vector<16x100xbf16>, vector<16x100xbf16>, vector<16x100xbf16>, vector<16x100xbf16>, vector<16x100xbf16>, vector<16x100xbf16> -> vector<256x100xbf16>
    %c0_7 = arith.constant 0 : index
    %c0_8 = arith.constant 0 : index
    %27 = vector.load %arg4[%c0_7, %c0_8] : memref<32x256xbf16, #tpu.memory_space<vmem>>, vector<32x256xbf16>
    %cst_9 = arith.constant dense<0.000000e+00> : vector<32x100xf32>
    %28 = tpu.matmul %27, %26, %cst_9 {dimension_numbers = #tpu.dot_dimension_numbers<[1], [0], [0], [1], [0, 0, 1, 1], [], []>} : vector<32x256xbf16>, vector<256x100xbf16>, vector<32x100xf32> -> vector<32x100xf32>
    %c0_10 = arith.constant 0 : index
    %c0_11 = arith.constant 0 : index
    %29 = vector.load %arg5[%c0_10, %c0_11] : memref<32x1xf32, #tpu.memory_space<vmem>>, vector<32x1xf32>
    %30 = vector.broadcast %29 : vector<32x1xf32> to vector<32x100xf32>
    %31 = arith.addf %28, %30 : vector<32x100xf32>
    %cst_12 = arith.constant 0.000000e+00 : f32
    %32 = vector.broadcast %cst_12 : f32 to vector<32x100xf32>
    %33 = arith.maximumf %31, %32 : vector<32x100xf32>
    %c0_13 = arith.constant 0 : index
    %c0_14 = arith.constant 0 : index
    %34 = vector.load %arg7[%c0_13, %c0_14] : memref<1x256xf32, #tpu.memory_space<vmem>>, vector<1x256xf32>
    %35 = vector.extract_strided_slice %33 {offsets = [0, 0], sizes = [1, 96], strides = [1, 1]} : vector<32x100xf32> to vector<1x96xf32>
    %36 = arith.truncf %35 : vector<1x96xf32> to vector<1x96xbf16>
    %c0_15 = arith.constant 0 : index
    %c0_16 = arith.constant 0 : index
    %37 = vector.load %arg6[%c0_15, %c0_16] : memref<3072x256xbf16, #tpu.memory_space<vmem>>, vector<96x256xbf16>
    %cst_17 = arith.constant dense<0.000000e+00> : vector<1x256xf32>
    %38 = tpu.matmul %36, %37, %cst_17 {dimension_numbers = #tpu.dot_dimension_numbers<[1], [0], [0], [1], [0, 0, 1, 1], [], []>} : vector<1x96xbf16>, vector<96x256xbf16>, vector<1x256xf32> -> vector<1x256xf32>
    %39 = arith.addf %34, %38 : vector<1x256xf32>
    %40 = vector.extract_strided_slice %33 {offsets = [1, 0], sizes = [1, 96], strides = [1, 1]} : vector<32x100xf32> to vector<1x96xf32>
    %41 = arith.truncf %40 : vector<1x96xf32> to vector<1x96xbf16>
    %c96 = arith.constant 96 : index
    %c0_18 = arith.constant 0 : index
    %42 = vector.load %arg6[%c96, %c0_18] : memref<3072x256xbf16, #tpu.memory_space<vmem>>, vector<96x256xbf16>
    %cst_19 = arith.constant dense<0.000000e+00> : vector<1x256xf32>
    %43 = tpu.matmul %41, %42, %cst_19 {dimension_numbers = #tpu.dot_dimension_numbers<[1], [0], [0], [1], [0, 0, 1, 1], [], []>} : vector<1x96xbf16>, vector<96x256xbf16>, vector<1x256xf32> -> vector<1x256xf32>
    %44 = arith.addf %39, %43 : vector<1x256xf32>
    %45 = vector.extract_strided_slice %33 {offsets = [2, 0], sizes = [1, 96], strides = [1, 1]} : vector<32x100xf32> to vector<1x96xf32>
    %46 = arith.truncf %45 : vector<1x96xf32> to vector<1x96xbf16>
    %c192 = arith.constant 192 : index
    %c0_20 = arith.constant 0 : index
    %47 = vector.load %arg6[%c192, %c0_20] : memref<3072x256xbf16, #tpu.memory_space<vmem>>, vector<96x256xbf16>
    %cst_21 = arith.constant dense<0.000000e+00> : vector<1x256xf32>
    %48 = tpu.matmul %46, %47, %cst_21 {dimension_numbers = #tpu.dot_dimension_numbers<[1], [0], [0], [1], [0, 0, 1, 1], [], []>} : vector<1x96xbf16>, vector<96x256xbf16>, vector<1x256xf32> -> vector<1x256xf32>
    %49 = arith.addf %44, %48 : vector<1x256xf32>
    %50 = vector.extract_strided_slice %33 {offsets = [3, 0], sizes = [1, 96], strides = [1, 1]} : vector<32x100xf32> to vector<1x96xf32>
    %51 = arith.truncf %50 : vector<1x96xf32> to vector<1x96xbf16>
    %c288 = arith.constant 288 : index
    %c0_22 = arith.constant 0 : index
    %52 = vector.load %arg6[%c288, %c0_22] : memref<3072x256xbf16, #tpu.memory_space<vmem>>, vector<96x256xbf16>
    %cst_23 = arith.constant dense<0.000000e+00> : vector<1x256xf32>
    %53 = tpu.matmul %51, %52, %cst_23 {dimension_numbers = #tpu.dot_dimension_numbers<[1], [0], [0], [1], [0, 0, 1, 1], [], []>} : vector<1x96xbf16>, vector<96x256xbf16>, vector<1x256xf32> -> vector<1x256xf32>
    %54 = arith.addf %49, %53 : vector<1x256xf32>
    %55 = vector.extract_strided_slice %33 {offsets = [4, 0], sizes = [1, 96], strides = [1, 1]} : vector<32x100xf32> to vector<1x96xf32>
    %56 = arith.truncf %55 : vector<1x96xf32> to vector<1x96xbf16>
    %c384 = arith.constant 384 : index
    %c0_24 = arith.constant 0 : index
    %57 = vector.load %arg6[%c384, %c0_24] : memref<3072x256xbf16, #tpu.memory_space<vmem>>, vector<96x256xbf16>
    %cst_25 = arith.constant dense<0.000000e+00> : vector<1x256xf32>
    %58 = tpu.matmul %56, %57, %cst_25 {dimension_numbers = #tpu.dot_dimension_numbers<[1], [0], [0], [1], [0, 0, 1, 1], [], []>} : vector<1x96xbf16>, vector<96x256xbf16>, vector<1x256xf32> -> vector<1x256xf32>
    %59 = arith.addf %54, %58 : vector<1x256xf32>
    %60 = vector.extract_strided_slice %33 {offsets = [5, 0], sizes = [1, 96], strides = [1, 1]} : vector<32x100xf32> to vector<1x96xf32>
    %61 = arith.truncf %60 : vector<1x96xf32> to vector<1x96xbf16>
    %c480 = arith.constant 480 : index
    %c0_26 = arith.constant 0 : index
    %62 = vector.load %arg6[%c480, %c0_26] : memref<3072x256xbf16, #tpu.memory_space<vmem>>, vector<96x256xbf16>
    %cst_27 = arith.constant dense<0.000000e+00> : vector<1x256xf32>
    %63 = tpu.matmul %61, %62, %cst_27 {dimension_numbers = #tpu.dot_dimension_numbers<[1], [0], [0], [1], [0, 0, 1, 1], [], []>} : vector<1x96xbf16>, vector<96x256xbf16>, vector<1x256xf32> -> vector<1x256xf32>
    %64 = arith.addf %59, %63 : vector<1x256xf32>
    %65 = vector.extract_strided_slice %33 {offsets = [6, 0], sizes = [1, 96], strides = [1, 1]} : vector<32x100xf32> to vector<1x96xf32>
    %66 = arith.truncf %65 : vector<1x96xf32> to vector<1x96xbf16>
    %c576 = arith.constant 576 : index
    %c0_28 = arith.constant 0 : index
    %67 = vector.load %arg6[%c576, %c0_28] : memref<3072x256xbf16, #tpu.memory_space<vmem>>, vector<96x256xbf16>
    %cst_29 = arith.constant dense<0.000000e+00> : vector<1x256xf32>
    %68 = tpu.matmul %66, %67, %cst_29 {dimension_numbers = #tpu.dot_dimension_numbers<[1], [0], [0], [1], [0, 0, 1, 1], [], []>} : vector<1x96xbf16>, vector<96x256xbf16>, vector<1x256xf32> -> vector<1x256xf32>
    %69 = arith.addf %64, %68 : vector<1x256xf32>
    %70 = vector.extract_strided_slice %33 {offsets = [7, 0], sizes = [1, 96], strides = [1, 1]} : vector<32x100xf32> to vector<1x96xf32>
    %71 = arith.truncf %70 : vector<1x96xf32> to vector<1x96xbf16>
    %c672 = arith.constant 672 : index
    %c0_30 = arith.constant 0 : index
    %72 = vector.load %arg6[%c672, %c0_30] : memref<3072x256xbf16, #tpu.memory_space<vmem>>, vector<96x256xbf16>
    %cst_31 = arith.constant dense<0.000000e+00> : vector<1x256xf32>
    %73 = tpu.matmul %71, %72, %cst_31 {dimension_numbers = #tpu.dot_dimension_numbers<[1], [0], [0], [1], [0, 0, 1, 1], [], []>} : vector<1x96xbf16>, vector<96x256xbf16>, vector<1x256xf32> -> vector<1x256xf32>
    %74 = arith.addf %69, %73 : vector<1x256xf32>
    %75 = vector.extract_strided_slice %33 {offsets = [8, 0], sizes = [1, 96], strides = [1, 1]} : vector<32x100xf32> to vector<1x96xf32>
    %76 = arith.truncf %75 : vector<1x96xf32> to vector<1x96xbf16>
    %c768 = arith.constant 768 : index
    %c0_32 = arith.constant 0 : index
    %77 = vector.load %arg6[%c768, %c0_32] : memref<3072x256xbf16, #tpu.memory_space<vmem>>, vector<96x256xbf16>
    %cst_33 = arith.constant dense<0.000000e+00> : vector<1x256xf32>
    %78 = tpu.matmul %76, %77, %cst_33 {dimension_numbers = #tpu.dot_dimension_numbers<[1], [0], [0], [1], [0, 0, 1, 1], [], []>} : vector<1x96xbf16>, vector<96x256xbf16>, vector<1x256xf32> -> vector<1x256xf32>
    %79 = arith.addf %74, %78 : vector<1x256xf32>
    %80 = vector.extract_strided_slice %33 {offsets = [9, 0], sizes = [1, 96], strides = [1, 1]} : vector<32x100xf32> to vector<1x96xf32>
    %81 = arith.truncf %80 : vector<1x96xf32> to vector<1x96xbf16>
    %c864 = arith.constant 864 : index
    %c0_34 = arith.constant 0 : index
    %82 = vector.load %arg6[%c864, %c0_34] : memref<3072x256xbf16, #tpu.memory_space<vmem>>, vector<96x256xbf16>
    %cst_35 = arith.constant dense<0.000000e+00> : vector<1x256xf32>
    %83 = tpu.matmul %81, %82, %cst_35 {dimension_numbers = #tpu.dot_dimension_numbers<[1], [0], [0], [1], [0, 0, 1, 1], [], []>} : vector<1x96xbf16>, vector<96x256xbf16>, vector<1x256xf32> -> vector<1x256xf32>
    %84 = arith.addf %79, %83 : vector<1x256xf32>
    %85 = vector.extract_strided_slice %33 {offsets = [10, 0], sizes = [1, 96], strides = [1, 1]} : vector<32x100xf32> to vector<1x96xf32>
    %86 = arith.truncf %85 : vector<1x96xf32> to vector<1x96xbf16>
    %c960 = arith.constant 960 : index
    %c0_36 = arith.constant 0 : index
    %87 = vector.load %arg6[%c960, %c0_36] : memref<3072x256xbf16, #tpu.memory_space<vmem>>, vector<96x256xbf16>
    %cst_37 = arith.constant dense<0.000000e+00> : vector<1x256xf32>
    %88 = tpu.matmul %86, %87, %cst_37 {dimension_numbers = #tpu.dot_dimension_numbers<[1], [0], [0], [1], [0, 0, 1, 1], [], []>} : vector<1x96xbf16>, vector<96x256xbf16>, vector<1x256xf32> -> vector<1x256xf32>
    %89 = arith.addf %84, %88 : vector<1x256xf32>
    %90 = vector.extract_strided_slice %33 {offsets = [11, 0], sizes = [1, 96], strides = [1, 1]} : vector<32x100xf32> to vector<1x96xf32>
    %91 = arith.truncf %90 : vector<1x96xf32> to vector<1x96xbf16>
    %c1056 = arith.constant 1056 : index
    %c0_38 = arith.constant 0 : index
    %92 = vector.load %arg6[%c1056, %c0_38] : memref<3072x256xbf16, #tpu.memory_space<vmem>>, vector<96x256xbf16>
    %cst_39 = arith.constant dense<0.000000e+00> : vector<1x256xf32>
    %93 = tpu.matmul %91, %92, %cst_39 {dimension_numbers = #tpu.dot_dimension_numbers<[1], [0], [0], [1], [0, 0, 1, 1], [], []>} : vector<1x96xbf16>, vector<96x256xbf16>, vector<1x256xf32> -> vector<1x256xf32>
    %94 = arith.addf %89, %93 : vector<1x256xf32>
    %95 = vector.extract_strided_slice %33 {offsets = [12, 0], sizes = [1, 96], strides = [1, 1]} : vector<32x100xf32> to vector<1x96xf32>
    %96 = arith.truncf %95 : vector<1x96xf32> to vector<1x96xbf16>
    %c1152 = arith.constant 1152 : index
    %c0_40 = arith.constant 0 : index
    %97 = vector.load %arg6[%c1152, %c0_40] : memref<3072x256xbf16, #tpu.memory_space<vmem>>, vector<96x256xbf16>
    %cst_41 = arith.constant dense<0.000000e+00> : vector<1x256xf32>
    %98 = tpu.matmul %96, %97, %cst_41 {dimension_numbers = #tpu.dot_dimension_numbers<[1], [0], [0], [1], [0, 0, 1, 1], [], []>} : vector<1x96xbf16>, vector<96x256xbf16>, vector<1x256xf32> -> vector<1x256xf32>
    %99 = arith.addf %94, %98 : vector<1x256xf32>
    %100 = vector.extract_strided_slice %33 {offsets = [13, 0], sizes = [1, 96], strides = [1, 1]} : vector<32x100xf32> to vector<1x96xf32>
    %101 = arith.truncf %100 : vector<1x96xf32> to vector<1x96xbf16>
    %c1248 = arith.constant 1248 : index
    %c0_42 = arith.constant 0 : index
    %102 = vector.load %arg6[%c1248, %c0_42] : memref<3072x256xbf16, #tpu.memory_space<vmem>>, vector<96x256xbf16>
    %cst_43 = arith.constant dense<0.000000e+00> : vector<1x256xf32>
    %103 = tpu.matmul %101, %102, %cst_43 {dimension_numbers = #tpu.dot_dimension_numbers<[1], [0], [0], [1], [0, 0, 1, 1], [], []>} : vector<1x96xbf16>, vector<96x256xbf16>, vector<1x256xf32> -> vector<1x256xf32>
    %104 = arith.addf %99, %103 : vector<1x256xf32>
    %105 = vector.extract_strided_slice %33 {offsets = [14, 0], sizes = [1, 96], strides = [1, 1]} : vector<32x100xf32> to vector<1x96xf32>
    %106 = arith.truncf %105 : vector<1x96xf32> to vector<1x96xbf16>
    %c1344 = arith.constant 1344 : index
    %c0_44 = arith.constant 0 : index
    %107 = vector.load %arg6[%c1344, %c0_44] : memref<3072x256xbf16, #tpu.memory_space<vmem>>, vector<96x256xbf16>
    %cst_45 = arith.constant dense<0.000000e+00> : vector<1x256xf32>
    %108 = tpu.matmul %106, %107, %cst_45 {dimension_numbers = #tpu.dot_dimension_numbers<[1], [0], [0], [1], [0, 0, 1, 1], [], []>} : vector<1x96xbf16>, vector<96x256xbf16>, vector<1x256xf32> -> vector<1x256xf32>
    %109 = arith.addf %104, %108 : vector<1x256xf32>
    %110 = vector.extract_strided_slice %33 {offsets = [15, 0], sizes = [1, 96], strides = [1, 1]} : vector<32x100xf32> to vector<1x96xf32>
    %111 = arith.truncf %110 : vector<1x96xf32> to vector<1x96xbf16>
    %c1440 = arith.constant 1440 : index
    %c0_46 = arith.constant 0 : index
    %112 = vector.load %arg6[%c1440, %c0_46] : memref<3072x256xbf16, #tpu.memory_space<vmem>>, vector<96x256xbf16>
    %cst_47 = arith.constant dense<0.000000e+00> : vector<1x256xf32>
    %113 = tpu.matmul %111, %112, %cst_47 {dimension_numbers = #tpu.dot_dimension_numbers<[1], [0], [0], [1], [0, 0, 1, 1], [], []>} : vector<1x96xbf16>, vector<96x256xbf16>, vector<1x256xf32> -> vector<1x256xf32>
    %114 = arith.addf %109, %113 : vector<1x256xf32>
    %115 = vector.extract_strided_slice %33 {offsets = [16, 0], sizes = [1, 96], strides = [1, 1]} : vector<32x100xf32> to vector<1x96xf32>
    %116 = arith.truncf %115 : vector<1x96xf32> to vector<1x96xbf16>
    %c1536 = arith.constant 1536 : index
    %c0_48 = arith.constant 0 : index
    %117 = vector.load %arg6[%c1536, %c0_48] : memref<3072x256xbf16, #tpu.memory_space<vmem>>, vector<96x256xbf16>
    %cst_49 = arith.constant dense<0.000000e+00> : vector<1x256xf32>
    %118 = tpu.matmul %116, %117, %cst_49 {dimension_numbers = #tpu.dot_dimension_numbers<[1], [0], [0], [1], [0, 0, 1, 1], [], []>} : vector<1x96xbf16>, vector<96x256xbf16>, vector<1x256xf32> -> vector<1x256xf32>
    %119 = arith.addf %114, %118 : vector<1x256xf32>
    %120 = vector.extract_strided_slice %33 {offsets = [17, 0], sizes = [1, 96], strides = [1, 1]} : vector<32x100xf32> to vector<1x96xf32>
    %121 = arith.truncf %120 : vector<1x96xf32> to vector<1x96xbf16>
    %c1632 = arith.constant 1632 : index
    %c0_50 = arith.constant 0 : index
    %122 = vector.load %arg6[%c1632, %c0_50] : memref<3072x256xbf16, #tpu.memory_space<vmem>>, vector<96x256xbf16>
    %cst_51 = arith.constant dense<0.000000e+00> : vector<1x256xf32>
    %123 = tpu.matmul %121, %122, %cst_51 {dimension_numbers = #tpu.dot_dimension_numbers<[1], [0], [0], [1], [0, 0, 1, 1], [], []>} : vector<1x96xbf16>, vector<96x256xbf16>, vector<1x256xf32> -> vector<1x256xf32>
    %124 = arith.addf %119, %123 : vector<1x256xf32>
    %125 = vector.extract_strided_slice %33 {offsets = [18, 0], sizes = [1, 96], strides = [1, 1]} : vector<32x100xf32> to vector<1x96xf32>
    %126 = arith.truncf %125 : vector<1x96xf32> to vector<1x96xbf16>
    %c1728 = arith.constant 1728 : index
    %c0_52 = arith.constant 0 : index
    %127 = vector.load %arg6[%c1728, %c0_52] : memref<3072x256xbf16, #tpu.memory_space<vmem>>, vector<96x256xbf16>
    %cst_53 = arith.constant dense<0.000000e+00> : vector<1x256xf32>
    %128 = tpu.matmul %126, %127, %cst_53 {dimension_numbers = #tpu.dot_dimension_numbers<[1], [0], [0], [1], [0, 0, 1, 1], [], []>} : vector<1x96xbf16>, vector<96x256xbf16>, vector<1x256xf32> -> vector<1x256xf32>
    %129 = arith.addf %124, %128 : vector<1x256xf32>
    %130 = vector.extract_strided_slice %33 {offsets = [19, 0], sizes = [1, 96], strides = [1, 1]} : vector<32x100xf32> to vector<1x96xf32>
    %131 = arith.truncf %130 : vector<1x96xf32> to vector<1x96xbf16>
    %c1824 = arith.constant 1824 : index
    %c0_54 = arith.constant 0 : index
    %132 = vector.load %arg6[%c1824, %c0_54] : memref<3072x256xbf16, #tpu.memory_space<vmem>>, vector<96x256xbf16>
    %cst_55 = arith.constant dense<0.000000e+00> : vector<1x256xf32>
    %133 = tpu.matmul %131, %132, %cst_55 {dimension_numbers = #tpu.dot_dimension_numbers<[1], [0], [0], [1], [0, 0, 1, 1], [], []>} : vector<1x96xbf16>, vector<96x256xbf16>, vector<1x256xf32> -> vector<1x256xf32>
    %134 = arith.addf %129, %133 : vector<1x256xf32>
    %135 = vector.extract_strided_slice %33 {offsets = [20, 0], sizes = [1, 96], strides = [1, 1]} : vector<32x100xf32> to vector<1x96xf32>
    %136 = arith.truncf %135 : vector<1x96xf32> to vector<1x96xbf16>
    %c1920 = arith.constant 1920 : index
    %c0_56 = arith.constant 0 : index
    %137 = vector.load %arg6[%c1920, %c0_56] : memref<3072x256xbf16, #tpu.memory_space<vmem>>, vector<96x256xbf16>
    %cst_57 = arith.constant dense<0.000000e+00> : vector<1x256xf32>
    %138 = tpu.matmul %136, %137, %cst_57 {dimension_numbers = #tpu.dot_dimension_numbers<[1], [0], [0], [1], [0, 0, 1, 1], [], []>} : vector<1x96xbf16>, vector<96x256xbf16>, vector<1x256xf32> -> vector<1x256xf32>
    %139 = arith.addf %134, %138 : vector<1x256xf32>
    %140 = vector.extract_strided_slice %33 {offsets = [21, 0], sizes = [1, 96], strides = [1, 1]} : vector<32x100xf32> to vector<1x96xf32>
    %141 = arith.truncf %140 : vector<1x96xf32> to vector<1x96xbf16>
    %c2016 = arith.constant 2016 : index
    %c0_58 = arith.constant 0 : index
    %142 = vector.load %arg6[%c2016, %c0_58] : memref<3072x256xbf16, #tpu.memory_space<vmem>>, vector<96x256xbf16>
    %cst_59 = arith.constant dense<0.000000e+00> : vector<1x256xf32>
    %143 = tpu.matmul %141, %142, %cst_59 {dimension_numbers = #tpu.dot_dimension_numbers<[1], [0], [0], [1], [0, 0, 1, 1], [], []>} : vector<1x96xbf16>, vector<96x256xbf16>, vector<1x256xf32> -> vector<1x256xf32>
    %144 = arith.addf %139, %143 : vector<1x256xf32>
    %145 = vector.extract_strided_slice %33 {offsets = [22, 0], sizes = [1, 96], strides = [1, 1]} : vector<32x100xf32> to vector<1x96xf32>
    %146 = arith.truncf %145 : vector<1x96xf32> to vector<1x96xbf16>
    %c2112 = arith.constant 2112 : index
    %c0_60 = arith.constant 0 : index
    %147 = vector.load %arg6[%c2112, %c0_60] : memref<3072x256xbf16, #tpu.memory_space<vmem>>, vector<96x256xbf16>
    %cst_61 = arith.constant dense<0.000000e+00> : vector<1x256xf32>
    %148 = tpu.matmul %146, %147, %cst_61 {dimension_numbers = #tpu.dot_dimension_numbers<[1], [0], [0], [1], [0, 0, 1, 1], [], []>} : vector<1x96xbf16>, vector<96x256xbf16>, vector<1x256xf32> -> vector<1x256xf32>
    %149 = arith.addf %144, %148 : vector<1x256xf32>
    %150 = vector.extract_strided_slice %33 {offsets = [23, 0], sizes = [1, 96], strides = [1, 1]} : vector<32x100xf32> to vector<1x96xf32>
    %151 = arith.truncf %150 : vector<1x96xf32> to vector<1x96xbf16>
    %c2208 = arith.constant 2208 : index
    %c0_62 = arith.constant 0 : index
    %152 = vector.load %arg6[%c2208, %c0_62] : memref<3072x256xbf16, #tpu.memory_space<vmem>>, vector<96x256xbf16>
    %cst_63 = arith.constant dense<0.000000e+00> : vector<1x256xf32>
    %153 = tpu.matmul %151, %152, %cst_63 {dimension_numbers = #tpu.dot_dimension_numbers<[1], [0], [0], [1], [0, 0, 1, 1], [], []>} : vector<1x96xbf16>, vector<96x256xbf16>, vector<1x256xf32> -> vector<1x256xf32>
    %154 = arith.addf %149, %153 : vector<1x256xf32>
    %155 = vector.extract_strided_slice %33 {offsets = [24, 0], sizes = [1, 96], strides = [1, 1]} : vector<32x100xf32> to vector<1x96xf32>
    %156 = arith.truncf %155 : vector<1x96xf32> to vector<1x96xbf16>
    %c2304 = arith.constant 2304 : index
    %c0_64 = arith.constant 0 : index
    %157 = vector.load %arg6[%c2304, %c0_64] : memref<3072x256xbf16, #tpu.memory_space<vmem>>, vector<96x256xbf16>
    %cst_65 = arith.constant dense<0.000000e+00> : vector<1x256xf32>
    %158 = tpu.matmul %156, %157, %cst_65 {dimension_numbers = #tpu.dot_dimension_numbers<[1], [0], [0], [1], [0, 0, 1, 1], [], []>} : vector<1x96xbf16>, vector<96x256xbf16>, vector<1x256xf32> -> vector<1x256xf32>
    %159 = arith.addf %154, %158 : vector<1x256xf32>
    %160 = vector.extract_strided_slice %33 {offsets = [25, 0], sizes = [1, 96], strides = [1, 1]} : vector<32x100xf32> to vector<1x96xf32>
    %161 = arith.truncf %160 : vector<1x96xf32> to vector<1x96xbf16>
    %c2400 = arith.constant 2400 : index
    %c0_66 = arith.constant 0 : index
    %162 = vector.load %arg6[%c2400, %c0_66] : memref<3072x256xbf16, #tpu.memory_space<vmem>>, vector<96x256xbf16>
    %cst_67 = arith.constant dense<0.000000e+00> : vector<1x256xf32>
    %163 = tpu.matmul %161, %162, %cst_67 {dimension_numbers = #tpu.dot_dimension_numbers<[1], [0], [0], [1], [0, 0, 1, 1], [], []>} : vector<1x96xbf16>, vector<96x256xbf16>, vector<1x256xf32> -> vector<1x256xf32>
    %164 = arith.addf %159, %163 : vector<1x256xf32>
    %165 = vector.extract_strided_slice %33 {offsets = [26, 0], sizes = [1, 96], strides = [1, 1]} : vector<32x100xf32> to vector<1x96xf32>
    %166 = arith.truncf %165 : vector<1x96xf32> to vector<1x96xbf16>
    %c2496 = arith.constant 2496 : index
    %c0_68 = arith.constant 0 : index
    %167 = vector.load %arg6[%c2496, %c0_68] : memref<3072x256xbf16, #tpu.memory_space<vmem>>, vector<96x256xbf16>
    %cst_69 = arith.constant dense<0.000000e+00> : vector<1x256xf32>
    %168 = tpu.matmul %166, %167, %cst_69 {dimension_numbers = #tpu.dot_dimension_numbers<[1], [0], [0], [1], [0, 0, 1, 1], [], []>} : vector<1x96xbf16>, vector<96x256xbf16>, vector<1x256xf32> -> vector<1x256xf32>
    %169 = arith.addf %164, %168 : vector<1x256xf32>
    %170 = vector.extract_strided_slice %33 {offsets = [27, 0], sizes = [1, 96], strides = [1, 1]} : vector<32x100xf32> to vector<1x96xf32>
    %171 = arith.truncf %170 : vector<1x96xf32> to vector<1x96xbf16>
    %c2592 = arith.constant 2592 : index
    %c0_70 = arith.constant 0 : index
    %172 = vector.load %arg6[%c2592, %c0_70] : memref<3072x256xbf16, #tpu.memory_space<vmem>>, vector<96x256xbf16>
    %cst_71 = arith.constant dense<0.000000e+00> : vector<1x256xf32>
    %173 = tpu.matmul %171, %172, %cst_71 {dimension_numbers = #tpu.dot_dimension_numbers<[1], [0], [0], [1], [0, 0, 1, 1], [], []>} : vector<1x96xbf16>, vector<96x256xbf16>, vector<1x256xf32> -> vector<1x256xf32>
    %174 = arith.addf %169, %173 : vector<1x256xf32>
    %175 = vector.extract_strided_slice %33 {offsets = [28, 0], sizes = [1, 96], strides = [1, 1]} : vector<32x100xf32> to vector<1x96xf32>
    %176 = arith.truncf %175 : vector<1x96xf32> to vector<1x96xbf16>
    %c2688 = arith.constant 2688 : index
    %c0_72 = arith.constant 0 : index
    %177 = vector.load %arg6[%c2688, %c0_72] : memref<3072x256xbf16, #tpu.memory_space<vmem>>, vector<96x256xbf16>
    %cst_73 = arith.constant dense<0.000000e+00> : vector<1x256xf32>
    %178 = tpu.matmul %176, %177, %cst_73 {dimension_numbers = #tpu.dot_dimension_numbers<[1], [0], [0], [1], [0, 0, 1, 1], [], []>} : vector<1x96xbf16>, vector<96x256xbf16>, vector<1x256xf32> -> vector<1x256xf32>
    %179 = arith.addf %174, %178 : vector<1x256xf32>
    %180 = vector.extract_strided_slice %33 {offsets = [29, 0], sizes = [1, 96], strides = [1, 1]} : vector<32x100xf32> to vector<1x96xf32>
    %181 = arith.truncf %180 : vector<1x96xf32> to vector<1x96xbf16>
    %c2784 = arith.constant 2784 : index
    %c0_74 = arith.constant 0 : index
    %182 = vector.load %arg6[%c2784, %c0_74] : memref<3072x256xbf16, #tpu.memory_space<vmem>>, vector<96x256xbf16>
    %cst_75 = arith.constant dense<0.000000e+00> : vector<1x256xf32>
    %183 = tpu.matmul %181, %182, %cst_75 {dimension_numbers = #tpu.dot_dimension_numbers<[1], [0], [0], [1], [0, 0, 1, 1], [], []>} : vector<1x96xbf16>, vector<96x256xbf16>, vector<1x256xf32> -> vector<1x256xf32>
    %184 = arith.addf %179, %183 : vector<1x256xf32>
    %185 = vector.extract_strided_slice %33 {offsets = [30, 0], sizes = [1, 96], strides = [1, 1]} : vector<32x100xf32> to vector<1x96xf32>
    %186 = arith.truncf %185 : vector<1x96xf32> to vector<1x96xbf16>
    %c2880 = arith.constant 2880 : index
    %c0_76 = arith.constant 0 : index
    %187 = vector.load %arg6[%c2880, %c0_76] : memref<3072x256xbf16, #tpu.memory_space<vmem>>, vector<96x256xbf16>
    %cst_77 = arith.constant dense<0.000000e+00> : vector<1x256xf32>
    %188 = tpu.matmul %186, %187, %cst_77 {dimension_numbers = #tpu.dot_dimension_numbers<[1], [0], [0], [1], [0, 0, 1, 1], [], []>} : vector<1x96xbf16>, vector<96x256xbf16>, vector<1x256xf32> -> vector<1x256xf32>
    %189 = arith.addf %184, %188 : vector<1x256xf32>
    %190 = vector.extract_strided_slice %33 {offsets = [31, 0], sizes = [1, 96], strides = [1, 1]} : vector<32x100xf32> to vector<1x96xf32>
    %191 = arith.truncf %190 : vector<1x96xf32> to vector<1x96xbf16>
    %c2976 = arith.constant 2976 : index
    %c0_78 = arith.constant 0 : index
    %192 = vector.load %arg6[%c2976, %c0_78] : memref<3072x256xbf16, #tpu.memory_space<vmem>>, vector<96x256xbf16>
    %cst_79 = arith.constant dense<0.000000e+00> : vector<1x256xf32>
    %193 = tpu.matmul %191, %192, %cst_79 {dimension_numbers = #tpu.dot_dimension_numbers<[1], [0], [0], [1], [0, 0, 1, 1], [], []>} : vector<1x96xbf16>, vector<96x256xbf16>, vector<1x256xf32> -> vector<1x256xf32>
    %194 = arith.addf %189, %193 : vector<1x256xf32>
    %cst_80 = arith.constant 0.000000e+00 : f32
    %195 = vector.broadcast %cst_80 : f32 to vector<1x256xf32>
    %196 = arith.maximumf %194, %195 : vector<1x256xf32>
    %c0_81 = arith.constant 0 : index
    %c0_82 = arith.constant 0 : index
    %197 = vector.load %arg8[%c0_81, %c0_82] : memref<256x4xbf16, #tpu.memory_space<vmem>>, vector<256x4xbf16>
    %c0_83 = arith.constant 0 : index
    %c0_84 = arith.constant 0 : index
    %198 = vector.load %arg9[%c0_83, %c0_84] : memref<1x4xf32, #tpu.memory_space<vmem>>, vector<1x4xf32>
    %199 = arith.truncf %196 : vector<1x256xf32> to vector<1x256xbf16>
    %cst_85 = arith.constant dense<0.000000e+00> : vector<1x4xf32>
    %200 = tpu.matmul %199, %197, %cst_85 {dimension_numbers = #tpu.dot_dimension_numbers<[1], [0], [0], [1], [0, 0, 1, 1], [], []>} : vector<1x256xbf16>, vector<256x4xbf16>, vector<1x4xf32> -> vector<1x4xf32>
    %201 = arith.addf %200, %198 : vector<1x4xf32>
    %cst_86 = arith.constant dense<0xFF800000> : vector<1xf32>
    %202 = vector.multi_reduction <maximumf>, %201, %cst_86 [1] : vector<1x4xf32> to vector<1xf32>
    %203 = vector.shape_cast %202 : vector<1xf32> to vector<1x1xf32>
    %204 = vector.broadcast %203 : vector<1x1xf32> to vector<1x4xf32>
    %205 = arith.subf %201, %204 : vector<1x4xf32>
    %206 = math.exp %205 : vector<1x4xf32>
    %cst_87 = arith.constant dense<0.000000e+00> : vector<1xf32>
    %207 = vector.multi_reduction <add>, %206, %cst_87 [1] : vector<1x4xf32> to vector<1xf32>
    %208 = vector.shape_cast %207 : vector<1xf32> to vector<1x1xf32>
    %209 = vector.broadcast %208 : vector<1x1xf32> to vector<1x4xf32>
    %210 = arith.divf %206, %209 : vector<1x4xf32>
    %c0_88 = arith.constant 0 : index
    %c0_89 = arith.constant 0 : index
    %c0_90 = arith.constant 0 : index
    %211 = vector.load %arg10[%c0_88, %c0_89, %c0_90] : memref<1x1x4xf32, #tpu.memory_space<vmem>>, vector<1x1x4xf32>
    %212 = vector.shape_cast %211 : vector<1x1x4xf32> to vector<1x4xf32>
    %213 = vector.shape_cast %210 : vector<1x4xf32> to vector<1x1x4xf32>
    tpu.vector_store %arg10[%c0_88, %c0_89, %c0_90], %213 {strides = array<i32>} : memref<1x1x4xf32, #tpu.memory_space<vmem>>, vector<1x1x4xf32>,
    return
  }
  func.func @transform_0(%arg0: i32) -> (i32, i32, i32) {
    %c0_i32 = arith.constant 0 : i32
    %c0_i32_0 = arith.constant 0 : i32
    %c0_i32_1 = arith.constant 0 : i32
    return %arg0, %c0_i32, %c0_i32_0 : i32, i32, i32
  }
  func.func @transform_1(%arg0: i32) -> (i32, i32) {
    %c0_i32 = arith.constant 0 : i32
    %c0_i32_0 = arith.constant 0 : i32
    %c0_i32_1 = arith.constant 0 : i32
    return %c0_i32, %c0_i32_0 : i32, i32
  }
  func.func @transform_2(%arg0: i32) -> (i32, i32) {
    %c0_i32 = arith.constant 0 : i32
    %c0_i32_0 = arith.constant 0 : i32
    %c0_i32_1 = arith.constant 0 : i32
    return %c0_i32, %c0_i32_0 : i32, i32
  }
  func.func @transform_3(%arg0: i32) -> (i32, i32) {
    %c0_i32 = arith.constant 0 : i32
    %c0_i32_0 = arith.constant 0 : i32
    %c0_i32_1 = arith.constant 0 : i32
    return %c0_i32, %c0_i32_0 : i32, i32
  }
  func.func @transform_4(%arg0: i32) -> (i32, i32) {
    %c0_i32 = arith.constant 0 : i32
    %c0_i32_0 = arith.constant 0 : i32
    %c0_i32_1 = arith.constant 0 : i32
    return %c0_i32, %c0_i32_0 : i32, i32
  }
  func.func @transform_5(%arg0: i32) -> (i32, i32) {
    %c0_i32 = arith.constant 0 : i32
    %c0_i32_0 = arith.constant 0 : i32
    %c0_i32_1 = arith.constant 0 : i32
    return %c0_i32, %c0_i32_0 : i32, i32
  }
  func.func @transform_6(%arg0: i32) -> (i32, i32) {
    %c0_i32 = arith.constant 0 : i32
    %c0_i32_0 = arith.constant 0 : i32
    %c0_i32_1 = arith.constant 0 : i32
    return %c0_i32, %c0_i32_0 : i32, i32
  }
  func.func @transform_7(%arg0: i32) -> (i32, i32) {
    %c0_i32 = arith.constant 0 : i32
    %c0_i32_0 = arith.constant 0 : i32
    %c0_i32_1 = arith.constant 0 : i32
    return %c0_i32, %c0_i32_0 : i32, i32
  }
  func.func @transform_8(%arg0: i32) -> (i32, i32) {
    %c0_i32 = arith.constant 0 : i32
    %c0_i32_0 = arith.constant 0 : i32
    %c0_i32_1 = arith.constant 0 : i32
    return %c0_i32, %c0_i32_0 : i32, i32
  }
  func.func @transform_9(%arg0: i32) -> (i32, i32, i32) {
    %c0_i32 = arith.constant 0 : i32
    %c0_i32_0 = arith.constant 0 : i32
    %c0_i32_1 = arith.constant 0 : i32
    return %arg0, %c0_i32, %c0_i32_0 : i32, i32, i32
  }
}

</mosaic_0001>

<bundles_post_ra>
// kernel: net_forward.1
= control target key start
LH: loop header
LB: loop body
LE: loop exit
PB: predicated region body
PF: predicated region fallthrough
CT: control target
= control target key end

     0   :  { %14 = vsyncpa [#allocation3], 0  ;;  %s8696_s0 = inlined_call_operand.vmem [shape: bf16[2,256,512], index: 0, kind: input, shape index: {}]   ;;  %s8697_s1 = inlined_call_operand.vmem [shape: bf16[16,256], index: 1, kind: input, shape index: {}]   ;;  %s8698_s2 = inlined_call_operand.vmem [shape: f32[16,1], index: 2, kind: input, shape index: {}]   ;;  %s8699_s3 = inlined_call_operand.vmem [shape: bf16[32,256], index: 3, kind: input, shape index: {}]   ;;  %s8700_s4 = inlined_call_operand.vmem [shape: f32[32,1], index: 4, kind: input, shape index: {}]   ;;  %s8701_s5 = inlined_call_operand.vmem [shape: bf16[3072,256], index: 5, kind: input, shape index: {}]   ;;  %s8702_s6 = inlined_call_operand.vmem [shape: f32[1,256], index: 6, kind: input, shape index: {}]   ;;  %s8703_s7 = inlined_call_operand.vmem [shape: bf16[256,4], index: 7, kind: input, shape index: {}]   ;;  %s8704_s8 = inlined_call_operand.vmem [shape: f32[1,4], index: 8, kind: input, shape index: {}]   ;;  %s8705_s9 = inlined_call_operand.hbm [shape: f32[2,1,4], index: 9, kind: output, shape index: {}]  }
   0x1   :  { %16 = vsyncpa [#allocation3 + $0x1], 0  ;;  %s7033_s30 = smov 0   ;;  %s7035_s10 = smov 0  }
   0x2   :  { %s7037_s11 = smov 0   ;;  %s7039_s12 = smov 0  }
   0x3 LB: > { %s7054_s13 = sadd.s32 4294967295, %s6975_s12   ;;  %s5604_s14 = sadd.s32 4294967294, %s6975_s12   ;;  %s6975_s12 = sphi %s7039_s12, %s8711_s12   ;;  %s6971_s11 = sphi %s7037_s11, %s8710_s11   ;;  %s6967_s10 = sphi %s7035_s10, %s8709_s10   ;;  %s6963_s30 = sphi %s7033_s30, %s8708_s30  }
   0x4   : > { %s7058_s15 = sadd.s32 1, %s6975_s12   ;;  %s223_s16 = sadd.s32 1, %s6971_s11 }
   0x5   : > { %s220_s17 = ssub.s32 %s6975_s12, %s7058_s15  ;;  %p233_p0 = scmp.ne.s32.totalorder %s6971_s11, %s6967_s10 }
   0x6   : > { %p221_p1 = scmp.eq.s32.totalorder %s220_s17, 0  ;;  %p234_p2 = scmp.eq.s32.totalorder %s7054_s13, 1 }
   0x7   : > { %p239_p3 = scmp.ne.s32.totalorder %s6967_s10, %s6963_s30  ;;  %p240_p4 = scmp.eq.s32.totalorder %s5604_s14, 1 }
   0x8   : > { %s7069_s18 = scalar_select %p221_p1, %s6971_s11, %s223_s16  }
   0x9   : > { %p7071_p5 = por %p234_p2, %p233_p0  ;;  %p7075_p6 = por %p240_p4, %p239_p3 }
   0xa   : > { %p5607_p7 = scmp.ge.s32.totalorder %s6975_s12, 1  ;;  %p290_p8 = scmp.lt.s32.totalorder %s6975_s12, 3 }
   0xc   : > { %p291_p9 = pnand %p5607_p7, %p290_p8 }
   0xd   : > { %p325_p10 = scmp.lt.s32.totalorder (!%p291_p9), %s7054_s13, 1  ;;  %v6310_v0 = vld [vmem:[%s8697_s1 + $0x4] ss:$8 sps:$4 sm:$0xff] (!%p291_p9)   ;;  %v6977_v1 = vmov (!%p291_p9), 0   ;;  %s6978_s22 = smov (!%p291_p9), 118   ;;  %vm1052_vm0 = vcmask (!%p291_p9), 785408  }
   0xe   : > { %294 = sbr.rel (%p291_p9) target bundleno = 1835 (0x72b), region = 56  ;;  %6210 = vset.pattern.permute.xlu0 (!%p291_p9), %v6977_v1  ;;  %v397_v2 = vld [vmem:[%s8698_s2] sm:$0xff] (!%p291_p9)  ;;  %v398_v3 = vld [vmem:[%s8698_s2 + $0x8] sm:$0xff] (!%p291_p9)  ;;  %6211 = vset.pattern.permute.xlu1 (!%p291_p9), %v6977_v1  ;;  %s6979_s23 = smov (!%p291_p9), 117   ;;  %vm5523_vm1 = vcmask (!%p291_p9), 24576  }
   0xf   : > { %401 = vperm.xlu0 (!%p291_p9), %6210, %v397_v2   ;;  %771 = vmatprep.mubr.bf16.mxu0 (!%p291_p9), %v6310_v0  ;;  %s6980_s24 = smov (!%p291_p9), 127   ;;  %s323_s29 = sand.u32 (!%p291_p9), 1, %s6967_s10  }
  0x10   : > { %814 = vmatprep.mubr.bf16.mxu1 (!%p291_p9), %v6310_v0  ;;  %s6112_s14 = sshll.u32 (!%p291_p9), %s7054_s13, 4  ;;  %s5537_s25 = scalar_lea.sflag (!%p291_p9), [#allocation3], %s323_s29 }
  0x13   : > { %406 = vperm.xlu0 (!%p291_p9), %6210, %v398_v3  }
  0x15   : > { %s326_s27 = scalar_select %p325_p10, %s7054_s13, 1 }
  0x16   : > { %s6982_s13 = smov [#allocation2]  }
  0x17   : > { %s6115_s28 = sshll.u32 %s326_s27, 9  ;;  %s6917_s27 = sshll.u32 %s6982_s13, 4  ;;  %s6918_s27 = int_to_ptr.vmem [resolvable:$false] %s6917_s27 }
  0x18   : > { %s7097_s16 = scalar_lea.vmem %s8696_s0, %s6115_s28 }
  0x19   : > { %v6212_v4 = vld [vmem:[%s7097_s16 + $0x4] ss:$16 sps:$4 sm:$0xff]   ;;  %v6214_v5 = vld [vmem:[%s7097_s16 + $0xc] ss:$16 sps:$4 sm:$0xff]   ;;  %v6216_v6 = vld [vmem:[%s7097_s16] ss:$16 sps:$4 sm:$0xff]  }
  0x1a   : > { %739 = vmatprep.subr.bf16.mxu0 %v6212_v4  ;;  %v6217_v7 = vld [vmem:[%s7097_s16 + $0x8] ss:$16 sps:$4 sm:$0xff]   ;;  %782 = vmatprep.subr.bf16.mxu1 %v6214_v5  ;;  %v6218_v8 = vld [vmem:[%s7097_s16 + $0x24] ss:$16 sps:$4 sm:$0xff]   ;;  %v6220_v9 = vld [vmem:[%s7097_s16 + $0x2c] ss:$16 sps:$4 sm:$0xff]  }
  0x1b   : > { %740 = vmatpush1.bf16.msra.mxu0 %v6216_v6  ;;  %783 = vmatpush1.bf16.msra.mxu1 %v6217_v7  ;;  %v6222_v10 = vld [vmem:[%s7097_s16 + $0x20] ss:$16 sps:$4 sm:$0xff]   ;;  %v6223_v11 = vld [vmem:[%s7097_s16 + $0x28] ss:$16 sps:$4 sm:$0xff]   ;;  %v6224_v12 = vld [vmem:[%s7097_s16 + $0x44] ss:$16 sps:$4 sm:$0xff]  }
  0x1c   : > { %741 = vmatprep.subr.bf16.mxu0 %v6218_v8  ;;  %784 = vmatprep.subr.bf16.mxu1 %v6220_v9  ;;  %v6226_v13 = vld [vmem:[%s7097_s16 + $0x4c] ss:$16 sps:$4 sm:$0xff]   ;;  %v6228_v14 = vld [vmem:[%s7097_s16 + $0x40] ss:$16 sps:$4 sm:$0xff]   ;;  %v6229_v15 = vld [vmem:[%s7097_s16 + $0x48] ss:$16 sps:$4 sm:$0xff]  }
  0x1d   : > { %v6230_v16 = vld [vmem:[%s7097_s16 + $0x64] ss:$16 sps:$4 sm:$0xff]   ;;  %v6232_v17 = vld [vmem:[%s7097_s16 + $0x6c] ss:$16 sps:$4 sm:$0xff]   ;;  %v6234_v18 = vld [vmem:[%s7097_s16 + $0x60] ss:$16 sps:$4 sm:$0xff]  }
  0x1e   : > { %v6235_v19 = vld [vmem:[%s7097_s16 + $0x68] ss:$16 sps:$4 sm:$0xff]   ;;  %v6236_v20 = vld [vmem:[%s7097_s16 + $0x84] ss:$16 sps:$4 sm:$0xff]   ;;  %v6238_v21 = vld [vmem:[%s7097_s16 + $0x8c] ss:$16 sps:$4 sm:$0xff]  }
  0x1f   : > { %742 = vmatpush1.bf16.msra.mxu0 %v6222_v10  ;;  %785 = vmatpush1.bf16.msra.mxu1 %v6223_v11  ;;  %v6240_v22 = vld [vmem:[%s7097_s16 + $0x80] ss:$16 sps:$4 sm:$0xff]   ;;  %v6241_v23 = vld [vmem:[%s7097_s16 + $0x88] ss:$16 sps:$4 sm:$0xff]   ;;  %v6242_v24 = vld [vmem:[%s7097_s16 + $0xa4] ss:$16 sps:$4 sm:$0xff]  }
  0x20   : > { %743 = vmatprep.subr.bf16.mxu0 %v6224_v12  ;;  %786 = vmatprep.subr.bf16.mxu1 %v6226_v13  ;;  %v6244_v25 = vld [vmem:[%s7097_s16 + $0xac] ss:$16 sps:$4 sm:$0xff]   ;;  %v6246_v26 = vld [vmem:[%s7097_s16 + $0xa0] ss:$16 sps:$4 sm:$0xff]   ;;  %v6247_v27 = vld [vmem:[%s7097_s16 + $0xa8] ss:$16 sps:$4 sm:$0xff]  }
  0x21   : > { %v6248_v28 = vld [vmem:[%s7097_s16 + $0xc4] ss:$16 sps:$4 sm:$0xff]   ;;  %v6250_v29 = vld [vmem:[%s7097_s16 + $0xcc] ss:$16 sps:$4 sm:$0xff]   ;;  %v6252_v30 = vld [vmem:[%s7097_s16 + $0xc0] ss:$16 sps:$4 sm:$0xff]  }
  0x22   : > { %v6253_v31 = vld [vmem:[%s7097_s16 + $0xc8] ss:$16 sps:$4 sm:$0xff]   ;;  %v6254_v32 = vld [vmem:[%s7097_s16 + $0xe4] ss:$16 sps:$4 sm:$0xff]   ;;  %v6256_v33 = vld [vmem:[%s7097_s16 + $0xec] ss:$16 sps:$4 sm:$0xff]  }
  0x23   : > { %744 = vmatpush1.bf16.msra.mxu0 %v6228_v14  ;;  %787 = vmatpush1.bf16.msra.mxu1 %v6229_v15  ;;  %v6258_v34 = vld [vmem:[%s7097_s16 + $0xe0] ss:$16 sps:$4 sm:$0xff]   ;;  %v6259_v35 = vld [vmem:[%s7097_s16 + $0xe8] ss:$16 sps:$4 sm:$0xff]   ;;  %v6260_v36 = vld [vmem:[%s7097_s16 + $0x104] ss:$16 sps:$4 sm:$0xff]  }
  0x24   : > { %745 = vmatprep.subr.bf16.mxu0 %v6230_v16  ;;  %788 = vmatprep.subr.bf16.mxu1 %v6232_v17  ;;  %v6262_v37 = vld [vmem:[%s7097_s16 + $0x10c] ss:$16 sps:$4 sm:$0xff]   ;;  %v6264_v38 = vld [vmem:[%s7097_s16 + $0x100] ss:$16 sps:$4 sm:$0xff]   ;;  %v6265_v39 = vld [vmem:[%s7097_s16 + $0x108] ss:$16 sps:$4 sm:$0xff]  }
  0x25   : > { %v6266_v40 = vld [vmem:[%s7097_s16 + $0x124] ss:$16 sps:$4 sm:$0xff]   ;;  %v6268_v41 = vld [vmem:[%s7097_s16 + $0x12c] ss:$16 sps:$4 sm:$0xff]   ;;  %v6270_v42 = vld [vmem:[%s7097_s16 + $0x120] ss:$16 sps:$4 sm:$0xff]  }
  0x26   : > { %v6271_v43 = vld [vmem:[%s7097_s16 + $0x128] ss:$16 sps:$4 sm:$0xff]   ;;  %v6272_v44 = vld [vmem:[%s7097_s16 + $0x144] ss:$16 sps:$4 sm:$0xff]   ;;  %v6274_v45 = vld [vmem:[%s7097_s16 + $0x14c] ss:$16 sps:$4 sm:$0xff]  }
  0x27   : > { %746 = vmatpush1.bf16.msra.mxu0 %v6234_v18  ;;  %789 = vmatpush1.bf16.msra.mxu1 %v6235_v19  ;;  %v6276_v46 = vld [vmem:[%s7097_s16 + $0x140] ss:$16 sps:$4 sm:$0xff]   ;;  %v6277_v47 = vld [vmem:[%s7097_s16 + $0x148] ss:$16 sps:$4 sm:$0xff]   ;;  %v6278_v48 = vld [vmem:[%s7097_s16 + $0x164] ss:$16 sps:$4 sm:$0xff]  }
  0x28   : > { %747 = vmatprep.subr.bf16.mxu0 %v6236_v20  ;;  %790 = vmatprep.subr.bf16.mxu1 %v6238_v21  ;;  %v6280_v49 = vld [vmem:[%s7097_s16 + $0x16c] ss:$16 sps:$4 sm:$0xff]   ;;  %v6282_v50 = vld [vmem:[%s7097_s16 + $0x160] ss:$16 sps:$4 sm:$0xff]   ;;  %v6283_v51 = vld [vmem:[%s7097_s16 + $0x168] ss:$16 sps:$4 sm:$0xff]  }
  0x29   : > { %v6284_v52 = vld [vmem:[%s7097_s16 + $0x184] ss:$16 sps:$4 sm:$0xff]   ;;  %v6286_v53 = vld [vmem:[%s7097_s16 + $0x18c] ss:$16 sps:$4 sm:$0xff]   ;;  %v6288_v54 = vld [vmem:[%s7097_s16 + $0x180] ss:$16 sps:$4 sm:$0xff]  }
  0x2a   : > { %v6289_v55 = vld [vmem:[%s7097_s16 + $0x188] ss:$16 sps:$4 sm:$0xff]   ;;  %v6290_v56 = vld [vmem:[%s7097_s16 + $0x1a4] ss:$16 sps:$4 sm:$0xff]   ;;  %v6292_v57 = vld [vmem:[%s7097_s16 + $0x1ac] ss:$16 sps:$4 sm:$0xff]  }
  0x2b   : > { %748 = vmatpush1.bf16.msra.mxu0 %v6240_v22  ;;  %791 = vmatpush1.bf16.msra.mxu1 %v6241_v23  ;;  %v6294_v58 = vld [vmem:[%s7097_s16 + $0x1a0] ss:$16 sps:$4 sm:$0xff]   ;;  %v6295_v59 = vld [vmem:[%s7097_s16 + $0x1a8] ss:$16 sps:$4 sm:$0xff]   ;;  %v6296_v60 = vld [vmem:[%s7097_s16 + $0x1c4] ss:$16 sps:$4 sm:$0xff]  }
  0x2c   : > { %749 = vmatprep.subr.bf16.mxu0 %v6242_v24  ;;  %792 = vmatprep.subr.bf16.mxu1 %v6244_v25  ;;  %v6298_v61 = vld [vmem:[%s7097_s16 + $0x1cc] ss:$16 sps:$4 sm:$0xff]   ;;  %v6300_v62 = vld [vmem:[%s7097_s16 + $0x1c0] ss:$16 sps:$4 sm:$0xff]   ;;  %v6301_v63 = vld [vmem:[%s7097_s16 + $0x1c8] ss:$16 sps:$4 sm:$0xff]  }
  0x2d   : > { %v6302_v0 = vld [vmem:[%s7097_s16 + $0x1e4] ss:$16 sps:$4 sm:$0xff]   ;;  %v6304_v2 = vld [vmem:[%s7097_s16 + $0x1ec] ss:$16 sps:$4 sm:$0xff]   ;;  %v6306_v3 = vld [vmem:[%s7097_s16 + $0x1e0] ss:$16 sps:$4 sm:$0xff]  }
  0x2e   : > { %v6307_v4 = vld [vmem:[%s7097_s16 + $0x1e8] ss:$16 sps:$4 sm:$0xff]   ;;  %s324_s16 = scalar_lea.vmem [#allocation2], %s323_s29 }
  0x2f   : > { %750 = vmatpush1.bf16.msra.mxu0 %v6246_v26  ;;  %793 = vmatpush1.bf16.msra.mxu1 %v6247_v27  ;;  %v6308_v5 = vld [vmem:[%s8697_s1] ss:$8 sps:$4 sm:$0xff]   ;;  %s5549_s17 = sshll.u32 %s324_s16, 4  ;;  %s8655_s17 = int_to_ptr.vmem [resolvable:$true] %s5549_s17 }
  0x30   : > { %751 = vmatprep.subr.bf16.mxu0 %v6248_v28  ;;  %794 = vmatprep.subr.bf16.mxu1 %v6250_v29  ;;  %s6913_s26 = scalar_lea.vmem %s8655_s17, 16  ;;  %p6920_p0 = scmp.lt.s32.totalorder %s8655_s17, %s6918_s27 }
  0x31   : > { %p6914_p11 = scmp.ne.s32.totalorder %s8655_s17, %s6913_s26 }
  0x33   : > { %752 = vmatpush1.bf16.msra.mxu0 %v6252_v30  ;;  %795 = vmatpush1.bf16.msra.mxu1 %v6253_v31  ;;  %p6915_p12 = pnand %p6914_p11, %p7071_p5 }
  0x34   : > { %753 = vmatprep.subr.bf16.mxu0 %v6254_v32  ;;  %796 = vmatprep.subr.bf16.mxu1 %v6256_v33 }
  0x35   : > { %p6916_p13 = pneg %p6915_p12 }
  0x37   : > { %754 = vmatpush1.bf16.msra.mxu0 %v6258_v34  ;;  %797 = vmatpush1.bf16.msra.mxu1 %v6259_v35 }
  0x38   : > { %755 = vmatprep.subr.bf16.mxu0 %v6260_v36  ;;  %798 = vmatprep.subr.bf16.mxu1 %v6262_v37  ;;  %v6313_v36 = vld [vmem:[%s8699_s3 + $0x4] ss:$8 sps:$4 sm:$0xff]  }
  0x39   : > { %v881_v37 = vld [vmem:[%s8700_s4] sm:$0xff] }
  0x3b   : > { %756 = vmatpush1.bf16.msra.mxu0 %v6264_v38  ;;  %799 = vmatpush1.bf16.msra.mxu1 %v6265_v39  ;;  %v883_v38 = vld [vmem:[%s8700_s4 + $0x10] sm:$0xff]  ;;  %v882_v39 = vld [vmem:[%s8700_s4 + $0x8] sm:$0xff] }
  0x3c   : > { %757 = vmatprep.subr.bf16.mxu0 %v6266_v40  ;;  %800 = vmatprep.subr.bf16.mxu1 %v6268_v41  ;;  %v6317_v40 = vld [vmem:[%s8701_s5] ss:$8 sps:$4 sm:$0xff]   ;;  %v6319_v41 = vld [vmem:[%s8701_s5 + $0x4] ss:$8 sps:$4 sm:$0xff]  }
  0x3f   : > { %758 = vmatpush1.bf16.msra.mxu0 %v6270_v42  ;;  %801 = vmatpush1.bf16.msra.mxu1 %v6271_v43  ;;  %v6325_v42 = vld [vmem:[%s8701_s5 + $0x14] ss:$8 sps:$4 sm:$0xff]   ;;  %v6323_v43 = vld [vmem:[%s8701_s5 + $0x10] ss:$8 sps:$4 sm:$0xff]  }
  0x40   : > { %759 = vmatprep.subr.bf16.mxu0 %v6272_v44  ;;  %802 = vmatprep.subr.bf16.mxu1 %v6274_v45  ;;  %v884_v44 = vld [vmem:[%s8700_s4 + $0x18] sm:$0xff]  ;;  %v6331_v45 = vld [vmem:[%s8701_s5 + $0x24] ss:$8 sps:$4 sm:$0xff]  }
  0x43   : > { %760 = vmatpush1.bf16.msra.mxu0 %v6276_v46  ;;  %803 = vmatpush1.bf16.msra.mxu1 %v6277_v47  ;;  %v6329_v46 = vld [vmem:[%s8701_s5 + $0x20] ss:$8 sps:$4 sm:$0xff]   ;;  %v6337_v47 = vld [vmem:[%s8701_s5 + $0x34] ss:$8 sps:$4 sm:$0xff]  }
  0x44   : > { %761 = vmatprep.subr.bf16.mxu0 %v6278_v48  ;;  %804 = vmatprep.subr.bf16.mxu1 %v6280_v49  ;;  %v6335_v48 = vld [vmem:[%s8701_s5 + $0x30] ss:$8 sps:$4 sm:$0xff]  }
  0x47   : > { %762 = vmatpush1.bf16.msra.mxu0 %v6282_v50  ;;  %805 = vmatpush1.bf16.msra.mxu1 %v6283_v51 }
  0x48   : > { %763 = vmatprep.subr.bf16.mxu0 %v6284_v52  ;;  %806 = vmatprep.subr.bf16.mxu1 %v6286_v53 }
  0x4b   : > { %764 = vmatpush1.bf16.msra.mxu0 %v6288_v54  ;;  %807 = vmatpush1.bf16.msra.mxu1 %v6289_v55 }
  0x4c   : > { %765 = vmatprep.subr.bf16.mxu0 %v6290_v56  ;;  %808 = vmatprep.subr.bf16.mxu1 %v6292_v57 }
  0x4f   : > { %766 = vmatpush1.bf16.msra.mxu0 %v6294_v58  ;;  %809 = vmatpush1.bf16.msra.mxu1 %v6295_v59 }
  0x50   : > { %767 = vmatprep.subr.bf16.mxu0 %v6296_v60  ;;  %810 = vmatprep.subr.bf16.mxu1 %v6298_v61  ;;  %v6322_v60 = vld [vmem:[%s8701_s5 + $0xc4] ss:$8 sps:$4 sm:$0xff]  }
  0x53   : > { %768 = vmatpush1.bf16.msra.mxu0 %v6300_v62  ;;  %811 = vmatpush1.bf16.msra.mxu1 %v6301_v63  ;;  %v6311_v62 = vld [vmem:[%s8699_s3] ss:$8 sps:$4 sm:$0xff]   ;;  %v6314_v63 = vld [vmem:[%s8699_s3 + $0x14] ss:$8 sps:$4 sm:$0xff]  }
  0x54   : > { %769 = vmatprep.subr.bf16.mxu0 %v6302_v0  ;;  %812 = vmatprep.subr.bf16.mxu1 %v6304_v2  ;;  %v6320_v0 = vld [vmem:[%s8701_s5 + $0xc0] ss:$8 sps:$4 sm:$0xff]   ;;  %v6328_v2 = vld [vmem:[%s8701_s5 + $0xd4] ss:$8 sps:$4 sm:$0xff]  }
  0x57   : > { %770 = vmatpush1.bf16.msra.mxu0 %v6306_v3  ;;  %813 = vmatpush1.bf16.msra.mxu1 %v6307_v4  ;;  %v6326_v3 = vld [vmem:[%s8701_s5 + $0xd0] ss:$8 sps:$4 sm:$0xff]   ;;  %v6334_v4 = vld [vmem:[%s8701_s5 + $0xe4] ss:$8 sps:$4 sm:$0xff]  }
  0x58   : > { %1056 = vmatprep.subr.bf16.mxu1 %v6319_v41  ;;  %v6362_v41 = vld [vmem:[%s8701_s5 + $0x190] ss:$8 sps:$4 sm:$0xff]  }
  0x5a   : > { %772 = vmatmul.mubr.bf16.vlgmr.msra.gmra.mrb[0].mxu0 %v6308_v5  ;;  %815 = vmatmul.mubr.bf16.vlgmr.msra.gmra.mrb[0].mxu1 %v6308_v5  ;;  %v6316_v5 = vld [vmem:[%s8699_s3 + $0x10] ss:$8 sps:$4 sm:$0xff]  }
  0x5b   : > { %1088 = vmatprep.mubr.bf16.mxu1 %v6977_v1  ;;  %957 = vmatprep.mubr.bf16.mxu0 %v6313_v36  ;;  %v6364_v36 = vld [vmem:[%s8701_s5 + $0x194] ss:$8 sps:$4 sm:$0xff]  }
  0x5c   : > { %1057 = vmatpush1.bf16.msra.mxu1 %v6317_v40  ;;  %v6367_v40 = vld [vmem:[%s8701_s5 + $0x84] ss:$8 sps:$4 sm:$0xff]  }
  0x5d   : > { %1058 = vmatprep.subr.bf16.mxu1 %v6325_v42 }
  0x60   : > { %1059 = vmatpush1.bf16.msra.mxu1 %v6323_v43  ;;  %v6370_v43 = vld [vmem:[%s8701_s5 + $0x1a4] ss:$8 sps:$4 sm:$0xff]  }
  0x61   : > { %1060 = vmatprep.subr.bf16.mxu1 %v6331_v45  ;;  %v6373_v45 = vld [vmem:[%s8701_s5 + $0x94] ss:$8 sps:$4 sm:$0xff]  }
  0x64   : > { %1061 = vmatpush1.bf16.msra.mxu1 %v6329_v46  ;;  %v6368_v46 = vld [vmem:[%s8701_s5 + $0x1a0] ss:$8 sps:$4 sm:$0xff]  }
  0x65   : > { %1062 = vmatprep.subr.bf16.mxu1 %v6337_v47  ;;  %v6376_v47 = vld [vmem:[%s8701_s5 + $0x1b4] ss:$8 sps:$4 sm:$0xff]  }
  0x68   : > { %1063 = vmatpush1.bf16.msra.mxu1 %v6335_v48  ;;  %v6371_v48 = vld [vmem:[%s8701_s5 + $0x90] ss:$8 sps:$4 sm:$0xff]  }
  0x8e   : > { %v402_v6 = vpop.permute.xlu0 %401 }
  0x92   : > { %v407_v7 = vpop.permute.xlu0 %406 }
 0x12d   : > { %v773_v8 = vpop.f32.mrb[0].mxu0  ;;  %v816_v9 = vpop.f32.mrb[0].mxu1 }
 0x12e   : > { %v774_v10 = vadd.f32 %v773_v8, %v402_v6  ;;  %v817_v11 = vadd.f32 %v816_v9, %v402_v6  ;;  %v775_v12 = vpop.f32.mrb[1].mxu0  ;;  %v818_v13 = vpop.f32.mrb[1].mxu1  ;;  %v6338_v8 = vld [vmem:[%s8701_s5 + $0xf0] ss:$8 sps:$4 sm:$0xff]   ;;  %v6343_v9 = vld [vmem:[%s8701_s5 + $0x44] ss:$8 sps:$4 sm:$0xff]  }
 0x12f   : > { %v776_v14 = vadd.f32 %v775_v12, %v402_v6  ;;  %v819_v15 = vadd.f32 %v818_v13, %v402_v6  ;;  %v777_v16 = vpop.f32.mrb[2].mxu0  ;;  %v820_v17 = vpop.f32.mrb[2].mxu1  ;;  %v6332_v6 = vld [vmem:[%s8701_s5 + $0xe0] ss:$8 sps:$4 sm:$0xff]   ;;  %1064 = vmatprep.subr.bf16.mxu1 %v6343_v9  ;;  %v6349_v13 = vld [vmem:[%s8701_s5 + $0x54] ss:$8 sps:$4 sm:$0xff]  }
 0x130   : > { %v778_v18 = vadd.f32 %v777_v16, %v407_v7  ;;  %v821_v19 = vadd.f32 %v820_v17, %v407_v7  ;;  %v779_v20 = vpop.f32.mrb[3].mxu0  ;;  %v822_v21 = vpop.f32.mrb[3].mxu1  ;;  %v825_v24 = vmax.f32 %v774_v10, 0.0  ;;  %v827_v25 = vmax.f32 %v817_v11, 0.0  ;;  %v6341_v10 = vld [vmem:[%s8701_s5 + $0x40] ss:$8 sps:$4 sm:$0xff]  }
 0x131   : > { %v780_v22 = vadd.f32 %v779_v20, %v407_v7  ;;  %v823_v23 = vadd.f32 %v822_v21, %v407_v7  ;;  %v826_v28 = vmax.f32 %v776_v14, 0.0  ;;  %v828_v29 = vmax.f32 %v819_v15, 0.0  ;;  %v6340_v7 = vld [vmem:[%s8701_s5 + $0xf4] ss:$8 sps:$4 sm:$0xff]   ;;  %v6346_v11 = vld [vmem:[%s8701_s5 + $0x104] ss:$8 sps:$4 sm:$0xff]   ;;  %1065 = vmatpush1.bf16.msra.mxu1 %v6341_v10 }
 0x132   : > { %v829_v26 = vmax.f32 %v778_v18, 0.0  ;;  %v831_v27 = vmax.f32 %v821_v19, 0.0  ;;  %v6344_v12 = vld [vmem:[%s8701_s5 + $0x100] ss:$8 sps:$4 sm:$0xff]   ;;  %v6347_v14 = vld [vmem:[%s8701_s5 + $0x50] ss:$8 sps:$4 sm:$0xff]   ;;  %1066 = vmatprep.subr.bf16.mxu1 %v6349_v13 }
 0x133   : > { %v830_v30 = vmax.f32 %v780_v22, 0.0  ;;  %v832_v31 = vmax.f32 %v823_v23, 0.0  ;;  %v6352_v15 = vld [vmem:[%s8701_s5 + $0x114] ss:$8 sps:$4 sm:$0xff]   ;;  %v6350_v16 = vld [vmem:[%s8701_s5 + $0x110] ss:$8 sps:$4 sm:$0xff]  }
 0x134   : > { %v833_v32 = vpack.c.bf16 %v829_v26, %v825_v24  ;;  %v835_v33 = vpack.c.bf16 %v831_v27, %v827_v25  ;;  %v6355_v17 = vld [vmem:[%s8701_s5 + $0x64] ss:$8 sps:$4 sm:$0xff]   ;;  %v6404_v9 = vld [vmem:[%s8701_s5 + $0x260] ss:$8 sps:$4 sm:$0xff]   ;;  %v6412_v10 = vld [vmem:[%s8701_s5 + $0x274] ss:$8 sps:$4 sm:$0xff]  }
 0x135   : > { %v834_v34 = vpack.c.bf16 %v830_v30, %v826_v28  ;;  %v836_v35 = vpack.c.bf16 %v832_v31, %v828_v29  ;;  %1067 = vmatpush1.bf16.msra.mxu1 %v6347_v14  ;;  %v6358_v18 = vld [vmem:[%s8701_s5 + $0x184] ss:$8 sps:$4 sm:$0xff]   ;;  %v6353_v28 = vld [vmem:[%s8701_s5 + $0x60] ss:$8 sps:$4 sm:$0xff]   ;;  %v6361_v31 = vld [vmem:[%s8701_s5 + $0x74] ss:$8 sps:$4 sm:$0xff]  }
 0x136   : > { %859 = vrot.lane.b32.xlu0 %v835_v33, %s6978_s22  ;;  %853 = vrot.lane.b32.xlu1 %v833_v32, %s6978_s22  ;;  %v6410_v13 = vld [vmem:[%s8701_s5 + $0x270] ss:$8 sps:$4 sm:$0xff]   ;;  %v6418_v14 = vld [vmem:[%s8701_s5 + $0x284] ss:$8 sps:$4 sm:$0xff]  }
 0x137   : > { %1193 = vmatprep.subr.bf16.mxu1 %v6355_v17  ;;  %v6416_v17 = vld [vmem:[%s8701_s5 + $0x280] ss:$8 sps:$4 sm:$0xff]  }
 0x13a   : > { %865 = vrot.lane.b32.xlu0 %v833_v32, %s6979_s23  ;;  %856 = vrot.lane.b32.xlu1 %v834_v34, %s6978_s22 }
 0x13e   : > { %868 = vrot.lane.b32.xlu0 %v834_v34, %s6979_s23  ;;  %862 = vrot.lane.b32.xlu1 %v836_v35, %s6978_s22 }
 0x142   : > { %871 = vrot.lane.b32.xlu0 %v835_v33, %s6979_s23  ;;  %838 = vrot.lane.b32.xlu1 %v833_v32, %s6980_s24 }
 0x146   : > { %874 = vrot.lane.b32.xlu0 %v836_v35, %s6979_s23  ;;  %842 = vrot.lane.b32.xlu1 %v834_v34, %s6980_s24  ;;  %s8653_s23 = scalar_lea.hbm %s8705_s9, %s6112_s14 }
 0x14a   : > { %887 = vperm.xlu0 %6210, %v881_v37   ;;  %846 = vrot.lane.b32.xlu1 %v835_v33, %s6980_s24 }
 0x14e   : > { %897 = vperm.xlu0 %6210, %v883_v38   ;;  %850 = vrot.lane.b32.xlu1 %v836_v35, %s6980_s24  ;;  %v6359_v38 = vld [vmem:[%s8701_s5 + $0x70] ss:$8 sps:$4 sm:$0xff]   ;;  %s6919_s24 = scalar_lea.vmem %s6918_s27, 32 }
 0x14f   : > { %p6921_p1 = scmp.lt.s32.totalorder %s6919_s24, %s6913_s26 }
 0x151   : > { %p6922_p2 = por %p6921_p1, %p6920_p0 }
 0x152   : > { %892 = vperm.xlu1 %6211, %v882_v39  }
 0x153   : > { %p6923_p3 = pnand %p6922_p2, %p6916_p13 }
 0x156   : > { %902 = vperm.xlu1 %6211, %v884_v44   ;;  %v6365_v44 = vld [vmem:[%s8701_s5 + $0x80] ss:$8 sps:$4 sm:$0xff]  }
 0x1a8   : > { %v854_v49 = vpop.permute.xlu1 %853  ;;  %v860_v50 = vpop.permute.xlu0 %859 }
 0x1a9   : > { %6116 = vmatprep.subr.bf16.mxu0 %v854_v49  ;;  %v6379_v49 = vld [vmem:[%s8701_s5 + $0xa4] ss:$8 sps:$4 sm:$0xff]  }
 0x1aa   : > { %6117 = vmatpush3.bf16.msra.mxu0 %v833_v32 }
 0x1ac   : > { %v857_v51 = vpop.permute.xlu1 %856  ;;  %v866_v52 = vpop.permute.xlu0 %865 }
 0x1ad   : > { %6118 = vmatprep.subr.bf16.mxu0 %v857_v51  ;;  %v6382_v51 = vld [vmem:[%s8701_s5 + $0x1c4] ss:$8 sps:$4 sm:$0xff]  }
 0x1ae   : > { %6119 = vmatpush3.bf16.msra.mxu0 %v834_v34 }
 0x1af   : > { %6120 = vmatprep.subr.bf16.mxu0 %v860_v50  ;;  %v6374_v50 = vld [vmem:[%s8701_s5 + $0x1b0] ss:$8 sps:$4 sm:$0xff]  }
 0x1b0   : > { %v863_v53 = vpop.permute.xlu1 %862  ;;  %v869_v55 = vpop.permute.xlu0 %868 }
 0x1b2   : > { %6121 = vmatpush3.bf16.msra.mxu0 %v835_v33  ;;  %v6356_v33 = vld [vmem:[%s8701_s5 + $0x180] ss:$8 sps:$4 sm:$0xff]  }
 0x1b3   : > { %6122 = vmatprep.subr.bf16.mxu0 %v863_v53  ;;  %v6385_v53 = vld [vmem:[%s8701_s5 + $0xb4] ss:$8 sps:$4 sm:$0xff]  }
 0x1b4   : > { %v839_v54 = vpop.permute.xlu1 %838  ;;  %v872_v57 = vpop.permute.xlu0 %871 }
 0x1b6   : > { %6123 = vmatpush3.bf16.msra.mxu0 %v836_v35 }
 0x1b7   : > { %6124 = vmatprep.subr.bf16.mxu0 %v866_v52  ;;  %v6377_v52 = vld [vmem:[%s8701_s5 + $0xa0] ss:$8 sps:$4 sm:$0xff]  }
 0x1b8   : > { %v843_v56 = vpop.permute.xlu1 %842  ;;  %v875_v59 = vpop.permute.xlu0 %874 }
 0x1ba   : > { %6125 = vmatpush3.bf16.msra.mxu0 %v839_v54  ;;  %v6380_v54 = vld [vmem:[%s8701_s5 + $0x1c0] ss:$8 sps:$4 sm:$0xff]  }
 0x1bb   : > { %6126 = vmatprep.subr.bf16.mxu0 %v869_v55  ;;  %v6388_v55 = vld [vmem:[%s8701_s5 + $0x1d4] ss:$8 sps:$4 sm:$0xff]  }
 0x1bc   : > { %v847_v58 = vpop.permute.xlu1 %846 }
 0x1be   : > { %6127 = vmatpush3.bf16.msra.mxu0 %v843_v56  ;;  %v6383_v56 = vld [vmem:[%s8701_s5 + $0xb0] ss:$8 sps:$4 sm:$0xff]  }
 0x1bf   : > { %6128 = vmatprep.subr.bf16.mxu0 %v872_v57  ;;  %v6391_v57 = vld [vmem:[%s8701_s5 + $0x124] ss:$8 sps:$4 sm:$0xff]  }
 0x1c0   : > { %v851_v61 = vpop.permute.xlu1 %850 }
 0x1c2   : > { %6129 = vmatpush3.bf16.msra.mxu0 %v847_v58  ;;  %v6386_v58 = vld [vmem:[%s8701_s5 + $0x1d0] ss:$8 sps:$4 sm:$0xff]  }
 0x1c3   : > { %6130 = vmatprep.subr.bf16.mxu0 %v875_v59  ;;  %v6394_v59 = vld [vmem:[%s8701_s5 + $0x244] ss:$8 sps:$4 sm:$0xff]  }
 0x1c6   : > { %6131 = vmatpush3.bf16.msra.mxu0 %v851_v61 }
 0x1c7   : > { %1330 = vmatprep.subr.bf16.mxu0 %v6322_v60  ;;  %v6389_v60 = vld [vmem:[%s8701_s5 + $0x120] ss:$8 sps:$4 sm:$0xff]  }
 0x1c9   : > { %958 = vmatmul.mubr.bf16.vlgmr.msra.gmra.mrb[4].mxu0 %v6311_v62  ;;  %v888_v23 = vpop.permute.xlu0 %887  ;;  %v6397_v62 = vld [vmem:[%s8701_s5 + $0x134] ss:$8 sps:$4 sm:$0xff]  }
 0x1ca   : > { %965 = vmatprep.mubr.bf16.mxu0 %v6314_v63  ;;  %1331 = vmatpush1.bf16.msra.mxu0 %v6320_v0  ;;  %v6392_v63 = vld [vmem:[%s8701_s5 + $0x240] ss:$8 sps:$4 sm:$0xff]  }
 0x1cb   : > { %1332 = vmatprep.subr.bf16.mxu0 %v6328_v2  ;;  %v6400_v2 = vld [vmem:[%s8701_s5 + $0x254] ss:$8 sps:$4 sm:$0xff]  }
 0x1ce   : > { %1333 = vmatpush1.bf16.msra.mxu0 %v6326_v3  ;;  %v6395_v3 = vld [vmem:[%s8701_s5 + $0x130] ss:$8 sps:$4 sm:$0xff]  }
 0x1cf   : > { %1334 = vmatprep.subr.bf16.mxu0 %v6334_v4  ;;  %v6403_v4 = vld [vmem:[%s8701_s5 + $0x144] ss:$8 sps:$4 sm:$0xff]  }
 0x1d1   : > { %966 = vmatmul.mubr.bf16.gmra.mrb[8].mxu0 %v6316_v5  ;;  %v6398_v5 = vld [vmem:[%s8701_s5 + $0x250] ss:$8 sps:$4 sm:$0xff]  }
 0x1d2   : > { %1335 = vmatpush1.bf16.msra.mxu0 %v6332_v6  ;;  %1362 = vmatprep.mubr.bf16.mxu0 %v6977_v1  ;;  %v6406_v6 = vld [vmem:[%s8701_s5 + $0x264] ss:$8 sps:$4 sm:$0xff]  }
 0x1d3   : > { %1336 = vmatprep.subr.bf16.mxu0 %v6340_v7  ;;  %v6401_v7 = vld [vmem:[%s8701_s5 + $0x140] ss:$8 sps:$4 sm:$0xff]  }
 0x1d6   : > { %1337 = vmatpush1.bf16.msra.mxu0 %v6338_v8  ;;  %v6409_v8 = vld [vmem:[%s8701_s5 + $0x154] ss:$8 sps:$4 sm:$0xff]  }
 0x1d7   : > { %1338 = vmatprep.subr.bf16.mxu0 %v6346_v11  ;;  %v6407_v11 = vld [vmem:[%s8701_s5 + $0x150] ss:$8 sps:$4 sm:$0xff]  }
 0x1da   : > { %1339 = vmatpush1.bf16.msra.mxu0 %v6344_v12  ;;  %v6415_v12 = vld [vmem:[%s8701_s5 + $0x164] ss:$8 sps:$4 sm:$0xff]  }
 0x1db   : > { %1340 = vmatprep.subr.bf16.mxu0 %v6352_v15  ;;  %v6413_v15 = vld [vmem:[%s8701_s5 + $0x160] ss:$8 sps:$4 sm:$0xff]  }
 0x1de   : > { %1341 = vmatpush1.bf16.msra.mxu0 %v6350_v16  ;;  %v6421_v16 = vld [vmem:[%s8701_s5 + $0x174] ss:$8 sps:$4 sm:$0xff]  }
 0x1df   : > { %1602 = vmatprep.subr.bf16.mxu0 %v6358_v18  ;;  %v6424_v18 = vld [vmem:[%s8701_s5 + $0x294] ss:$8 sps:$4 sm:$0xff]  }
 0x29c   : > { %v6132_v19 = vpop.f32.mrb[4].mxu0 }
 0x29d   : > { %v6133_v20 = vpop.f32.mrb[5].mxu0 }
 0x29e   : > { %v6134_v21 = vadd.f32 %v6133_v20, %v6132_v19  ;;  %v6135_v22 = vpop.f32.mrb[6].mxu0  ;;  %v6419_v19 = vld [vmem:[%s8701_s5 + $0x170] ss:$8 sps:$4 sm:$0xff]   ;;  %v6427_v20 = vld [vmem:[%s8701_s5 + $0x1e4] ss:$8 sps:$4 sm:$0xff]  }
 0x29f   : > { %v6136_v24 = vpop.f32.mrb[7].mxu0 }
 0x2a0   : > { %v960_v25 = vadd.f32 %v6134_v21, %v888_v23  ;;  %v7270_v26 = vadd.f32 %v6136_v24, %v6135_v22  ;;  %v6422_v21 = vld [vmem:[%s8701_s5 + $0x290] ss:$8 sps:$4 sm:$0xff]   ;;  %v6430_v22 = vld [vmem:[%s8701_s5 + $0x304] ss:$8 sps:$4 sm:$0xff]   ;;  %v6425_v23 = vld [vmem:[%s8701_s5 + $0x1e0] ss:$8 sps:$4 sm:$0xff]  }
 0x2a2   : > { %v974_v27 = vmax.f32 %v960_v25, 0.0  ;;  %v6433_v25 = vld [vmem:[%s8701_s5 + $0x1f4] ss:$8 sps:$4 sm:$0xff]  }
 0x2a4   : > { %v7275_v29 = vpack.c.bf16 %v974_v27, %v974_v27  ;;  %v6138_v30 = vpop.f32.mrb[8].mxu0  ;;  %v6428_v27 = vld [vmem:[%s8701_s5 + $0x300] ss:$8 sps:$4 sm:$0xff]  }
 0x2a5   : > { %v6139_v32 = vpop.f32.mrb[9].mxu0 }
 0x2a6   : > { %v1266_v34 = vrot.slane %v7275_v29, 1  ;;  %v7284_v35 = vadd.f32 %v6139_v32, %v6138_v30  ;;  %5692 = vmatmul.mubr.msk.bf16.vlgmr.msra.gmra.mrb[4].mxu1 %vm1052_vm0, %v7275_v29  ;;  %v6141_v37 = vpop.f32.mrb[10].mxu0  ;;  %v7360_v61 = vshrl.u32 %v7275_v29, 16  ;;  %v1538_v0 = vrot.slane %v7275_v29, 2  ;;  %v6436_v30 = vld [vmem:[%s8701_s5 + $0x314] ss:$8 sps:$4 sm:$0xff]  }
 0x2a7   : > { %1194 = vmatpush1.bf16.msra.mxu1 %v6353_v28  ;;  %1225 = vmatprep.mubr.bf16.mxu1 %v6977_v1  ;;  %v6142_v39 = vpop.f32.mrb[11].mxu0  ;;  %v1810_v28 = vrot.slane %v7275_v29, 3  ;;  %v6439_v32 = vld [vmem:[%s8701_s5 + $0x204] ss:$8 sps:$4 sm:$0xff]   ;;  %v6434_v29 = vld [vmem:[%s8701_s5 + $0x310] ss:$8 sps:$4 sm:$0xff]  }
 0x2a8   : > { %5718 = vmatmul.mubr.msk.bf16.vlgmr.msra.gmra.mrb[12].mxu0 %vm1052_vm0, %v1266_v34  ;;  %1195 = vmatprep.subr.bf16.mxu1 %v6361_v31  ;;  %v7303_v42 = vadd.f32 %v6142_v39, %v6141_v37  ;;  %v1402_v24 = vrot.slane %v7360_v61, 1  ;;  %v6431_v31 = vld [vmem:[%s8701_s5 + $0x1f0] ss:$8 sps:$4 sm:$0xff]   ;;  %v6437_v34 = vld [vmem:[%s8701_s5 + $0x200] ss:$8 sps:$4 sm:$0xff]  }
 0x2a9   : > { %1603 = vmatpush1.bf16.msra.mxu0 %v6356_v33  ;;  %1634 = vmatprep.mubr.bf16.mxu0 %v6977_v1  ;;  %v6442_v33 = vld [vmem:[%s8701_s5 + $0x324] ss:$8 sps:$4 sm:$0xff]   ;;  %v6440_v37 = vld [vmem:[%s8701_s5 + $0x320] ss:$8 sps:$4 sm:$0xff]   ;;  %v6443_v39 = vld [vmem:[%s8701_s5 + $0x210] ss:$8 sps:$4 sm:$0xff]  }
 0x2aa   : > { %1604 = vmatprep.subr.bf16.mxu0 %v6364_v36  ;;  %v6445_v36 = vld [vmem:[%s8701_s5 + $0x214] ss:$8 sps:$4 sm:$0xff]  }
 0x2ab   : > { %1196 = vmatpush1.bf16.msra.mxu1 %v6359_v38  ;;  %v6448_v38 = vld [vmem:[%s8701_s5 + $0x334] ss:$8 sps:$4 sm:$0xff]  }
 0x2ac   : > { %1197 = vmatprep.subr.bf16.mxu1 %v6367_v40  ;;  %v6451_v40 = vld [vmem:[%s8701_s5 + $0x224] ss:$8 sps:$4 sm:$0xff]  }
 0x2ad   : > { %1605 = vmatpush1.bf16.msra.mxu0 %v6362_v41  ;;  %v6446_v41 = vld [vmem:[%s8701_s5 + $0x330] ss:$8 sps:$4 sm:$0xff]  }
 0x2ae   : > { %1606 = vmatprep.subr.bf16.mxu0 %v6370_v43  ;;  %v6454_v43 = vld [vmem:[%s8701_s5 + $0x344] ss:$8 sps:$4 sm:$0xff]  }
 0x2af   : > { %1198 = vmatpush1.bf16.msra.mxu1 %v6365_v44  ;;  %v893_v44 = vpop.permute.xlu1 %892 }
 0x2b0   : > { %1199 = vmatprep.subr.bf16.mxu1 %v6373_v45  ;;  %v6449_v45 = vld [vmem:[%s8701_s5 + $0x220] ss:$8 sps:$4 sm:$0xff]  }
 0x2b1   : > { %1607 = vmatpush1.bf16.msra.mxu0 %v6368_v46  ;;  %v6457_v46 = vld [vmem:[%s8701_s5 + $0x234] ss:$8 sps:$4 sm:$0xff]  }
 0x2b2   : > { %1608 = vmatprep.subr.bf16.mxu0 %v6376_v47  ;;  %v6452_v47 = vld [vmem:[%s8701_s5 + $0x340] ss:$8 sps:$4 sm:$0xff]  }
 0x2b3   : > { %1200 = vmatpush1.bf16.msra.mxu1 %v6371_v48  ;;  %v963_v48 = vadd.f32 %v7270_v26, %v893_v44  ;;  %v6458_v26 = vld [vmem:[%s8701_s5 + $0x350] ss:$8 sps:$4 sm:$0xff]  }
 0x2b4   : > { %1201 = vmatprep.subr.bf16.mxu1 %v6379_v49  ;;  %v6460_v49 = vld [vmem:[%s8701_s5 + $0x354] ss:$8 sps:$4 sm:$0xff]   ;;  %v6530_v44 = vld [vmem:[%s8701_s5 + $0x4d0] ss:$8 sps:$4 sm:$0xff]  }
 0x2b5   : > { %1609 = vmatpush1.bf16.msra.mxu0 %v6374_v50  ;;  %v6455_v50 = vld [vmem:[%s8701_s5 + $0x230] ss:$8 sps:$4 sm:$0xff]  }
 0x2b6   : > { %1610 = vmatprep.subr.bf16.mxu0 %v6382_v51  ;;  %v6463_v51 = vld [vmem:[%s8701_s5 + $0x2a4] ss:$8 sps:$4 sm:$0xff]  }
 0x2b7   : > { %1202 = vmatpush1.bf16.msra.mxu1 %v6377_v52  ;;  %v975_v52 = vmax.f32 %v963_v48, 0.0  ;;  %v6541_v48 = vld [vmem:[%s8701_s5 + $0x434] ss:$8 sps:$4 sm:$0xff]  }
 0x2b8   : > { %1203 = vmatprep.subr.bf16.mxu1 %v6385_v53  ;;  %v6466_v53 = vld [vmem:[%s8701_s5 + $0x3c4] ss:$8 sps:$4 sm:$0xff]  }
 0x2b9   : > { %1611 = vmatpush1.bf16.msra.mxu0 %v6380_v54  ;;  %v6461_v54 = vld [vmem:[%s8701_s5 + $0x2a0] ss:$8 sps:$4 sm:$0xff]  }
 0x2ba   : > { %1612 = vmatprep.subr.bf16.mxu0 %v6388_v55  ;;  %v1674_v55 = vrot.slane %v7360_v61, 2 }
 0x2bb   : > { %1204 = vmatpush1.bf16.msra.mxu1 %v6383_v56  ;;  %v6469_v56 = vld [vmem:[%s8701_s5 + $0x2b4] ss:$8 sps:$4 sm:$0xff]  }
 0x2bc   : > { %1466 = vmatprep.subr.bf16.mxu1 %v6391_v57  ;;  %v6464_v57 = vld [vmem:[%s8701_s5 + $0x3c0] ss:$8 sps:$4 sm:$0xff]  }
 0x2bd   : > { %1613 = vmatpush1.bf16.msra.mxu0 %v6386_v58  ;;  %v7526_v58 = vpack.c.bf16 %v975_v52, %v975_v52  ;;  %v6547_v52 = vld [vmem:[%s8701_s5 + $0x444] ss:$8 sps:$4 sm:$0xff]  }
 0x2be   : > { %5705 = vmatmul.mubr.msk.bf16.vlgmr.msra.gmra.mrb[8].mxu1 %vm1052_vm0, %v7360_v61  ;;  %1874 = vmatprep.subr.bf16.mxu0 %v6394_v59  ;;  %v6472_v59 = vld [vmem:[%s8701_s5 + $0x3d4] ss:$8 sps:$4 sm:$0xff]  }
 0x2bf   : > { %1467 = vmatpush1.bf16.msra.mxu1 %v6389_v60  ;;  %1498 = vmatprep.mubr.bf16.mxu1 %v6977_v1  ;;  %v6467_v60 = vld [vmem:[%s8701_s5 + $0x2b0] ss:$8 sps:$4 sm:$0xff]  }
 0x2c0   : > { %5744 = vmatmul.mubr.msk.bf16.vlgmr.msra.gmra.mrb[16].mxu0 %vm1052_vm0, %v1538_v0  ;;  %1468 = vmatprep.subr.bf16.mxu1 %v6397_v62  ;;  %v6475_v62 = vld [vmem:[%s8701_s5 + $0x2c4] ss:$8 sps:$4 sm:$0xff]  }
 0x2c1   : > { %1875 = vmatpush1.bf16.msra.mxu0 %v6392_v63  ;;  %1906 = vmatprep.mubr.bf16.mxu0 %v6977_v1  ;;  %v6470_v63 = vld [vmem:[%s8701_s5 + $0x3d0] ss:$8 sps:$4 sm:$0xff]   ;;  %v6478_v0 = vld [vmem:[%s8701_s5 + $0x3e4] ss:$8 sps:$4 sm:$0xff]  }
 0x2c2   : > { %1876 = vmatprep.subr.bf16.mxu0 %v6400_v2  ;;  %v6473_v2 = vld [vmem:[%s8701_s5 + $0x2c0] ss:$8 sps:$4 sm:$0xff]  }
 0x2c3   : > { %1469 = vmatpush1.bf16.msra.mxu1 %v6395_v3  ;;  %v6481_v3 = vld [vmem:[%s8701_s5 + $0x2d4] ss:$8 sps:$4 sm:$0xff]  }
 0x2c4   : > { %1470 = vmatprep.subr.bf16.mxu1 %v6403_v4  ;;  %v6476_v4 = vld [vmem:[%s8701_s5 + $0x3e0] ss:$8 sps:$4 sm:$0xff]  }
 0x2c5   : > { %1877 = vmatpush1.bf16.msra.mxu0 %v6398_v5  ;;  %v6484_v5 = vld [vmem:[%s8701_s5 + $0x3f4] ss:$8 sps:$4 sm:$0xff]  }
 0x2c6   : > { %1878 = vmatprep.subr.bf16.mxu0 %v6406_v6  ;;  %v6479_v6 = vld [vmem:[%s8701_s5 + $0x2d0] ss:$8 sps:$4 sm:$0xff]  }
 0x2c7   : > { %1471 = vmatpush1.bf16.msra.mxu1 %v6401_v7  ;;  %v6487_v7 = vld [vmem:[%s8701_s5 + $0x2e4] ss:$8 sps:$4 sm:$0xff]  }
 0x2c8   : > { %1472 = vmatprep.subr.bf16.mxu1 %v6409_v8  ;;  %v6482_v8 = vld [vmem:[%s8701_s5 + $0x3f0] ss:$8 sps:$4 sm:$0xff]  }
 0x2c9   : > { %1879 = vmatpush1.bf16.msra.mxu0 %v6404_v9  ;;  %v6490_v9 = vld [vmem:[%s8701_s5 + $0x404] ss:$8 sps:$4 sm:$0xff]  }
 0x2ca   : > { %1880 = vmatprep.subr.bf16.mxu0 %v6412_v10  ;;  %v6485_v10 = vld [vmem:[%s8701_s5 + $0x2e0] ss:$8 sps:$4 sm:$0xff]  }
 0x2cb   : > { %1473 = vmatpush1.bf16.msra.mxu1 %v6407_v11  ;;  %v6493_v11 = vld [vmem:[%s8701_s5 + $0x2f4] ss:$8 sps:$4 sm:$0xff]  }
 0x2cc   : > { %1474 = vmatprep.subr.bf16.mxu1 %v6415_v12  ;;  %v6488_v12 = vld [vmem:[%s8701_s5 + $0x400] ss:$8 sps:$4 sm:$0xff]  }
 0x2cd   : > { %1881 = vmatpush1.bf16.msra.mxu0 %v6410_v13  ;;  %v6496_v13 = vld [vmem:[%s8701_s5 + $0x414] ss:$8 sps:$4 sm:$0xff]  }
 0x2ce   : > { %1882 = vmatprep.subr.bf16.mxu0 %v6418_v14  ;;  %v6491_v14 = vld [vmem:[%s8701_s5 + $0x2f0] ss:$8 sps:$4 sm:$0xff]  }
 0x2cf   : > { %1475 = vmatpush1.bf16.msra.mxu1 %v6413_v15  ;;  %v6499_v15 = vld [vmem:[%s8701_s5 + $0x364] ss:$8 sps:$4 sm:$0xff]  }
 0x2d0   : > { %1476 = vmatprep.subr.bf16.mxu1 %v6421_v16  ;;  %v6494_v16 = vld [vmem:[%s8701_s5 + $0x410] ss:$8 sps:$4 sm:$0xff]  }
 0x2d1   : > { %1883 = vmatpush1.bf16.msra.mxu0 %v6416_v17  ;;  %v6502_v17 = vld [vmem:[%s8701_s5 + $0x484] ss:$8 sps:$4 sm:$0xff]  }
 0x2d2   : > { %1884 = vmatprep.subr.bf16.mxu0 %v6424_v18  ;;  %v6497_v18 = vld [vmem:[%s8701_s5 + $0x360] ss:$8 sps:$4 sm:$0xff]  }
 0x2d3   : > { %1477 = vmatpush1.bf16.msra.mxu1 %v6419_v19  ;;  %v1946_v19 = vrot.slane %v7360_v61, 3  ;;  %v6503_v61 = vld [vmem:[%s8701_s5 + $0x370] ss:$8 sps:$4 sm:$0xff]  }
 0x2d4   : > { %1738 = vmatprep.subr.bf16.mxu1 %v6427_v20  ;;  %v6505_v20 = vld [vmem:[%s8701_s5 + $0x374] ss:$8 sps:$4 sm:$0xff]  }
 0x2d5   : > { %1885 = vmatpush1.bf16.msra.mxu0 %v6422_v21  ;;  %v6500_v21 = vld [vmem:[%s8701_s5 + $0x480] ss:$8 sps:$4 sm:$0xff]  }
 0x2d6   : > { %5731 = vmatmul.mubr.msk.bf16.vlgmr.msra.gmra.mrb[12].mxu1 %vm1052_vm0, %v1402_v24  ;;  %2146 = vmatprep.subr.bf16.mxu0 %v6430_v22  ;;  %v2356_v22 = vrot.slane %v7526_v58, 1  ;;  %v6511_v24 = vld [vmem:[%s8701_s5 + $0x384] ss:$8 sps:$4 sm:$0xff]  }
 0x2d7   : > { %1739 = vmatpush1.bf16.msra.mxu1 %v6425_v23  ;;  %1770 = vmatprep.mubr.bf16.mxu1 %v6977_v1  ;;  %v6508_v23 = vld [vmem:[%s8701_s5 + $0x494] ss:$8 sps:$4 sm:$0xff]  }
 0x2d8   : > { %5770 = vmatmul.mubr.msk.bf16.vlgmr.msra.gmra.mrb[20].mxu0 %vm1052_vm0, %v1810_v28  ;;  %1740 = vmatprep.subr.bf16.mxu1 %v6433_v25  ;;  %v6506_v25 = vld [vmem:[%s8701_s5 + $0x490] ss:$8 sps:$4 sm:$0xff]   ;;  %v6509_v28 = vld [vmem:[%s8701_s5 + $0x380] ss:$8 sps:$4 sm:$0xff]  }
 0x2d9   : > { %2147 = vmatpush1.bf16.msra.mxu0 %v6428_v27  ;;  %2178 = vmatprep.mubr.bf16.mxu0 %v6977_v1  ;;  %v6514_v27 = vld [vmem:[%s8701_s5 + $0x4a4] ss:$8 sps:$4 sm:$0xff]  }
 0x2da   : > { %2148 = vmatprep.subr.bf16.mxu0 %v6436_v30  ;;  %v6517_v30 = vld [vmem:[%s8701_s5 + $0x394] ss:$8 sps:$4 sm:$0xff]  }
 0x2db   : > { %1741 = vmatpush1.bf16.msra.mxu1 %v6431_v31  ;;  %v6512_v31 = vld [vmem:[%s8701_s5 + $0x4a0] ss:$8 sps:$4 sm:$0xff]  }
 0x2dc   : > { %1742 = vmatprep.subr.bf16.mxu1 %v6439_v32  ;;  %v6520_v32 = vld [vmem:[%s8701_s5 + $0x4b4] ss:$8 sps:$4 sm:$0xff]  }
 0x2dd   : > { %2149 = vmatpush1.bf16.msra.mxu0 %v6434_v29  ;;  %v6515_v29 = vld [vmem:[%s8701_s5 + $0x390] ss:$8 sps:$4 sm:$0xff]  }
 0x2de   : > { %2150 = vmatprep.subr.bf16.mxu0 %v6442_v33  ;;  %v6523_v33 = vld [vmem:[%s8701_s5 + $0x3a4] ss:$8 sps:$4 sm:$0xff]  }
 0x2df   : > { %1743 = vmatpush1.bf16.msra.mxu1 %v6437_v34  ;;  %v6518_v34 = vld [vmem:[%s8701_s5 + $0x4b0] ss:$8 sps:$4 sm:$0xff]  }
 0x2e0   : > { %1744 = vmatprep.subr.bf16.mxu1 %v6445_v36  ;;  %v6526_v36 = vld [vmem:[%s8701_s5 + $0x4c4] ss:$8 sps:$4 sm:$0xff]  }
 0x2e1   : > { %2151 = vmatpush1.bf16.msra.mxu0 %v6440_v37  ;;  %v6521_v37 = vld [vmem:[%s8701_s5 + $0x3a0] ss:$8 sps:$4 sm:$0xff]  }
 0x2e2   : > { %2152 = vmatprep.subr.bf16.mxu0 %v6448_v38  ;;  %v6529_v38 = vld [vmem:[%s8701_s5 + $0x3b4] ss:$8 sps:$4 sm:$0xff]  }
 0x2e3   : > { %1745 = vmatpush1.bf16.msra.mxu1 %v6443_v39  ;;  %v6524_v39 = vld [vmem:[%s8701_s5 + $0x4c0] ss:$8 sps:$4 sm:$0xff]  }
 0x2e4   : > { %1746 = vmatprep.subr.bf16.mxu1 %v6451_v40  ;;  %v6532_v40 = vld [vmem:[%s8701_s5 + $0x4d4] ss:$8 sps:$4 sm:$0xff]  }
 0x2e5   : > { %2153 = vmatpush1.bf16.msra.mxu0 %v6446_v41  ;;  %v6527_v41 = vld [vmem:[%s8701_s5 + $0x3b0] ss:$8 sps:$4 sm:$0xff]  }
 0x2e6   : > { %2154 = vmatprep.subr.bf16.mxu0 %v6454_v43  ;;  %v6535_v43 = vld [vmem:[%s8701_s5 + $0x424] ss:$8 sps:$4 sm:$0xff]  }
 0x2e7   : > { %1747 = vmatpush1.bf16.msra.mxu1 %v6449_v45  ;;  %v6538_v45 = vld [vmem:[%s8701_s5 + $0x544] ss:$8 sps:$4 sm:$0xff]  }
 0x2e8   : > { %1748 = vmatprep.subr.bf16.mxu1 %v6457_v46  ;;  %v6533_v46 = vld [vmem:[%s8701_s5 + $0x420] ss:$8 sps:$4 sm:$0xff]  }
 0x2e9   : > { %2155 = vmatpush1.bf16.msra.mxu0 %v6452_v47  ;;  %v7678_v47 = vshrl.u32 %v7526_v58, 16 }
 0x2ea   : > { %2156 = vmatprep.subr.bf16.mxu0 %v6460_v49  ;;  %v6536_v49 = vld [vmem:[%s8701_s5 + $0x540] ss:$8 sps:$4 sm:$0xff]  }
 0x2eb   : > { %1749 = vmatpush1.bf16.msra.mxu1 %v6455_v50  ;;  %v2628_v50 = vrot.slane %v7526_v58, 2 }
 0x2ec   : > { %2010 = vmatprep.subr.bf16.mxu1 %v6463_v51  ;;  %v6544_v51 = vld [vmem:[%s8701_s5 + $0x554] ss:$8 sps:$4 sm:$0xff]  }
 0x2ed   : > { %2157 = vmatpush1.bf16.msra.mxu0 %v6458_v26  ;;  %v6539_v26 = vld [vmem:[%s8701_s5 + $0x430] ss:$8 sps:$4 sm:$0xff]  }
 0x2ee   : > { %5757 = vmatmul.mubr.msk.bf16.vlgmr.msra.gmra.mrb[16].mxu1 %vm1052_vm0, %v1674_v55  ;;  %2420 = vmatprep.subr.bf16.mxu0 %v6466_v53  ;;  %v6542_v53 = vld [vmem:[%s8701_s5 + $0x550] ss:$8 sps:$4 sm:$0xff]   ;;  %v6545_v55 = vld [vmem:[%s8701_s5 + $0x440] ss:$8 sps:$4 sm:$0xff]  }
 0x2ef   : > { %2011 = vmatpush1.bf16.msra.mxu1 %v6461_v54  ;;  %2042 = vmatprep.mubr.bf16.mxu1 %v6977_v1  ;;  %v6550_v54 = vld [vmem:[%s8701_s5 + $0x564] ss:$8 sps:$4 sm:$0xff]  }
 0x2f0   : > { %5796 = vmatmul.mubr.msk.bf16.vlgmr.msra.gmra.mrb[24].mxu0 %vm1052_vm0, %v7526_v58  ;;  %2012 = vmatprep.subr.bf16.mxu1 %v6469_v56  ;;  %v6553_v56 = vld [vmem:[%s8701_s5 + $0x454] ss:$8 sps:$4 sm:$0xff]  }
 0x2f1   : > { %2421 = vmatpush1.bf16.msra.mxu0 %v6464_v57  ;;  %2452 = vmatprep.mubr.bf16.mxu0 %v6977_v1  ;;  %v6548_v57 = vld [vmem:[%s8701_s5 + $0x560] ss:$8 sps:$4 sm:$0xff]  }
 0x2f2   : > { %2422 = vmatprep.subr.bf16.mxu0 %v6472_v59  ;;  %v6556_v59 = vld [vmem:[%s8701_s5 + $0x574] ss:$8 sps:$4 sm:$0xff]  }
 0x2f3   : > { %2013 = vmatpush1.bf16.msra.mxu1 %v6467_v60  ;;  %v6551_v60 = vld [vmem:[%s8701_s5 + $0x450] ss:$8 sps:$4 sm:$0xff]  }
 0x2f4   : > { %2014 = vmatprep.subr.bf16.mxu1 %v6475_v62  ;;  %v6559_v62 = vld [vmem:[%s8701_s5 + $0x464] ss:$8 sps:$4 sm:$0xff]  }
 0x2f5   : > { %2423 = vmatpush1.bf16.msra.mxu0 %v6470_v63  ;;  %v6554_v63 = vld [vmem:[%s8701_s5 + $0x570] ss:$8 sps:$4 sm:$0xff]  }
 0x2f6   : > { %2424 = vmatprep.subr.bf16.mxu0 %v6478_v0  ;;  %v6562_v0 = vld [vmem:[%s8701_s5 + $0x584] ss:$8 sps:$4 sm:$0xff]  }
 0x2f7   : > { %2015 = vmatpush1.bf16.msra.mxu1 %v6473_v2  ;;  %v6557_v2 = vld [vmem:[%s8701_s5 + $0x460] ss:$8 sps:$4 sm:$0xff]  }
 0x2f8   : > { %2016 = vmatprep.subr.bf16.mxu1 %v6481_v3  ;;  %v6565_v3 = vld [vmem:[%s8701_s5 + $0x474] ss:$8 sps:$4 sm:$0xff]  }
 0x2f9   : > { %2425 = vmatpush1.bf16.msra.mxu0 %v6476_v4  ;;  %v6560_v4 = vld [vmem:[%s8701_s5 + $0x580] ss:$8 sps:$4 sm:$0xff]  }
 0x2fa   : > { %2426 = vmatprep.subr.bf16.mxu0 %v6484_v5  ;;  %v6568_v5 = vld [vmem:[%s8701_s5 + $0x594] ss:$8 sps:$4 sm:$0xff]  }
 0x2fb   : > { %2017 = vmatpush1.bf16.msra.mxu1 %v6479_v6  ;;  %v6563_v6 = vld [vmem:[%s8701_s5 + $0x470] ss:$8 sps:$4 sm:$0xff]  }
 0x2fc   : > { %2018 = vmatprep.subr.bf16.mxu1 %v6487_v7  ;;  %v6571_v7 = vld [vmem:[%s8701_s5 + $0x4e4] ss:$8 sps:$4 sm:$0xff]  }
 0x2fd   : > { %2427 = vmatpush1.bf16.msra.mxu0 %v6482_v8  ;;  %v6566_v8 = vld [vmem:[%s8701_s5 + $0x590] ss:$8 sps:$4 sm:$0xff]  }
 0x2fe   : > { %2428 = vmatprep.subr.bf16.mxu0 %v6490_v9  ;;  %v6574_v9 = vld [vmem:[%s8701_s5 + $0x604] ss:$8 sps:$4 sm:$0xff]  }
 0x2ff   : > { %2019 = vmatpush1.bf16.msra.mxu1 %v6485_v10  ;;  %v6569_v10 = vld [vmem:[%s8701_s5 + $0x4e0] ss:$8 sps:$4 sm:$0xff]  }
 0x300   : > { %2020 = vmatprep.subr.bf16.mxu1 %v6493_v11  ;;  %v2492_v11 = vrot.slane %v7678_v47, 1 }
 0x301   : > { %2429 = vmatpush1.bf16.msra.mxu0 %v6488_v12  ;;  %v6577_v12 = vld [vmem:[%s8701_s5 + $0x4f4] ss:$8 sps:$4 sm:$0xff]  }
 0x302   : > { %2430 = vmatprep.subr.bf16.mxu0 %v6496_v13  ;;  %v6572_v13 = vld [vmem:[%s8701_s5 + $0x600] ss:$8 sps:$4 sm:$0xff]  }
 0x303   : > { %2021 = vmatpush1.bf16.msra.mxu1 %v6491_v14  ;;  %v2900_v14 = vrot.slane %v7526_v58, 3  ;;  %v6578_v58 = vld [vmem:[%s8701_s5 + $0x610] ss:$8 sps:$4 sm:$0xff]  }
 0x304   : > { %2283 = vmatprep.subr.bf16.mxu1 %v6499_v15  ;;  %v6580_v15 = vld [vmem:[%s8701_s5 + $0x614] ss:$8 sps:$4 sm:$0xff]  }
 0x305   : > { %2431 = vmatpush1.bf16.msra.mxu0 %v6494_v16  ;;  %v6575_v16 = vld [vmem:[%s8701_s5 + $0x4f0] ss:$8 sps:$4 sm:$0xff]  }
 0x306   : > { %5783 = vmatmul.mubr.msk.bf16.vlgmr.msra.gmra.mrb[20].mxu1 %vm1052_vm0, %v1946_v19  ;;  %2692 = vmatprep.subr.bf16.mxu0 %v6502_v17  ;;  %v6583_v17 = vld [vmem:[%s8701_s5 + $0x504] ss:$8 sps:$4 sm:$0xff]   ;;  %v6581_v19 = vld [vmem:[%s8701_s5 + $0x500] ss:$8 sps:$4 sm:$0xff]  }
 0x307   : > { %2284 = vmatpush1.bf16.msra.mxu1 %v6497_v18  ;;  %2315 = vmatprep.mubr.bf16.mxu1 %v6977_v1  ;;  %v6586_v18 = vld [vmem:[%s8701_s5 + $0x624] ss:$8 sps:$4 sm:$0xff]  }
 0x308   : > { %5822 = vmatmul.mubr.msk.bf16.vlgmr.msra.gmra.mrb[28].mxu0 %vm1052_vm0, %v2356_v22  ;;  %2285 = vmatprep.subr.bf16.mxu1 %v6505_v20  ;;  %v6589_v20 = vld [vmem:[%s8701_s5 + $0x514] ss:$8 sps:$4 sm:$0xff]  }
 0x309   : > { %2693 = vmatpush1.bf16.msra.mxu0 %v6500_v21  ;;  %2724 = vmatprep.mubr.bf16.mxu0 %v6977_v1  ;;  %v6584_v21 = vld [vmem:[%s8701_s5 + $0x620] ss:$8 sps:$4 sm:$0xff]   ;;  %v6592_v22 = vld [vmem:[%s8701_s5 + $0x634] ss:$8 sps:$4 sm:$0xff]  }
 0x30a   : > { %2694 = vmatprep.subr.bf16.mxu0 %v6508_v23  ;;  %v6587_v23 = vld [vmem:[%s8701_s5 + $0x510] ss:$8 sps:$4 sm:$0xff]  }
 0x30b   : > { %2286 = vmatpush1.bf16.msra.mxu1 %v6503_v61  ;;  %v6595_v61 = vld [vmem:[%s8701_s5 + $0x524] ss:$8 sps:$4 sm:$0xff]  }
 0x30c   : > { %2287 = vmatprep.subr.bf16.mxu1 %v6511_v24  ;;  %v6590_v24 = vld [vmem:[%s8701_s5 + $0x630] ss:$8 sps:$4 sm:$0xff]  }
 0x30d   : > { %2695 = vmatpush1.bf16.msra.mxu0 %v6506_v25  ;;  %v6598_v25 = vld [vmem:[%s8701_s5 + $0x644] ss:$8 sps:$4 sm:$0xff]  }
 0x30e   : > { %2696 = vmatprep.subr.bf16.mxu0 %v6514_v27  ;;  %v6593_v27 = vld [vmem:[%s8701_s5 + $0x520] ss:$8 sps:$4 sm:$0xff]  }
 0x30f   : > { %2288 = vmatpush1.bf16.msra.mxu1 %v6509_v28  ;;  %v6601_v28 = vld [vmem:[%s8701_s5 + $0x534] ss:$8 sps:$4 sm:$0xff]  }
 0x310   : > { %2289 = vmatprep.subr.bf16.mxu1 %v6517_v30  ;;  %v898_v30 = vpop.permute.xlu0 %897 }
 0x311   : > { %2697 = vmatpush1.bf16.msra.mxu0 %v6512_v31  ;;  %v6596_v31 = vld [vmem:[%s8701_s5 + $0x640] ss:$8 sps:$4 sm:$0xff]  }
 0x312   : > { %2698 = vmatprep.subr.bf16.mxu0 %v6520_v32  ;;  %v968_v32 = vadd.f32 %v7284_v35, %v898_v30  ;;  %v6602_v35 = vld [vmem:[%s8701_s5 + $0x650] ss:$8 sps:$4 sm:$0xff]   ;;  %v6682_v30 = vld [vmem:[%s8701_s5 + $0x844] ss:$8 sps:$4 sm:$0xff]  }
 0x313   : > { %2290 = vmatpush1.bf16.msra.mxu1 %v6515_v29  ;;  %v6604_v29 = vld [vmem:[%s8701_s5 + $0x654] ss:$8 sps:$4 sm:$0xff]  }
 0x314   : > { %2291 = vmatprep.subr.bf16.mxu1 %v6523_v33  ;;  %v6599_v33 = vld [vmem:[%s8701_s5 + $0x530] ss:$8 sps:$4 sm:$0xff]  }
 0x315   : > { %2699 = vmatpush1.bf16.msra.mxu0 %v6518_v34  ;;  %v6607_v34 = vld [vmem:[%s8701_s5 + $0x5a4] ss:$8 sps:$4 sm:$0xff]  }
 0x316   : > { %2700 = vmatprep.subr.bf16.mxu0 %v6526_v36  ;;  %v976_v36 = vmax.f32 %v968_v32, 0.0 }
 0x317   : > { %2292 = vmatpush1.bf16.msra.mxu1 %v6521_v37  ;;  %v6610_v37 = vld [vmem:[%s8701_s5 + $0x6c4] ss:$8 sps:$4 sm:$0xff]  }
 0x318   : > { %2293 = vmatprep.subr.bf16.mxu1 %v6529_v38  ;;  %v6605_v38 = vld [vmem:[%s8701_s5 + $0x5a0] ss:$8 sps:$4 sm:$0xff]  }
 0x319   : > { %2701 = vmatpush1.bf16.msra.mxu0 %v6524_v39  ;;  %v2764_v39 = vrot.slane %v7678_v47, 2 }
 0x31a   : > { %2702 = vmatprep.subr.bf16.mxu0 %v6532_v40  ;;  %v6613_v40 = vld [vmem:[%s8701_s5 + $0x5b4] ss:$8 sps:$4 sm:$0xff]  }
 0x31b   : > { %2294 = vmatpush1.bf16.msra.mxu1 %v6527_v41  ;;  %v6608_v41 = vld [vmem:[%s8701_s5 + $0x6c0] ss:$8 sps:$4 sm:$0xff]  }
 0x31c   : > { %2556 = vmatprep.subr.bf16.mxu1 %v6535_v43  ;;  %v7844_v43 = vpack.c.bf16 %v976_v36, %v976_v36 }
 0x31d   : > { %2703 = vmatpush1.bf16.msra.mxu0 %v6530_v44  ;;  %v6616_v44 = vld [vmem:[%s8701_s5 + $0x6d4] ss:$8 sps:$4 sm:$0xff]  }
 0x31e   : > { %5809 = vmatmul.mubr.msk.bf16.vlgmr.msra.gmra.mrb[24].mxu1 %vm1052_vm0, %v7678_v47  ;;  %2964 = vmatprep.subr.bf16.mxu0 %v6538_v45  ;;  %v6611_v45 = vld [vmem:[%s8701_s5 + $0x5b0] ss:$8 sps:$4 sm:$0xff]   ;;  %v8006_v36 = vshrl.u32 %v7844_v43, 16 }
 0x31f   : > { %2557 = vmatpush1.bf16.msra.mxu1 %v6533_v46  ;;  %2588 = vmatprep.mubr.bf16.mxu1 %v6977_v1  ;;  %v6619_v46 = vld [vmem:[%s8701_s5 + $0x5c4] ss:$8 sps:$4 sm:$0xff]  }
 0x320   : > { %5848 = vmatmul.mubr.msk.bf16.vlgmr.msra.gmra.mrb[32].mxu0 %vm1052_vm0, %v2628_v50  ;;  %2558 = vmatprep.subr.bf16.mxu1 %v6541_v48  ;;  %v6614_v48 = vld [vmem:[%s8701_s5 + $0x6d0] ss:$8 sps:$4 sm:$0xff]   ;;  %v6617_v50 = vld [vmem:[%s8701_s5 + $0x5c0] ss:$8 sps:$4 sm:$0xff]  }
 0x321   : > { %2965 = vmatpush1.bf16.msra.mxu0 %v6536_v49  ;;  %2996 = vmatprep.mubr.bf16.mxu0 %v6977_v1  ;;  %v6622_v49 = vld [vmem:[%s8701_s5 + $0x6e4] ss:$8 sps:$4 sm:$0xff]  }
 0x322   : > { %2966 = vmatprep.subr.bf16.mxu0 %v6544_v51  ;;  %v6625_v51 = vld [vmem:[%s8701_s5 + $0x5d4] ss:$8 sps:$4 sm:$0xff]  }
 0x323   : > { %2559 = vmatpush1.bf16.msra.mxu1 %v6539_v26  ;;  %v6620_v26 = vld [vmem:[%s8701_s5 + $0x6e0] ss:$8 sps:$4 sm:$0xff]  }
 0x324   : > { %2560 = vmatprep.subr.bf16.mxu1 %v6547_v52  ;;  %v6628_v52 = vld [vmem:[%s8701_s5 + $0x6f4] ss:$8 sps:$4 sm:$0xff]  }
 0x325   : > { %2967 = vmatpush1.bf16.msra.mxu0 %v6542_v53  ;;  %v6623_v53 = vld [vmem:[%s8701_s5 + $0x5d0] ss:$8 sps:$4 sm:$0xff]  }
 0x326   : > { %2968 = vmatprep.subr.bf16.mxu0 %v6550_v54  ;;  %v6631_v54 = vld [vmem:[%s8701_s5 + $0x5e4] ss:$8 sps:$4 sm:$0xff]  }
 0x327   : > { %2561 = vmatpush1.bf16.msra.mxu1 %v6545_v55  ;;  %v6626_v55 = vld [vmem:[%s8701_s5 + $0x6f0] ss:$8 sps:$4 sm:$0xff]  }
 0x328   : > { %2562 = vmatprep.subr.bf16.mxu1 %v6553_v56  ;;  %v6634_v56 = vld [vmem:[%s8701_s5 + $0x704] ss:$8 sps:$4 sm:$0xff]  }
 0x329   : > { %2969 = vmatpush1.bf16.msra.mxu0 %v6548_v57  ;;  %v6629_v57 = vld [vmem:[%s8701_s5 + $0x5e0] ss:$8 sps:$4 sm:$0xff]  }
 0x32a   : > { %2970 = vmatprep.subr.bf16.mxu0 %v6556_v59  ;;  %v6637_v59 = vld [vmem:[%s8701_s5 + $0x5f4] ss:$8 sps:$4 sm:$0xff]  }
 0x32b   : > { %2563 = vmatpush1.bf16.msra.mxu1 %v6551_v60  ;;  %v6632_v60 = vld [vmem:[%s8701_s5 + $0x700] ss:$8 sps:$4 sm:$0xff]  }
 0x32c   : > { %2564 = vmatprep.subr.bf16.mxu1 %v6559_v62  ;;  %v6640_v62 = vld [vmem:[%s8701_s5 + $0x714] ss:$8 sps:$4 sm:$0xff]  }
 0x32d   : > { %2971 = vmatpush1.bf16.msra.mxu0 %v6554_v63  ;;  %v6635_v63 = vld [vmem:[%s8701_s5 + $0x5f0] ss:$8 sps:$4 sm:$0xff]  }
 0x32e   : > { %2972 = vmatprep.subr.bf16.mxu0 %v6562_v0  ;;  %v6643_v0 = vld [vmem:[%s8701_s5 + $0x664] ss:$8 sps:$4 sm:$0xff]  }
 0x32f   : > { %2565 = vmatpush1.bf16.msra.mxu1 %v6557_v2  ;;  %v6638_v2 = vld [vmem:[%s8701_s5 + $0x710] ss:$8 sps:$4 sm:$0xff]  }
 0x330   : > { %2566 = vmatprep.subr.bf16.mxu1 %v6565_v3  ;;  %v6646_v3 = vld [vmem:[%s8701_s5 + $0x784] ss:$8 sps:$4 sm:$0xff]  }
 0x331   : > { %2973 = vmatpush1.bf16.msra.mxu0 %v6560_v4  ;;  %v6641_v4 = vld [vmem:[%s8701_s5 + $0x660] ss:$8 sps:$4 sm:$0xff]  }
 0x332   : > { %2974 = vmatprep.subr.bf16.mxu0 %v6568_v5  ;;  %v3036_v5 = vrot.slane %v7678_v47, 3  ;;  %v6647_v47 = vld [vmem:[%s8701_s5 + $0x670] ss:$8 sps:$4 sm:$0xff]  }
 0x333   : > { %2567 = vmatpush1.bf16.msra.mxu1 %v6563_v6  ;;  %v6649_v6 = vld [vmem:[%s8701_s5 + $0x674] ss:$8 sps:$4 sm:$0xff]  }
 0x334   : > { %2828 = vmatprep.subr.bf16.mxu1 %v6571_v7  ;;  %v6644_v7 = vld [vmem:[%s8701_s5 + $0x780] ss:$8 sps:$4 sm:$0xff]  }
 0x335   : > { %2975 = vmatpush1.bf16.msra.mxu0 %v6566_v8  ;;  %v3446_v8 = vrot.slane %v7844_v43, 1 }
 0x336   : > { %5835 = vmatmul.mubr.msk.bf16.vlgmr.msra.gmra.mrb[28].mxu1 %vm1052_vm0, %v2492_v11  ;;  %3236 = vmatprep.subr.bf16.mxu0 %v6574_v9  ;;  %v6652_v9 = vld [vmem:[%s8701_s5 + $0x794] ss:$8 sps:$4 sm:$0xff]   ;;  %v6650_v11 = vld [vmem:[%s8701_s5 + $0x790] ss:$8 sps:$4 sm:$0xff]  }
 0x337   : > { %2829 = vmatpush1.bf16.msra.mxu1 %v6569_v10  ;;  %2860 = vmatprep.mubr.bf16.mxu1 %v6977_v1  ;;  %v6655_v10 = vld [vmem:[%s8701_s5 + $0x684] ss:$8 sps:$4 sm:$0xff]  }
 0x338   : > { %5874 = vmatmul.mubr.msk.bf16.vlgmr.msra.gmra.mrb[36].mxu0 %vm1052_vm0, %v2900_v14  ;;  %2830 = vmatprep.subr.bf16.mxu1 %v6577_v12  ;;  %v6658_v12 = vld [vmem:[%s8701_s5 + $0x7a4] ss:$8 sps:$4 sm:$0xff]   ;;  %v6661_v14 = vld [vmem:[%s8701_s5 + $0x694] ss:$8 sps:$4 sm:$0xff]  }
 0x339   : > { %3237 = vmatpush1.bf16.msra.mxu0 %v6572_v13  ;;  %3268 = vmatprep.mubr.bf16.mxu0 %v6977_v1  ;;  %v6653_v13 = vld [vmem:[%s8701_s5 + $0x680] ss:$8 sps:$4 sm:$0xff]  }
 0x33a   : > { %3238 = vmatprep.subr.bf16.mxu0 %v6580_v15  ;;  %v6656_v15 = vld [vmem:[%s8701_s5 + $0x7a0] ss:$8 sps:$4 sm:$0xff]  }
 0x33b   : > { %2831 = vmatpush1.bf16.msra.mxu1 %v6575_v16  ;;  %v6664_v16 = vld [vmem:[%s8701_s5 + $0x7b4] ss:$8 sps:$4 sm:$0xff]  }
 0x33c   : > { %2832 = vmatprep.subr.bf16.mxu1 %v6583_v17  ;;  %v6659_v17 = vld [vmem:[%s8701_s5 + $0x690] ss:$8 sps:$4 sm:$0xff]  }
 0x33d   : > { %3239 = vmatpush1.bf16.msra.mxu0 %v6578_v58  ;;  %v6667_v58 = vld [vmem:[%s8701_s5 + $0x6a4] ss:$8 sps:$4 sm:$0xff]  }
 0x33e   : > { %3240 = vmatprep.subr.bf16.mxu0 %v6586_v18  ;;  %v6662_v18 = vld [vmem:[%s8701_s5 + $0x7b0] ss:$8 sps:$4 sm:$0xff]  }
 0x33f   : > { %2833 = vmatpush1.bf16.msra.mxu1 %v6581_v19  ;;  %v6670_v19 = vld [vmem:[%s8701_s5 + $0x7c4] ss:$8 sps:$4 sm:$0xff]  }
 0x340   : > { %2834 = vmatprep.subr.bf16.mxu1 %v6589_v20  ;;  %v6665_v20 = vld [vmem:[%s8701_s5 + $0x6a0] ss:$8 sps:$4 sm:$0xff]  }
 0x341   : > { %3241 = vmatpush1.bf16.msra.mxu0 %v6584_v21  ;;  %v6673_v21 = vld [vmem:[%s8701_s5 + $0x6b4] ss:$8 sps:$4 sm:$0xff]  }
 0x342   : > { %3242 = vmatprep.subr.bf16.mxu0 %v6592_v22  ;;  %v6668_v22 = vld [vmem:[%s8701_s5 + $0x7c0] ss:$8 sps:$4 sm:$0xff]  }
 0x343   : > { %2835 = vmatpush1.bf16.msra.mxu1 %v6587_v23  ;;  %v6676_v23 = vld [vmem:[%s8701_s5 + $0x7d4] ss:$8 sps:$4 sm:$0xff]  }
 0x344   : > { %2836 = vmatprep.subr.bf16.mxu1 %v6595_v61  ;;  %v6671_v61 = vld [vmem:[%s8701_s5 + $0x6b0] ss:$8 sps:$4 sm:$0xff]  }
 0x345   : > { %3243 = vmatpush1.bf16.msra.mxu0 %v6590_v24  ;;  %v6679_v24 = vld [vmem:[%s8701_s5 + $0x724] ss:$8 sps:$4 sm:$0xff]  }
 0x346   : > { %3244 = vmatprep.subr.bf16.mxu0 %v6598_v25 }
 0x347   : > { %2837 = vmatpush1.bf16.msra.mxu1 %v6593_v27  ;;  %v6674_v27 = vld [vmem:[%s8701_s5 + $0x7d0] ss:$8 sps:$4 sm:$0xff]  }
 0x348   : > { %2838 = vmatprep.subr.bf16.mxu1 %v6601_v28 }
 0x349   : > { %3245 = vmatpush1.bf16.msra.mxu0 %v6596_v31 }
 0x34a   : > { %3246 = vmatprep.subr.bf16.mxu0 %v6604_v29 }
 0x34b   : > { %2839 = vmatpush1.bf16.msra.mxu1 %v6599_v33  ;;  %v6677_v33 = vld [vmem:[%s8701_s5 + $0x720] ss:$8 sps:$4 sm:$0xff]  }
 0x34c   : > { %3100 = vmatprep.subr.bf16.mxu1 %v6607_v34 }
 0x34d   : > { %3247 = vmatpush1.bf16.msra.mxu0 %v6602_v35 }
 0x34e   : > { %5861 = vmatmul.mubr.msk.bf16.vlgmr.msra.gmra.mrb[32].mxu1 %vm1052_vm0, %v2764_v39  ;;  %3510 = vmatprep.subr.bf16.mxu0 %v6610_v37  ;;  %v6685_v37 = vld [vmem:[%s8701_s5 + $0x734] ss:$8 sps:$4 sm:$0xff]  }
 0x34f   : > { %3101 = vmatpush1.bf16.msra.mxu1 %v6605_v38  ;;  %3132 = vmatprep.mubr.bf16.mxu1 %v6977_v1 }
 0x350   : > { %5900 = vmatmul.mubr.msk.bf16.vlgmr.msra.gmra.mrb[40].mxu0 %vm1052_vm0, %v7844_v43  ;;  %3102 = vmatprep.subr.bf16.mxu1 %v6613_v40  ;;  %v6680_v40 = vld [vmem:[%s8701_s5 + $0x840] ss:$8 sps:$4 sm:$0xff]  }
 0x351   : > { %3511 = vmatpush1.bf16.msra.mxu0 %v6608_v41  ;;  %3542 = vmatprep.mubr.bf16.mxu0 %v6977_v1 }
 0x352   : > { %3512 = vmatprep.subr.bf16.mxu0 %v6616_v44  ;;  %v3718_v44 = vrot.slane %v7844_v43, 2 }
 0x353   : > { %3103 = vmatpush1.bf16.msra.mxu1 %v6611_v45  ;;  %v6688_v45 = vld [vmem:[%s8701_s5 + $0x854] ss:$8 sps:$4 sm:$0xff]  }
 0x354   : > { %3104 = vmatprep.subr.bf16.mxu1 %v6619_v46  ;;  %v6683_v46 = vld [vmem:[%s8701_s5 + $0x730] ss:$8 sps:$4 sm:$0xff]  }
 0x355   : > { %3513 = vmatpush1.bf16.msra.mxu0 %v6614_v48  ;;  %v6691_v48 = vld [vmem:[%s8701_s5 + $0x744] ss:$8 sps:$4 sm:$0xff]  }
 0x356   : > { %3514 = vmatprep.subr.bf16.mxu0 %v6622_v49  ;;  %v6686_v49 = vld [vmem:[%s8701_s5 + $0x850] ss:$8 sps:$4 sm:$0xff]  }
 0x357   : > { %3105 = vmatpush1.bf16.msra.mxu1 %v6617_v50  ;;  %v6694_v50 = vld [vmem:[%s8701_s5 + $0x864] ss:$8 sps:$4 sm:$0xff]  }
 0x358   : > { %3106 = vmatprep.subr.bf16.mxu1 %v6625_v51  ;;  %v6981_v51 = vmov 1966171168  }
 0x359   : > { %3515 = vmatpush1.bf16.msra.mxu0 %v6620_v26  ;;  %v1101_v26 = vunpack.c.l.s4 %v6981_v51  ;;  %v6737_v51 = vld [vmem:[%s8701_s5 + $0x820] ss:$8 sps:$4 sm:$0xff]  }
 0x35a   : > { %3516 = vmatprep.subr.bf16.mxu0 %v6628_v52  ;;  %v1103_v52 = vlaneseq }
 0x35b   : > { %3107 = vmatpush1.bf16.msra.mxu1 %v6623_v53  ;;  %v6689_v53 = vld [vmem:[%s8701_s5 + $0x740] ss:$8 sps:$4 sm:$0xff]  }
 0x35c   : > { %3108 = vmatprep.subr.bf16.mxu1 %v6631_v54  ;;  %v6697_v54 = vld [vmem:[%s8701_s5 + $0x754] ss:$8 sps:$4 sm:$0xff]  }
 0x35d   : > { %3517 = vmatpush1.bf16.msra.mxu0 %v6626_v55  ;;  %v6692_v55 = vld [vmem:[%s8701_s5 + $0x860] ss:$8 sps:$4 sm:$0xff]  }
 0x35e   : > { %3518 = vmatprep.subr.bf16.mxu0 %v6634_v56  ;;  %v6700_v56 = vld [vmem:[%s8701_s5 + $0x874] ss:$8 sps:$4 sm:$0xff]  }
 0x35f   : > { %3109 = vmatpush1.bf16.msra.mxu1 %v6629_v57  ;;  %v1102_v57 = vunpack.c.0.s8 %v1101_v26  ;;  %v6745_v26 = vld [vmem:[%s8701_s5 + $0x834] ss:$8 sps:$4 sm:$0xff]  }
 0x360   : > { %3110 = vmatprep.subr.bf16.mxu1 %v6637_v59  ;;  %v8049_v59 = vshrl.u32 %v1103_v52, 7  ;;  %v6740_v52 = vld [vmem:[%s8701_s5 + $0x940] ss:$8 sps:$4 sm:$0xff]  }
 0x361   : > { %3519 = vmatpush1.bf16.msra.mxu0 %v6632_v60  ;;  %v6695_v60 = vld [vmem:[%s8701_s5 + $0x750] ss:$8 sps:$4 sm:$0xff]  }
 0x362   : > { %3520 = vmatprep.subr.bf16.mxu0 %v6640_v62  ;;  %v6703_v62 = vld [vmem:[%s8701_s5 + $0x764] ss:$8 sps:$4 sm:$0xff]  }
 0x363   : > { %3111 = vmatpush1.bf16.msra.mxu1 %v6635_v63  ;;  %v6698_v63 = vld [vmem:[%s8701_s5 + $0x870] ss:$8 sps:$4 sm:$0xff]  }
 0x364   : > { %3373 = vmatprep.subr.bf16.mxu1 %v6643_v0  ;;  %v6706_v0 = vld [vmem:[%s8701_s5 + $0x884] ss:$8 sps:$4 sm:$0xff]  }
 0x365   : > { %3521 = vmatpush1.bf16.msra.mxu0 %v6638_v2  ;;  %v8064_v2 = vsub.s32 %v1102_v57, %v8049_v59 }
 0x366   : > { %5887 = vmatmul.mubr.msk.bf16.vlgmr.msra.gmra.mrb[36].mxu1 %vm1052_vm0, %v3036_v5  ;;  %3782 = vmatprep.subr.bf16.mxu0 %v6646_v3  ;;  %v6701_v3 = vld [vmem:[%s8701_s5 + $0x760] ss:$8 sps:$4 sm:$0xff]  }
 0x367   : > { %3374 = vmatpush1.bf16.msra.mxu1 %v6641_v4  ;;  %3405 = vmatprep.mubr.bf16.mxu1 %v6977_v1  ;;  %v6709_v4 = vld [vmem:[%s8701_s5 + $0x774] ss:$8 sps:$4 sm:$0xff]   ;;  %v6704_v5 = vld [vmem:[%s8701_s5 + $0x880] ss:$8 sps:$4 sm:$0xff]  }
 0x368   : > { %5926 = vmatmul.mubr.msk.bf16.vlgmr.msra.gmra.mrb[44].mxu0 %vm1052_vm0, %v3446_v8  ;;  %3375 = vmatprep.subr.bf16.mxu1 %v6649_v6  ;;  %v6712_v6 = vld [vmem:[%s8701_s5 + $0x894] ss:$8 sps:$4 sm:$0xff]   ;;  %v6707_v8 = vld [vmem:[%s8701_s5 + $0x770] ss:$8 sps:$4 sm:$0xff]  }
 0x369   : > { %3783 = vmatpush1.bf16.msra.mxu0 %v6644_v7  ;;  %3814 = vmatprep.mubr.bf16.mxu0 %v6977_v1 }
 0x36a   : > { %3784 = vmatprep.subr.bf16.mxu0 %v6652_v9  ;;  %v6715_v9 = vld [vmem:[%s8701_s5 + $0x7e4] ss:$8 sps:$4 sm:$0xff]  }
 0x36b   : > { %3376 = vmatpush1.bf16.msra.mxu1 %v6647_v47 }
 0x36c   : > { %3377 = vmatprep.subr.bf16.mxu1 %v6655_v10  ;;  %v6710_v10 = vld [vmem:[%s8701_s5 + $0x890] ss:$8 sps:$4 sm:$0xff]  }
 0x36d   : > { %3785 = vmatpush1.bf16.msra.mxu0 %v6650_v11 }
 0x36e   : > { %3786 = vmatprep.subr.bf16.mxu0 %v6658_v12  ;;  %v6718_v12 = vld [vmem:[%s8701_s5 + $0x904] ss:$8 sps:$4 sm:$0xff]  }
 0x36f   : > { %3378 = vmatpush1.bf16.msra.mxu1 %v6653_v13 }
 0x370   : > { %3379 = vmatprep.subr.bf16.mxu1 %v6661_v14 }
 0x371   : > { %3787 = vmatpush1.bf16.msra.mxu0 %v6656_v15 }
 0x372   : > { %3788 = vmatprep.subr.bf16.mxu0 %v6664_v16 }
 0x373   : > { %3380 = vmatpush1.bf16.msra.mxu1 %v6659_v17  ;;  %v3582_v17 = vrot.slane %v8006_v36, 1 }
 0x374   : > { %3381 = vmatprep.subr.bf16.mxu1 %v6667_v58  ;;  %v6713_v58 = vld [vmem:[%s8701_s5 + $0x7e0] ss:$8 sps:$4 sm:$0xff]  }
 0x375   : > { %3789 = vmatpush1.bf16.msra.mxu0 %v6662_v18  ;;  %v978_v18 = vld [vmem:[%s8702_s6] sm:$0x3] }
 0x376   : > { %3790 = vmatprep.subr.bf16.mxu0 %v6670_v19 }
 0x377   : > { %3382 = vmatpush1.bf16.msra.mxu1 %v6665_v20 }
 0x378   : > { %3383 = vmatprep.subr.bf16.mxu1 %v6673_v21  ;;  %v6721_v21 = vld [vmem:[%s8701_s5 + $0x7f4] ss:$8 sps:$4 sm:$0xff]  }
 0x379   : > { %3791 = vmatpush1.bf16.msra.mxu0 %v6668_v22  ;;  %v7986_v25 = vpop.f32.mrb[4].mxu1 }
 0x37a   : > { %v7991_v28 = vpop.f32.mrb[5].mxu1  ;;  %3792 = vmatprep.subr.bf16.mxu0 %v6676_v23 }
 0x37b   : > { %v1099_v31 = vcombine.low %v7986_v25, %v7991_v28  ;;  %3384 = vmatpush1.bf16.msra.mxu1 %v6671_v61  ;;  %v1094_v32 = vpop.f32.mrb[6].mxu1  ;;  %v7998_v29 = vpop.f32.mrb[12].mxu0  ;;  %v6716_v25 = vld [vmem:[%s8701_s5 + $0x900] ss:$8 sps:$4 sm:$0xff]   ;;  %v3990_v28 = vrot.slane %v7844_v43, 3 }
 0x37c   : > { %v1095_v34 = vpop.f32.mrb[7].mxu1  ;;  %v8003_v35 = vpop.f32.mrb[13].mxu0  ;;  %3646 = vmatprep.subr.bf16.mxu1 %v6679_v24  ;;  %v6727_v43 = vld [vmem:[%s8701_s5 + $0x804] ss:$8 sps:$4 sm:$0xff]  }
 0x37d   : > { %v1373_v38 = vcombine.low %v7998_v29, %v8003_v35  ;;  %3793 = vmatpush1.bf16.msra.mxu0 %v6674_v27  ;;  %v1368_v39 = vpop.f32.mrb[14].mxu0  ;;  %v1106_v7 = vrot.slane %v1099_v31, %v8064_v2  ;;  %v6719_v29 = vld [vmem:[%s8701_s5 + $0x7f0] ss:$8 sps:$4 sm:$0xff]  }
 0x37e   : > { %5913 = vmatmul.mubr.msk.bf16.vlgmr.msra.gmra.mrb[40].mxu1 %vm1052_vm0, %v8006_v36  ;;  %v1369_v41 = vpop.f32.mrb[15].mxu0  ;;  %4054 = vmatprep.subr.bf16.mxu0 %v6682_v30  ;;  %v6724_v30 = vld [vmem:[%s8701_s5 + $0x914] ss:$8 sps:$4 sm:$0xff]   ;;  %v6722_v35 = vld [vmem:[%s8701_s5 + $0x910] ss:$8 sps:$4 sm:$0xff]  }
 0x37f   : > { %3647 = vmatpush1.bf16.msra.mxu1 %v6677_v33  ;;  %3678 = vmatprep.mubr.bf16.mxu1 %v6977_v1  ;;  %v1113_v13 = vrot.slane %v1106_v7, %v8064_v2  ;;  %v1380_v22 = vrot.slane %v1373_v38, %v8064_v2  ;;  %v6725_v38 = vld [vmem:[%s8701_s5 + $0x800] ss:$8 sps:$4 sm:$0xff]  }
 0x380   : > { %5952 = vmatmul.mubr.msk.bf16.vlgmr.msra.gmra.mrb[48].mxu0 %vm1052_vm0, %v3718_v44  ;;  %3648 = vmatprep.subr.bf16.mxu1 %v6685_v37  ;;  %v6730_v37 = vld [vmem:[%s8701_s5 + $0x924] ss:$8 sps:$4 sm:$0xff]   ;;  %v6728_v41 = vld [vmem:[%s8701_s5 + $0x920] ss:$8 sps:$4 sm:$0xff]   ;;  %v6736_v44 = vld [vmem:[%s8701_s5 + $0x934] ss:$8 sps:$4 sm:$0xff]  }
 0x381   : > { %4055 = vmatpush1.bf16.msra.mxu0 %v6680_v40  ;;  %4086 = vmatprep.mubr.bf16.mxu0 %v6977_v1  ;;  %v1115_v31 = vadd.f32 %v1113_v13, %v978_v18  ;;  %v1387_v33 = vrot.slane %v1380_v22, %v8064_v2  ;;  %v6733_v40 = vld [vmem:[%s8701_s5 + $0x814] ss:$8 sps:$4 sm:$0xff]   ;;  %v6752_v13 = vld [vmem:[%s8701_s5 + $0x9c0] ss:$8 sps:$4 sm:$0xff]   ;;  %v6763_v18 = vld [vmem:[%s8701_s5 + $0x8c4] ss:$8 sps:$4 sm:$0xff]  }
 0x382   : > { %4056 = vmatprep.subr.bf16.mxu0 %v6688_v45  ;;  %v6731_v45 = vld [vmem:[%s8701_s5 + $0x810] ss:$8 sps:$4 sm:$0xff]   ;;  %v6766_v22 = vld [vmem:[%s8701_s5 + $0x9e4] ss:$8 sps:$4 sm:$0xff]  }
 0x383   : > { %3649 = vmatpush1.bf16.msra.mxu1 %v6683_v46  ;;  %v6739_v46 = vld [vmem:[%s8701_s5 + $0x824] ss:$8 sps:$4 sm:$0xff]  }
 0x384   : > { %3650 = vmatprep.subr.bf16.mxu1 %v6691_v48  ;;  %v6734_v48 = vld [vmem:[%s8701_s5 + $0x930] ss:$8 sps:$4 sm:$0xff]  }
 0x385   : > { %4057 = vmatpush1.bf16.msra.mxu0 %v6686_v49  ;;  %v6742_v49 = vld [vmem:[%s8701_s5 + $0x944] ss:$8 sps:$4 sm:$0xff]  }
 0x386   : > { %4058 = vmatprep.subr.bf16.mxu0 %v6694_v50  ;;  %v903_v50 = vpop.permute.xlu1 %902 }
 0x387   : > { %3651 = vmatpush1.bf16.msra.mxu1 %v6689_v53  ;;  %v971_v53 = vadd.f32 %v7303_v42, %v903_v50  ;;  %v6746_v42 = vld [vmem:[%s8701_s5 + $0x950] ss:$8 sps:$4 sm:$0xff]  }
 0x388   : > { %3652 = vmatprep.subr.bf16.mxu1 %v6697_v54  ;;  %v6748_v54 = vld [vmem:[%s8701_s5 + $0x954] ss:$8 sps:$4 sm:$0xff]  }
 0x389   : > { %4059 = vmatpush1.bf16.msra.mxu0 %v6692_v55  ;;  %v6743_v55 = vld [vmem:[%s8701_s5 + $0x830] ss:$8 sps:$4 sm:$0xff]  }
 0x38a   : > { %4060 = vmatprep.subr.bf16.mxu0 %v6700_v56  ;;  %v6751_v56 = vld [vmem:[%s8701_s5 + $0x8a4] ss:$8 sps:$4 sm:$0xff]  }
 0x38b   : > { %3653 = vmatpush1.bf16.msra.mxu1 %v6695_v60  ;;  %v977_v60 = vmax.f32 %v971_v53, 0.0 }
 0x38c   : > { %3654 = vmatprep.subr.bf16.mxu1 %v6703_v62 }
 0x38d   : > { %4061 = vmatpush1.bf16.msra.mxu0 %v6698_v63  ;;  %v6754_v63 = vld [vmem:[%s8701_s5 + $0x9c4] ss:$8 sps:$4 sm:$0xff]  }
 0x38e   : > { %4062 = vmatprep.subr.bf16.mxu0 %v6706_v0 }
 0x38f   : > { %3655 = vmatpush1.bf16.msra.mxu1 %v6701_v3 }
 0x390   : > { %3656 = vmatprep.subr.bf16.mxu1 %v6709_v4 }
 0x391   : > { %v1227_v47 = vpop.f32.mrb[8].mxu1  ;;  %4063 = vmatpush1.bf16.msra.mxu0 %v6704_v5  ;;  %v6749_v5 = vld [vmem:[%s8701_s5 + $0x8a0] ss:$8 sps:$4 sm:$0xff]  }
 0x392   : > { %v1229_v11 = vpop.f32.mrb[9].mxu1  ;;  %4064 = vmatprep.subr.bf16.mxu0 %v6712_v6 }
 0x393   : > { %v1236_v14 = vcombine.low %v1227_v47, %v1229_v11  ;;  %v1231_v15 = vpop.f32.mrb[10].mxu1  ;;  %v8092_v16 = vpop.f32.mrb[16].mxu0  ;;  %3657 = vmatpush1.bf16.msra.mxu1 %v6707_v8  ;;  %v3854_v8 = vrot.slane %v8006_v36, 2 }
 0x394   : > { %v1232_v19 = vpop.f32.mrb[11].mxu1  ;;  %v8101_v20 = vpop.f32.mrb[17].mxu0  ;;  %3918 = vmatprep.subr.bf16.mxu1 %v6715_v9  ;;  %v6757_v9 = vld [vmem:[%s8701_s5 + $0x8b4] ss:$8 sps:$4 sm:$0xff]  }
 0x395   : > { %v1243_v23 = vrot.slane %v1236_v14, %v8064_v2  ;;  %v1645_v61 = vcombine.low %v8092_v16, %v8101_v20  ;;  %v1640_v24 = vpop.f32.mrb[18].mxu0  ;;  %4065 = vmatpush1.bf16.msra.mxu0 %v6710_v10  ;;  %v8210_v14 = vpack.c.bf16 %v977_v60, %v977_v60  ;;  %v6760_v16 = vld [vmem:[%s8701_s5 + $0x9d4] ss:$8 sps:$4 sm:$0xff]  }
 0x396   : > { %v1641_v27 = vpop.f32.mrb[19].mxu0  ;;  %5939 = vmatmul.mubr.msk.bf16.vlgmr.msra.gmra.mrb[44].mxu1 %vm1052_vm0, %v3582_v17  ;;  %4326 = vmatprep.subr.bf16.mxu0 %v6718_v12  ;;  %v6769_v24 = vld [vmem:[%s8701_s5 + $0x8d4] ss:$8 sps:$4 sm:$0xff]  }
 0x397   : > { %v1250_v32 = vrot.slane %v1243_v23, %v8064_v2  ;;  %3919 = vmatpush1.bf16.msra.mxu1 %v6713_v58  ;;  %3950 = vmatprep.mubr.bf16.mxu1 %v6977_v1  ;;  %v1652_v47 = vrot.slane %v1645_v61, %v8064_v2  ;;  %v6755_v58 = vld [vmem:[%s8701_s5 + $0x8b0] ss:$8 sps:$4 sm:$0xff]   ;;  %v6761_v23 = vld [vmem:[%s8701_s5 + $0x8c0] ss:$8 sps:$4 sm:$0xff]   ;;  %v6772_v27 = vld [vmem:[%s8701_s5 + $0x9f4] ss:$8 sps:$4 sm:$0xff]  }
 0x398   : > { %5978 = vmatmul.mubr.msk.bf16.vlgmr.msra.gmra.mrb[52].mxu0 %vm1052_vm0, %v3990_v28  ;;  %3920 = vmatprep.subr.bf16.mxu1 %v6721_v21  ;;  %v6758_v21 = vld [vmem:[%s8701_s5 + $0x9d0] ss:$8 sps:$4 sm:$0xff]  }
 0x399   : > { %v1252_v34 = vadd.f32 %v1250_v32, %v1115_v31  ;;  %4327 = vmatpush1.bf16.msra.mxu0 %v6716_v25  ;;  %4358 = vmatprep.mubr.bf16.mxu0 %v6977_v1  ;;  %v1659_v19 = vrot.slane %v1652_v47, %v8064_v2  ;;  %v6764_v25 = vld [vmem:[%s8701_s5 + $0x9e0] ss:$8 sps:$4 sm:$0xff]   ;;  %v6767_v28 = vld [vmem:[%s8701_s5 + $0x8d0] ss:$8 sps:$4 sm:$0xff]   ;;  %v6778_v32 = vld [vmem:[%s8701_s5 + $0xa04] ss:$8 sps:$4 sm:$0xff]  }
 0x39a   : > { %4328 = vmatprep.subr.bf16.mxu0 %v6724_v30  ;;  %v6775_v30 = vld [vmem:[%s8701_s5 + $0x8e4] ss:$8 sps:$4 sm:$0xff]   ;;  %v6770_v31 = vld [vmem:[%s8701_s5 + $0x9f0] ss:$8 sps:$4 sm:$0xff]   ;;  %v6808_v47 = vld [vmem:[%s8701_s5 + $0xab4] ss:$8 sps:$4 sm:$0xff]  }
 0x39b   : > { %3921 = vmatpush1.bf16.msra.mxu1 %v6719_v29  ;;  %v8141_v39 = vadd.f32 %v1387_v33, %v1252_v34  ;;  %v6773_v29 = vld [vmem:[%s8701_s5 + $0x8e0] ss:$8 sps:$4 sm:$0xff]   ;;  %v6784_v34 = vld [vmem:[%s8701_s5 + $0xa14] ss:$8 sps:$4 sm:$0xff]  }
 0x39c   : > { %3922 = vmatprep.subr.bf16.mxu1 %v6727_v43  ;;  %v6781_v43 = vld [vmem:[%s8701_s5 + $0x8f4] ss:$8 sps:$4 sm:$0xff]   ;;  %v6776_v33 = vld [vmem:[%s8701_s5 + $0xa00] ss:$8 sps:$4 sm:$0xff]  }
 0x39d   : > { %4329 = vmatpush1.bf16.msra.mxu0 %v6722_v35  ;;  %v6779_v35 = vld [vmem:[%s8701_s5 + $0x8f0] ss:$8 sps:$4 sm:$0xff]  }
 0x39e   : > { %4330 = vmatprep.subr.bf16.mxu0 %v6730_v37  ;;  %v6787_v37 = vld [vmem:[%s8701_s5 + $0x964] ss:$8 sps:$4 sm:$0xff]  }
 0x39f   : > { %3923 = vmatpush1.bf16.msra.mxu1 %v6725_v38 }
 0x3a0   : > { %3924 = vmatprep.subr.bf16.mxu1 %v6733_v40 }
 0x3a1   : > { %4331 = vmatpush1.bf16.msra.mxu0 %v6728_v41  ;;  %v6790_v41 = vld [vmem:[%s8701_s5 + $0xa84] ss:$8 sps:$4 sm:$0xff]  }
 0x3a2   : > { %4332 = vmatprep.subr.bf16.mxu0 %v6736_v44 }
 0x3a3   : > { %3925 = vmatpush1.bf16.msra.mxu1 %v6731_v45 }
 0x3a4   : > { %3926 = vmatprep.subr.bf16.mxu1 %v6739_v46 }
 0x3a5   : > { %4333 = vmatpush1.bf16.msra.mxu0 %v6734_v48  ;;  %v6785_v48 = vld [vmem:[%s8701_s5 + $0x960] ss:$8 sps:$4 sm:$0xff]  }
 0x3a6   : > { %4334 = vmatprep.subr.bf16.mxu0 %v6742_v49 }
 0x3a7   : > { %3927 = vmatpush1.bf16.msra.mxu1 %v6737_v51  ;;  %v4126_v51 = vrot.slane %v8006_v36, 3  ;;  %v6788_v36 = vld [vmem:[%s8701_s5 + $0xa80] ss:$8 sps:$4 sm:$0xff]  }
 0x3a8   : > { %3928 = vmatprep.subr.bf16.mxu1 %v6745_v26  ;;  %v6793_v26 = vld [vmem:[%s8701_s5 + $0x974] ss:$8 sps:$4 sm:$0xff]  }
 0x3a9   : > { %v1500_v57 = vpop.f32.mrb[12].mxu1  ;;  %4335 = vmatpush1.bf16.msra.mxu0 %v6740_v52 }
 0x3aa   : > { %v1502_v62 = vpop.f32.mrb[13].mxu1  ;;  %4336 = vmatprep.subr.bf16.mxu0 %v6748_v54 }
 0x3ab   : > { %v1509_v0 = vcombine.low %v1500_v57, %v1502_v62  ;;  %v1504_v3 = vpop.f32.mrb[14].mxu1  ;;  %v8189_v4 = vpop.f32.mrb[20].mxu0  ;;  %3929 = vmatpush1.bf16.msra.mxu1 %v6743_v55  ;;  %v4536_v57 = vrot.slane %v8210_v14, 1  ;;  %v6791_v62 = vld [vmem:[%s8701_s5 + $0x970] ss:$8 sps:$4 sm:$0xff]  }
 0x3ac   : > { %v1505_v6 = vpop.f32.mrb[15].mxu1  ;;  %v8194_v7 = vpop.f32.mrb[21].mxu0  ;;  %4190 = vmatprep.subr.bf16.mxu1 %v6751_v56 }
 0x3ad   : > { %v1516_v10 = vrot.slane %v1509_v0, %v8064_v2  ;;  %v1917_v11 = vcombine.low %v8189_v4, %v8194_v7  ;;  %v1912_v12 = vpop.f32.mrb[22].mxu0  ;;  %4337 = vmatpush1.bf16.msra.mxu0 %v6746_v42  ;;  %v6796_v42 = vld [vmem:[%s8701_s5 + $0xa94] ss:$8 sps:$4 sm:$0xff]   ;;  %v6794_v4 = vld [vmem:[%s8701_s5 + $0xa90] ss:$8 sps:$4 sm:$0xff]  }
 0x3ae   : > { %v1913_v15 = vpop.f32.mrb[23].mxu0  ;;  %5965 = vmatmul.mubr.msk.bf16.vlgmr.msra.gmra.mrb[48].mxu1 %vm1052_vm0, %v3854_v8  ;;  %4600 = vmatprep.subr.bf16.mxu0 %v6754_v63  ;;  %v6799_v63 = vld [vmem:[%s8701_s5 + $0x984] ss:$8 sps:$4 sm:$0xff]   ;;  %v6797_v6 = vld [vmem:[%s8701_s5 + $0x980] ss:$8 sps:$4 sm:$0xff]  }
 0x3af   : > { %v1523_v17 = vrot.slane %v1516_v10, %v8064_v2  ;;  %4191 = vmatpush1.bf16.msra.mxu1 %v6749_v5  ;;  %4222 = vmatprep.mubr.bf16.mxu1 %v6977_v1  ;;  %v1924_v52 = vrot.slane %v1917_v11, %v8064_v2  ;;  %v6802_v5 = vld [vmem:[%s8701_s5 + $0xaa4] ss:$8 sps:$4 sm:$0xff]   ;;  %v6805_v8 = vld [vmem:[%s8701_s5 + $0x994] ss:$8 sps:$4 sm:$0xff]   ;;  %v6803_v10 = vld [vmem:[%s8701_s5 + $0x990] ss:$8 sps:$4 sm:$0xff]  }
 0x3b0   : > { %6004 = vmatmul.mubr.msk.bf16.vlgmr.msra.gmra.mrb[56].mxu0 %vm1052_vm0, %v8210_v14  ;;  %4192 = vmatprep.subr.bf16.mxu1 %v6757_v9  ;;  %v6800_v9 = vld [vmem:[%s8701_s5 + $0xaa0] ss:$8 sps:$4 sm:$0xff]   ;;  %v6811_v11 = vld [vmem:[%s8701_s5 + $0x9a4] ss:$8 sps:$4 sm:$0xff]   ;;  %v6806_v12 = vld [vmem:[%s8701_s5 + $0xab0] ss:$8 sps:$4 sm:$0xff]  }
 0x3b1   : > { %v1525_v20 = vadd.f32 %v1523_v17, %v8141_v39  ;;  %4601 = vmatpush1.bf16.msra.mxu0 %v6752_v13  ;;  %4632 = vmatprep.mubr.bf16.mxu0 %v6977_v1  ;;  %v6782_v39 = vld [vmem:[%s8701_s5 + $0xa10] ss:$8 sps:$4 sm:$0xff]   ;;  %v1931_v0 = vrot.slane %v1924_v52, %v8064_v2  ;;  %v6814_v13 = vld [vmem:[%s8701_s5 + $0xac4] ss:$8 sps:$4 sm:$0xff]   ;;  %v6809_v15 = vld [vmem:[%s8701_s5 + $0x9a0] ss:$8 sps:$4 sm:$0xff]  }
 0x3b2   : > { %4602 = vmatprep.subr.bf16.mxu0 %v6760_v16  ;;  %v6817_v16 = vld [vmem:[%s8701_s5 + $0x9b4] ss:$8 sps:$4 sm:$0xff]   ;;  %v6812_v17 = vld [vmem:[%s8701_s5 + $0xac0] ss:$8 sps:$4 sm:$0xff]  }
 0x3b3   : > { %4193 = vmatpush1.bf16.msra.mxu1 %v6755_v58  ;;  %v1661_v61 = vadd.f32 %v1659_v19, %v1525_v20  ;;  %v6820_v58 = vld [vmem:[%s8701_s5 + $0xad4] ss:$8 sps:$4 sm:$0xff]   ;;  %v6823_v19 = vld [vmem:[%s8701_s5 + $0xa24] ss:$8 sps:$4 sm:$0xff]   ;;  %v6836_v52 = vld [vmem:[%s8701_s5 + $0xb60] ss:$8 sps:$4 sm:$0xff]  }
 0x3b4   : > { %4194 = vmatprep.subr.bf16.mxu1 %v6763_v18  ;;  %v6815_v18 = vld [vmem:[%s8701_s5 + $0x9b0] ss:$8 sps:$4 sm:$0xff]  }
 0x3b5   : > { %4603 = vmatpush1.bf16.msra.mxu0 %v6758_v21  ;;  %v6818_v21 = vld [vmem:[%s8701_s5 + $0xad0] ss:$8 sps:$4 sm:$0xff]  }
 0x3b6   : > { %4604 = vmatprep.subr.bf16.mxu0 %v6766_v22 }
 0x3b7   : > { %4195 = vmatpush1.bf16.msra.mxu1 %v6761_v23  ;;  %v6826_v23 = vld [vmem:[%s8701_s5 + $0xb44] ss:$8 sps:$4 sm:$0xff]  }
 0x3b8   : > { %4196 = vmatprep.subr.bf16.mxu1 %v6769_v24 }
 0x3b9   : > { %4605 = vmatpush1.bf16.msra.mxu0 %v6764_v25 }
 0x3ba   : > { %4606 = vmatprep.subr.bf16.mxu0 %v6772_v27  ;;  %v6821_v27 = vld [vmem:[%s8701_s5 + $0xa20] ss:$8 sps:$4 sm:$0xff]  }
 0x3bb   : > { %4197 = vmatpush1.bf16.msra.mxu1 %v6767_v28 }
 0x3bc   : > { %4198 = vmatprep.subr.bf16.mxu1 %v6775_v30 }
 0x3bd   : > { %4607 = vmatpush1.bf16.msra.mxu0 %v6770_v31  ;;  %v8382_v31 = vshrl.u32 %v8210_v14, 16 }
 0x3be   : > { %4608 = vmatprep.subr.bf16.mxu0 %v6778_v32  ;;  %v6829_v32 = vld [vmem:[%s8701_s5 + $0xa34] ss:$8 sps:$4 sm:$0xff]  }
 0x3bf   : > { %4199 = vmatpush1.bf16.msra.mxu1 %v6773_v29 }
 0x3c0   : > { %4200 = vmatprep.subr.bf16.mxu1 %v6781_v43 }
 0x3c1   : > { %v1772_v38 = vpop.f32.mrb[16].mxu1  ;;  %4609 = vmatpush1.bf16.msra.mxu0 %v6776_v33 }
 0x3c2   : > { %v1774_v40 = vpop.f32.mrb[17].mxu1  ;;  %4610 = vmatprep.subr.bf16.mxu0 %v6784_v34 }
 0x3c3   : > { %v1781_v44 = vcombine.low %v1772_v38, %v1774_v40  ;;  %v1776_v45 = vpop.f32.mrb[18].mxu1  ;;  %v8283_v46 = vpop.f32.mrb[24].mxu0  ;;  %4201 = vmatpush1.bf16.msra.mxu1 %v6779_v35  ;;  %v6824_v35 = vld [vmem:[%s8701_s5 + $0xb40] ss:$8 sps:$4 sm:$0xff]   ;;  %v4808_v38 = vrot.slane %v8210_v14, 2 }
 0x3c4   : > { %v1777_v49 = vpop.f32.mrb[19].mxu1  ;;  %v8288_v50 = vpop.f32.mrb[25].mxu0  ;;  %4463 = vmatprep.subr.bf16.mxu1 %v6787_v37 }
 0x3c5   : > { %v1788_v53 = vrot.slane %v1781_v44, %v8064_v2  ;;  %v2189_v54 = vcombine.low %v8283_v46, %v8288_v50  ;;  %v2184_v55 = vpop.f32.mrb[26].mxu0  ;;  %4611 = vmatpush1.bf16.msra.mxu0 %v6782_v39  ;;  %v6832_v39 = vld [vmem:[%s8701_s5 + $0xb54] ss:$8 sps:$4 sm:$0xff]   ;;  %v6835_v44 = vld [vmem:[%s8701_s5 + $0xa44] ss:$8 sps:$4 sm:$0xff]  }
 0x3c6   : > { %v2185_v56 = vpop.f32.mrb[27].mxu0  ;;  %5991 = vmatmul.mubr.msk.bf16.vlgmr.msra.gmra.mrb[52].mxu1 %vm1052_vm0, %v4126_v51  ;;  %4872 = vmatprep.subr.bf16.mxu0 %v6790_v41  ;;  %v6827_v41 = vld [vmem:[%s8701_s5 + $0xa30] ss:$8 sps:$4 sm:$0xff]   ;;  %v6838_v49 = vld [vmem:[%s8701_s5 + $0xb64] ss:$8 sps:$4 sm:$0xff]  }
 0x3c7   : > { %v1795_v60 = vrot.slane %v1788_v53, %v8064_v2  ;;  %4464 = vmatpush1.bf16.msra.mxu1 %v6785_v48  ;;  %4495 = vmatprep.mubr.bf16.mxu1 %v6977_v1  ;;  %v2196_v29 = vrot.slane %v2189_v54, %v8064_v2  ;;  %v6830_v48 = vld [vmem:[%s8701_s5 + $0xb50] ss:$8 sps:$4 sm:$0xff]   ;;  %v6833_v50 = vld [vmem:[%s8701_s5 + $0xa40] ss:$8 sps:$4 sm:$0xff]   ;;  %v6844_v53 = vld [vmem:[%s8701_s5 + $0xb74] ss:$8 sps:$4 sm:$0xff]  }
 0x3c8   : > { %6030 = vmatmul.mubr.msk.bf16.vlgmr.msra.gmra.mrb[60].mxu0 %vm1052_vm0, %v4536_v57  ;;  %4465 = vmatprep.subr.bf16.mxu1 %v6793_v26  ;;  %v6841_v26 = vld [vmem:[%s8701_s5 + $0xa54] ss:$8 sps:$4 sm:$0xff]   ;;  %v6839_v54 = vld [vmem:[%s8701_s5 + $0xa50] ss:$8 sps:$4 sm:$0xff]   ;;  %v6847_v55 = vld [vmem:[%s8701_s5 + $0xa64] ss:$8 sps:$4 sm:$0xff]  }
 0x3c9   : > { %v1797_v3 = vadd.f32 %v1795_v60, %v1661_v61  ;;  %4873 = vmatpush1.bf16.msra.mxu0 %v6788_v36  ;;  %4904 = vmatprep.mubr.bf16.mxu0 %v6977_v1  ;;  %v2203_v45 = vrot.slane %v2196_v29, %v8064_v2  ;;  %v6842_v36 = vld [vmem:[%s8701_s5 + $0xb70] ss:$8 sps:$4 sm:$0xff]   ;;  %v6850_v56 = vld [vmem:[%s8701_s5 + $0xb84] ss:$8 sps:$4 sm:$0xff]   ;;  %v6845_v57 = vld [vmem:[%s8701_s5 + $0xa60] ss:$8 sps:$4 sm:$0xff]  }
 0x3ca   : > { %4874 = vmatprep.subr.bf16.mxu0 %v6796_v42  ;;  %v6853_v42 = vld [vmem:[%s8701_s5 + $0xa74] ss:$8 sps:$4 sm:$0xff]   ;;  %v6848_v60 = vld [vmem:[%s8701_s5 + $0xb80] ss:$8 sps:$4 sm:$0xff]   ;;  %v6877_v29 = vld [vmem:[%s8701_s5 + $0xba4] ss:$8 sps:$4 sm:$0xff]  }
 0x3cb   : > { %4466 = vmatpush1.bf16.msra.mxu1 %v6791_v62  ;;  %v1933_v7 = vadd.f32 %v1931_v0, %v1797_v3  ;;  %v6856_v62 = vld [vmem:[%s8701_s5 + $0xb94] ss:$8 sps:$4 sm:$0xff]   ;;  %v6859_v0 = vld [vmem:[%s8701_s5 + $0xae4] ss:$8 sps:$4 sm:$0xff]  }
 0x3cc   : > { %4467 = vmatprep.subr.bf16.mxu1 %v6799_v63  ;;  %v6851_v63 = vld [vmem:[%s8701_s5 + $0xa70] ss:$8 sps:$4 sm:$0xff]  }
 0x3cd   : > { %4875 = vmatpush1.bf16.msra.mxu0 %v6794_v4  ;;  %v6854_v4 = vld [vmem:[%s8701_s5 + $0xb90] ss:$8 sps:$4 sm:$0xff]  }
 0x3ce   : > { %4876 = vmatprep.subr.bf16.mxu0 %v6802_v5 }
 0x3cf   : > { %4468 = vmatpush1.bf16.msra.mxu1 %v6797_v6 }
 0x3d0   : > { %4469 = vmatprep.subr.bf16.mxu1 %v6805_v8 }
 0x3d1   : > { %4877 = vmatpush1.bf16.msra.mxu0 %v6800_v9  ;;  %v6857_v9 = vld [vmem:[%s8701_s5 + $0xae0] ss:$8 sps:$4 sm:$0xff]  }
 0x3d2   : > { %4878 = vmatprep.subr.bf16.mxu0 %v6808_v47 }
 0x3d3   : > { %4470 = vmatpush1.bf16.msra.mxu1 %v6803_v10 }
 0x3d4   : > { %4471 = vmatprep.subr.bf16.mxu1 %v6811_v11  ;;  %v4672_v11 = vrot.slane %v8382_v31, 1 }
 0x3d5   : > { %4879 = vmatpush1.bf16.msra.mxu0 %v6806_v12  ;;  %v6862_v12 = vld [vmem:[%s8701_s5 + $0xaf4] ss:$8 sps:$4 sm:$0xff]  }
 0x3d6   : > { %4880 = vmatprep.subr.bf16.mxu0 %v6814_v13 }
 0x3d7   : > { %4472 = vmatpush1.bf16.msra.mxu1 %v6809_v15 }
 0x3d8   : > { %4473 = vmatprep.subr.bf16.mxu1 %v6817_v16 }
 0x3d9   : > { %v2044_v20 = vpop.f32.mrb[20].mxu1  ;;  %4881 = vmatpush1.bf16.msra.mxu0 %v6812_v17 }
 0x3da   : > { %v2046_v22 = vpop.f32.mrb[21].mxu1  ;;  %4882 = vmatprep.subr.bf16.mxu0 %v6820_v58 }
 0x3db   : > { %v2053_v61 = vcombine.low %v2044_v20, %v2046_v22  ;;  %v2048_v24 = vpop.f32.mrb[22].mxu1  ;;  %v8374_v25 = vpop.f32.mrb[28].mxu0  ;;  %4474 = vmatpush1.bf16.msra.mxu1 %v6815_v18  ;;  %v5080_v18 = vrot.slane %v8210_v14, 3  ;;  %v6860_v20 = vld [vmem:[%s8701_s5 + $0xaf0] ss:$8 sps:$4 sm:$0xff]  }
 0x3dc   : > { %v2049_v28 = vpop.f32.mrb[23].mxu1  ;;  %v8379_v30 = vpop.f32.mrb[29].mxu0  ;;  %4736 = vmatprep.subr.bf16.mxu1 %v6823_v19  ;;  %v6863_v14 = vld [vmem:[%s8701_s5 + $0xb00] ss:$8 sps:$4 sm:$0xff]   ;;  %v6868_v24 = vld [vmem:[%s8701_s5 + $0xb14] ss:$8 sps:$4 sm:$0xff]  }
 0x3dd   : > { %v2060_v43 = vrot.slane %v2053_v61, %v8064_v2  ;;  %v2463_v33 = vcombine.low %v8374_v25, %v8379_v30  ;;  %v2458_v34 = vpop.f32.mrb[30].mxu0  ;;  %4883 = vmatpush1.bf16.msra.mxu0 %v6818_v21  ;;  %v6865_v21 = vld [vmem:[%s8701_s5 + $0xb04] ss:$8 sps:$4 sm:$0xff]   ;;  %v6866_v25 = vld [vmem:[%s8701_s5 + $0xb10] ss:$8 sps:$4 sm:$0xff]  }
 0x3de   : > { %v2459_v37 = vpop.f32.mrb[31].mxu0  ;;  %6017 = vmatmul.mubr.msk.bf16.vlgmr.msra.gmra.mrb[56].mxu1 %vm1052_vm0, %v8382_v31  ;;  %5144 = vmatprep.subr.bf16.mxu0 %v6826_v23  ;;  %v6869_v28 = vld [vmem:[%s8701_s5 + $0xb20] ss:$8 sps:$4 sm:$0xff]   ;;  %v6874_v30 = vld [vmem:[%s8701_s5 + $0xb34] ss:$8 sps:$4 sm:$0xff]  }
 0x3df   : > { %v2067_v40 = vrot.slane %v2060_v43, %v8064_v2  ;;  %4737 = vmatpush1.bf16.msra.mxu1 %v6821_v27  ;;  %4768 = vmatprep.mubr.bf16.mxu1 %v6977_v1  ;;  %v2470_v13 = vrot.slane %v2463_v33, %v8064_v2  ;;  %v6871_v27 = vld [vmem:[%s8701_s5 + $0xb24] ss:$8 sps:$4 sm:$0xff]  }
 0x3e0   : > { %6056 = vmatmul.mubr.msk.bf16.vlgmr.msra.gmra.mrb[64].mxu0 %vm1052_vm0, %v4808_v38  ;;  %4738 = vmatprep.subr.bf16.mxu1 %v6829_v32  ;;  %v6872_v32 = vld [vmem:[%s8701_s5 + $0xb30] ss:$8 sps:$4 sm:$0xff]   ;;  %v6875_v38 = vld [vmem:[%s8701_s5 + $0xba0] ss:$8 sps:$4 sm:$0xff]  }
 0x3e1   : > { %v2069_v46 = vadd.f32 %v2067_v40, %v1933_v7  ;;  %5145 = vmatpush1.bf16.msra.mxu0 %v6824_v35  ;;  %5176 = vmatprep.mubr.bf16.mxu0 %v6977_v1  ;;  %v2477_v22 = vrot.slane %v2470_v13, %v8064_v2 }
 0x3e2   : > { %5146 = vmatprep.subr.bf16.mxu0 %v6832_v39 }
 0x3e3   : > { %4739 = vmatpush1.bf16.msra.mxu1 %v6827_v41  ;;  %v2205_v51 = vadd.f32 %v2203_v45, %v2069_v46  ;;  %v4944_v41 = vrot.slane %v8382_v31, 2 }
 0x3e4   : > { %4740 = vmatprep.subr.bf16.mxu1 %v6835_v44  ;;  %v6880_v44 = vld [vmem:[%s8701_s5 + $0xbb4] ss:$8 sps:$4 sm:$0xff]  }
 0x3e5   : > { %5147 = vmatpush1.bf16.msra.mxu0 %v6830_v48 }
 0x3e6   : > { %5148 = vmatprep.subr.bf16.mxu0 %v6838_v49 }
 0x3e7   : > { %4741 = vmatpush1.bf16.msra.mxu1 %v6833_v50 }
 0x3e8   : > { %4742 = vmatprep.subr.bf16.mxu1 %v6841_v26  ;;  %v6878_v26 = vld [vmem:[%s8701_s5 + $0xbb0] ss:$8 sps:$4 sm:$0xff]  }
 0x3e9   : > { %5149 = vmatpush1.bf16.msra.mxu0 %v6836_v52  ;;  %v6883_v52 = vld [vmem:[%s8701_s5 + $0xbc4] ss:$8 sps:$4 sm:$0xff]  }
 0x3ea   : > { %5150 = vmatprep.subr.bf16.mxu0 %v6844_v53 }
 0x3eb   : > { %4743 = vmatpush1.bf16.msra.mxu1 %v6839_v54 }
 0x3ec   : > { %4744 = vmatprep.subr.bf16.mxu1 %v6847_v55  ;;  %v6881_v55 = vld [vmem:[%s8701_s5 + $0xbc0] ss:$8 sps:$4 sm:$0xff]  }
 0x3ed   : > { %5151 = vmatpush1.bf16.msra.mxu0 %v6842_v36 }
 0x3ee   : > { %5152 = vmatprep.subr.bf16.mxu0 %v6850_v56  ;;  %v6886_v56 = vld [vmem:[%s8701_s5 + $0xbd4] ss:$8 sps:$4 sm:$0xff]  }
 0x3ef   : > { %4745 = vmatpush1.bf16.msra.mxu1 %v6845_v57  ;;  %v6889_v57 = vld [vmem:[%s8701_s5 + $0xbe4] ss:$8 sps:$4 sm:$0xff]  }
 0x3f0   : > { %4746 = vmatprep.subr.bf16.mxu1 %v6853_v42  ;;  %v6887_v42 = vld [vmem:[%s8701_s5 + $0xbe0] ss:$8 sps:$4 sm:$0xff]  }
 0x3f1   : > { %v2317_v3 = vpop.f32.mrb[24].mxu1  ;;  %5153 = vmatpush1.bf16.msra.mxu0 %v6848_v60  ;;  %v6892_v60 = vld [vmem:[%s8701_s5 + $0xbf4] ss:$8 sps:$4 sm:$0xff]  }
 0x3f2   : > { %v2319_v5 = vpop.f32.mrb[25].mxu1  ;;  %5154 = vmatprep.subr.bf16.mxu0 %v6856_v62  ;;  %v6890_v62 = vld [vmem:[%s8701_s5 + $0xbf0] ss:$8 sps:$4 sm:$0xff]  }
 0x3f3   : > { %v2326_v6 = vcombine.low %v2317_v3, %v2319_v5  ;;  %v2321_v7 = vpop.f32.mrb[26].mxu1  ;;  %v2726_v8 = vpop.f32.mrb[32].mxu0  ;;  %4747 = vmatpush1.bf16.msra.mxu1 %v6851_v63 }
 0x3f4   : > { %v2322_v47 = vpop.f32.mrb[27].mxu1  ;;  %v2728_v10 = vpop.f32.mrb[33].mxu0  ;;  %5008 = vmatprep.subr.bf16.mxu1 %v6859_v0 }
 0x3f5   : > { %v2333_v15 = vrot.slane %v2326_v6, %v8064_v2  ;;  %v2735_v16 = vcombine.low %v2726_v8, %v2728_v10  ;;  %v2730_v17 = vpop.f32.mrb[34].mxu0  ;;  %5155 = vmatpush1.bf16.msra.mxu0 %v6854_v4  ;;  %v5216_v8 = vrot.slane %v8382_v31, 3 }
 0x3f6   : > { %v2731_v58 = vpop.f32.mrb[35].mxu0  ;;  %6043 = vmatmul.mubr.msk.bf16.vlgmr.msra.gmra.mrb[60].mxu1 %vm1052_vm0, %v4672_v11 }
 0x3f7   : > { %v2340_v19 = vrot.slane %v2333_v15, %v8064_v2  ;;  %5009 = vmatpush1.bf16.msra.mxu1 %v6857_v9  ;;  %5040 = vmatprep.mubr.bf16.mxu1 %v6977_v1  ;;  %v2742_v45 = vrot.slane %v2735_v16, %v8064_v2 }
 0x3f8   : > { %6082 = vmatmul.mubr.msk.bf16.vlgmr.msra.gmra.mrb[68].mxu0 %vm1052_vm0, %v5080_v18  ;;  %5010 = vmatprep.subr.bf16.mxu1 %v6862_v12 }
 0x3f9   : > { %v2342_v23 = vadd.f32 %v2340_v19, %v2205_v51  ;;  %v2749_v53 = vrot.slane %v2742_v45, %v8064_v2 }
 0x3fb   : > { %5011 = vmatpush1.bf16.msra.mxu1 %v6860_v20  ;;  %v2479_v61 = vadd.f32 %v2477_v22, %v2342_v23 }
 0x3fc   : > { %5012 = vmatprep.subr.bf16.mxu1 %v6865_v21 }
 0x3ff   : > { %5013 = vmatpush1.bf16.msra.mxu1 %v6863_v14 }
 0x400   : > { %5014 = vmatprep.subr.bf16.mxu1 %v6868_v24 }
 0x403   : > { %5015 = vmatpush1.bf16.msra.mxu1 %v6866_v25 }
 0x404   : > { %5016 = vmatprep.subr.bf16.mxu1 %v6871_v27 }
 0x407   : > { %5017 = vmatpush1.bf16.msra.mxu1 %v6869_v28 }
 0x408   : > { %5018 = vmatprep.subr.bf16.mxu1 %v6874_v30 }
 0x409   : > { %v2590_v43 = vpop.f32.mrb[28].mxu1 }
 0x40a   : > { %v2592_v33 = vpop.f32.mrb[29].mxu1 }
 0x40b   : > { %v2599_v34 = vcombine.low %v2590_v43, %v2592_v33  ;;  %v2594_v35 = vpop.f32.mrb[30].mxu1  ;;  %v2998_v37 = vpop.f32.mrb[36].mxu0  ;;  %5019 = vmatpush1.bf16.msra.mxu1 %v6872_v32 }
 0x40c   : > { %v2595_v39 = vpop.f32.mrb[31].mxu1  ;;  %v3000_v40 = vpop.f32.mrb[37].mxu0  ;;  %5280 = vmatprep.subr.bf16.mxu1 %v6877_v29 }
 0x40d   : > { %v2606_v46 = vrot.slane %v2599_v34, %v8064_v2  ;;  %v3007_v48 = vcombine.low %v2998_v37, %v3000_v40  ;;  %v3002_v49 = vpop.f32.mrb[38].mxu0 }
 0x40e   : > { %v3003_v50 = vpop.f32.mrb[39].mxu0  ;;  %6069 = vmatmul.mubr.msk.bf16.vlgmr.msra.gmra.mrb[64].mxu1 %vm1052_vm0, %v4944_v41 }
 0x40f   : > { %v2613_v51 = vrot.slane %v2606_v46, %v8064_v2  ;;  %5281 = vmatpush1.bf16.msra.mxu1 %v6875_v38  ;;  %5312 = vmatprep.mubr.bf16.mxu1 %v6977_v1  ;;  %v6884_v1 = vld [vmem:[%s8701_s5 + $0xbd0] ss:$8 sps:$4 sm:$0xff]   ;;  %v3014_v9 = vrot.slane %v3007_v48, %v8064_v2 }
 0x410   : > { %5282 = vmatprep.subr.bf16.mxu1 %v6880_v44 }
 0x411   : > { %v2615_v54 = vadd.f32 %v2613_v51, %v2479_v61  ;;  %v3021_v15 = vrot.slane %v3014_v9, %v8064_v2  ;;  %v6899_v9 = vld [vmem:[%s8703_s7 + $0x58] sm:$0xff]  }
 0x413   : > { %5283 = vmatpush1.bf16.msra.mxu1 %v6878_v26  ;;  %v2751_v36 = vadd.f32 %v2749_v53, %v2615_v54  ;;  %v6893_v26 = vld [vmem:[%s8703_s7 + $0x40] sm:$0xff]   ;;  %v6895_v53 = vld [vmem:[%s8703_s7 + $0x48] sm:$0xff]  }
 0x414   : > { %5284 = vmatprep.subr.bf16.mxu1 %v6883_v52  ;;  %v6894_v52 = vld [vmem:[%s8703_s7] sm:$0xff]   ;;  %6144 = vmatprep.subr.bf16.mxu0 %v6893_v26 }
 0x415   : > { %6145 = vmatpush3.bf16.msra.mxu0 %v6894_v52 }
 0x416   : > { %6146 = vmatprep.subr.bf16.mxu0 %v6895_v53 }
 0x417   : > { %5285 = vmatpush1.bf16.msra.mxu1 %v6881_v55 }
 0x418   : > { %5286 = vmatprep.subr.bf16.mxu1 %v6886_v56 }
 0x41b   : > { %5287 = vmatpush1.bf16.msra.mxu1 %v6884_v1 }
 0x41c   : > { %5288 = vmatprep.subr.bf16.mxu1 %v6889_v57 }
 0x41f   : > { %5289 = vmatpush1.bf16.msra.mxu1 %v6887_v42  ;;  %v6896_v42 = vld [vmem:[%s8703_s7 + $0x8] sm:$0xff]  }
 0x420   : > { %5290 = vmatprep.subr.bf16.mxu1 %v6892_v60  ;;  %6147 = vmatpush3.bf16.msra.mxu0 %v6896_v42 }
 0x421   : > { %v2862_v63 = vpop.f32.mrb[32].mxu1 }
 0x422   : > { %v2864_v0 = vpop.f32.mrb[33].mxu1 }
 0x423   : > { %v2871_v3 = vcombine.low %v2862_v63, %v2864_v0  ;;  %v2866_v4 = vpop.f32.mrb[34].mxu1  ;;  %v3270_v5 = vpop.f32.mrb[40].mxu0  ;;  %5291 = vmatpush1.bf16.msra.mxu1 %v6890_v62 }
 0x424   : > { %v2867_v6 = vpop.f32.mrb[35].mxu1  ;;  %v3272_v7 = vpop.f32.mrb[41].mxu0 }
 0x425   : > { %v2878_v47 = vrot.slane %v2871_v3, %v8064_v2  ;;  %v3279_v10 = vcombine.low %v3270_v5, %v3272_v7  ;;  %v3274_v11 = vpop.f32.mrb[42].mxu0  ;;  %v6897_v3 = vld [vmem:[%s8703_s7 + $0x50] sm:$0xff]  }
 0x426   : > { %v3275_v12 = vpop.f32.mrb[43].mxu0  ;;  %6095 = vmatmul.mubr.msk.bf16.vlgmr.msra.gmra.mrb[68].mxu1 %vm1052_vm0, %v5216_v8  ;;  %v6898_v6 = vld [vmem:[%s8703_s7 + $0x10] sm:$0xff]   ;;  %6148 = vmatprep.subr.bf16.mxu0 %v6897_v3  ;;  %v6901_v11 = vld [vmem:[%s8703_s7 + $0x60] sm:$0xff]  }
 0x427   : > { %v2885_v13 = vrot.slane %v2878_v47, %v8064_v2  ;;  %v3286_v23 = vrot.slane %v3279_v10, %v8064_v2  ;;  %6149 = vmatpush3.bf16.msra.mxu0 %v6898_v6  ;;  %v6900_v10 = vld [vmem:[%s8703_s7 + $0x18] sm:$0xff]   ;;  %v6902_v12 = vld [vmem:[%s8703_s7 + $0x20] sm:$0xff]  }
 0x428   : > { %6150 = vmatprep.subr.bf16.mxu0 %v6899_v9 }
 0x429   : > { %v2887_v16 = vadd.f32 %v2885_v13, %v2751_v36  ;;  %v3293_v28 = vrot.slane %v3286_v23, %v8064_v2  ;;  %v6903_v13 = vld [vmem:[%s8703_s7 + $0x68] sm:$0xff]  }
 0x42b   : > { %v3023_v17 = vadd.f32 %v3021_v15, %v2887_v16  ;;  %6151 = vmatpush3.bf16.msra.mxu0 %v6900_v10  ;;  %v6904_v15 = vld [vmem:[%s8703_s7 + $0x28] sm:$0xff]  }
 0x42c   : > { %6152 = vmatprep.subr.bf16.mxu0 %v6901_v11 }
 0x42f   : > { %6153 = vmatpush3.bf16.msra.mxu0 %v6902_v12 }
 0x430   : > { %6154 = vmatprep.subr.bf16.mxu0 %v6903_v13 }
 0x433   : > { %6155 = vmatpush3.bf16.msra.mxu0 %v6904_v15 }
 0x439   : > { %v3134_v58 = vpop.f32.mrb[36].mxu1 }
 0x43a   : > { %v3136_v18 = vpop.f32.mrb[37].mxu1 }
 0x43b   : > { %v3143_v19 = vcombine.low %v3134_v58, %v3136_v18  ;;  %v3138_v20 = vpop.f32.mrb[38].mxu1  ;;  %v3544_v31 = vpop.f32.mrb[44].mxu0  ;;  %v6906_v58 = vld [vmem:[%s8703_s7 + $0x30] sm:$0xff]   ;;  %v6907_v18 = vld [vmem:[%s8703_s7 + $0x78] sm:$0xff]  }
 0x43c   : > { %v3139_v21 = vpop.f32.mrb[39].mxu1  ;;  %v3546_v22 = vpop.f32.mrb[45].mxu0 }
 0x43d   : > { %v3150_v14 = vrot.slane %v3143_v19, %v8064_v2  ;;  %v3553_v61 = vcombine.low %v3544_v31, %v3546_v22  ;;  %v3548_v24 = vpop.f32.mrb[46].mxu0 }
 0x43e   : > { %v3549_v25 = vpop.f32.mrb[47].mxu0 }
 0x43f   : > { %v3157_v27 = vrot.slane %v3150_v14, %v8064_v2  ;;  %v3560_v39 = vrot.slane %v3553_v61, %v8064_v2  ;;  %v6908_v14 = vld [vmem:[%s8703_s7 + $0x38] sm:$0xff]  }
 0x441   : > { %v3159_v30 = vadd.f32 %v3157_v27, %v3023_v17  ;;  %v3567_v48 = vrot.slane %v3560_v39, %v8064_v2  ;;  %v6905_v17 = vld [vmem:[%s8703_s7 + $0x70] sm:$0xff]  }
 0x442   : > { %6156 = vmatprep.subr.bf16.mxu0 %v6905_v17 }
 0x443   : > { %v3295_v32 = vadd.f32 %v3293_v28, %v3159_v30  ;;  %6157 = vmatpush3.bf16.msra.mxu0 %v6906_v58 }
 0x444   : > { %6158 = vmatprep.subr.bf16.mxu0 %v6907_v18 }
 0x447   : > { %6159 = vmatpush3.bf16.msra.mxu0 %v6908_v14 }
 0x451   : > { %v3407_v29 = vpop.f32.mrb[40].mxu1 }
 0x452   : > { %v3409_v43 = vpop.f32.mrb[41].mxu1 }
 0x453   : > { %v3416_v33 = vcombine.low %v3407_v29, %v3409_v43  ;;  %v3411_v34 = vpop.f32.mrb[42].mxu1  ;;  %v3816_v35 = vpop.f32.mrb[48].mxu0 }
 0x454   : > { %v3412_v37 = vpop.f32.mrb[43].mxu1  ;;  %v3818_v38 = vpop.f32.mrb[49].mxu0 }
 0x455   : > { %v3423_v40 = vrot.slane %v3416_v33, %v8064_v2  ;;  %v3825_v41 = vcombine.low %v3816_v35, %v3818_v38  ;;  %v3820_v44 = vpop.f32.mrb[50].mxu0 }
 0x456   : > { %v3821_v45 = vpop.f32.mrb[51].mxu0 }
 0x457   : > { %v3430_v46 = vrot.slane %v3423_v40, %v8064_v2  ;;  %v3832_v60 = vrot.slane %v3825_v41, %v8064_v2 }
 0x459   : > { %v3432_v49 = vadd.f32 %v3430_v46, %v3295_v32  ;;  %v3839_v7 = vrot.slane %v3832_v60, %v8064_v2 }
 0x45b   : > { %v3569_v50 = vadd.f32 %v3567_v48, %v3432_v49 }
 0x469   : > { %v3680_v51 = vpop.f32.mrb[44].mxu1 }
 0x46a   : > { %v3682_v54 = vpop.f32.mrb[45].mxu1 }
 0x46b   : > { %v3689_v55 = vcombine.low %v3680_v51, %v3682_v54  ;;  %v3684_v36 = vpop.f32.mrb[46].mxu1  ;;  %v4088_v56 = vpop.f32.mrb[52].mxu0 }
 0x46c   : > { %v3685_v1 = vpop.f32.mrb[47].mxu1  ;;  %v4090_v57 = vpop.f32.mrb[53].mxu0 }
 0x46d   : > { %v3696_v62 = vrot.slane %v3689_v55, %v8064_v2  ;;  %v4097_v63 = vcombine.low %v4088_v56, %v4090_v57  ;;  %v4092_v0 = vpop.f32.mrb[54].mxu0 }
 0x46e   : > { %v4093_v4 = vpop.f32.mrb[55].mxu0 }
 0x46f   : > { %v3703_v5 = vrot.slane %v3696_v62, %v8064_v2  ;;  %v4104_v61 = vrot.slane %v4097_v63, %v8064_v2 }
 0x471   : > { %v3705_v8 = vadd.f32 %v3703_v5, %v3569_v50  ;;  %v4111_v32 = vrot.slane %v4104_v61, %v8064_v2 }
 0x473   : > { %v3841_v47 = vadd.f32 %v3839_v7, %v3705_v8 }
 0x481   : > { %v3952_v16 = vpop.f32.mrb[48].mxu1 }
 0x482   : > { %v3954_v19 = vpop.f32.mrb[49].mxu1 }
 0x483   : > { %v3961_v20 = vcombine.low %v3952_v16, %v3954_v19  ;;  %v3956_v31 = vpop.f32.mrb[50].mxu1  ;;  %v4360_v21 = vpop.f32.mrb[56].mxu0 }
 0x484   : > { %v3957_v22 = vpop.f32.mrb[51].mxu1  ;;  %v4362_v23 = vpop.f32.mrb[57].mxu0 }
 0x485   : > { %v3968_v24 = vrot.slane %v3961_v20, %v8064_v2  ;;  %v4369_v25 = vcombine.low %v4360_v21, %v4362_v23  ;;  %v4364_v27 = vpop.f32.mrb[58].mxu0 }
 0x486   : > { %v4365_v28 = vpop.f32.mrb[59].mxu0 }
 0x487   : > { %v3975_v30 = vrot.slane %v3968_v24, %v8064_v2  ;;  %v4376_v41 = vrot.slane %v4369_v25, %v8064_v2 }
 0x489   : > { %v3977_v29 = vadd.f32 %v3975_v30, %v3841_v47  ;;  %v4383_v50 = vrot.slane %v4376_v41, %v8064_v2 }
 0x48b   : > { %v4113_v43 = vadd.f32 %v4111_v32, %v3977_v29 }
 0x499   : > { %v4224_v33 = vpop.f32.mrb[52].mxu1 }
 0x49a   : > { %v4226_v34 = vpop.f32.mrb[53].mxu1 }
 0x49b   : > { %v4233_v35 = vcombine.low %v4224_v33, %v4226_v34  ;;  %v4228_v37 = vpop.f32.mrb[54].mxu1  ;;  %v4634_v38 = vpop.f32.mrb[60].mxu0 }
 0x49c   : > { %v4229_v39 = vpop.f32.mrb[55].mxu1  ;;  %v4636_v40 = vpop.f32.mrb[61].mxu0 }
 0x49d   : > { %v4240_v44 = vrot.slane %v4233_v35, %v8064_v2  ;;  %v4643_v45 = vcombine.low %v4634_v38, %v4636_v40  ;;  %v4638_v46 = vpop.f32.mrb[62].mxu0  ;;  %v5381_v39 = vsub.s32 1, %v8049_v59  ;;  %v5377_v40 = vsub.s32 0, %v8049_v59 }
 0x49e   : > { %v4639_v48 = vpop.f32.mrb[63].mxu0 }
 0x49f   : > { %v4247_v49 = vrot.slane %v4240_v44, %v8064_v2  ;;  %v4650_v57 = vrot.slane %v4643_v45, %v8064_v2 }
 0x4a1   : > { %v4249_v51 = vadd.f32 %v4247_v49, %v4113_v43  ;;  %v4657_v3 = vrot.slane %v4650_v57, %v8064_v2 }
 0x4a3   : > { %v4385_v26 = vadd.f32 %v4383_v50, %v4249_v51  ;;  %v5373_v51 = vld [vmem:[%s8704_s8] sm:$0x1] }
 0x4b1   : > { %v4497_v52 = vpop.f32.mrb[56].mxu1 }
 0x4b2   : > { %v4499_v53 = vpop.f32.mrb[57].mxu1 }
 0x4b3   : > { %v4506_v54 = vcombine.low %v4497_v52, %v4499_v53  ;;  %v4501_v55 = vpop.f32.mrb[58].mxu1  ;;  %v4906_v36 = vpop.f32.mrb[64].mxu0 }
 0x4b4   : > { %v4502_v56 = vpop.f32.mrb[59].mxu1  ;;  %v4908_v1 = vpop.f32.mrb[65].mxu0 }
 0x4b5   : > { %v4513_v42 = vrot.slane %v4506_v54, %v8064_v2  ;;  %v4915_v60 = vcombine.low %v4906_v36, %v4908_v1  ;;  %v4910_v62 = vpop.f32.mrb[66].mxu0 }
 0x4b6   : > { %v4911_v63 = vpop.f32.mrb[67].mxu0 }
 0x4b7   : > { %v4520_v0 = vrot.slane %v4513_v42, %v8064_v2  ;;  %v4922_v12 = vrot.slane %v4915_v60, %v8064_v2 }
 0x4b9   : > { %v4522_v4 = vadd.f32 %v4520_v0, %v4385_v26  ;;  %v4929_v18 = vrot.slane %v4922_v12, %v8064_v2 }
 0x4bb   : > { %v4659_v5 = vadd.f32 %v4657_v3, %v4522_v4 }
 0x4c9   : > { %v4770_v6 = vpop.f32.mrb[60].mxu1 }
 0x4ca   : > { %v4772_v7 = vpop.f32.mrb[61].mxu1 }
 0x4cb   : > { %v4779_v8 = vcombine.low %v4770_v6, %v4772_v7  ;;  %v4774_v9 = vpop.f32.mrb[62].mxu1  ;;  %v5178_v47 = vpop.f32.mrb[68].mxu0 }
 0x4cc   : > { %v4775_v10 = vpop.f32.mrb[63].mxu1  ;;  %v5180_v11 = vpop.f32.mrb[69].mxu0 }
 0x4cd   : > { %v4786_v13 = vrot.slane %v4779_v8, %v8064_v2  ;;  %v5187_v15 = vcombine.low %v5178_v47, %v5180_v11  ;;  %v5182_v16 = vpop.f32.mrb[70].mxu0 }
 0x4ce   : > { %v5183_v17 = vpop.f32.mrb[71].mxu0 }
 0x4cf   : > { %v4793_v58 = vrot.slane %v4786_v13, %v8064_v2  ;;  %v5194_v61 = vrot.slane %v5187_v15, %v8064_v2 }
 0x4d1   : > { %v4795_v19 = vadd.f32 %v4793_v58, %v4659_v5  ;;  %v5201_v27 = vrot.slane %v5194_v61, %v8064_v2 }
 0x4d3   : > { %v4931_v20 = vadd.f32 %v4929_v18, %v4795_v19 }
 0x4e1   : > { %v5042_v31 = vpop.f32.mrb[64].mxu1 }
 0x4e2   : > { %v5044_v21 = vpop.f32.mrb[65].mxu1 }
 0x4e3   : > { %v5051_v22 = vcombine.low %v5042_v31, %v5044_v21  ;;  %v5046_v23 = vpop.f32.mrb[66].mxu1 }
 0x4e4   : > { %v5047_v14 = vpop.f32.mrb[67].mxu1 }
 0x4e5   : > { %v5058_v24 = vrot.slane %v5051_v22, %v8064_v2 }
 0x4e7   : > { %v5065_v25 = vrot.slane %v5058_v24, %v8064_v2 }
 0x4e9   : > { %v5067_v28 = vadd.f32 %v5065_v25, %v4931_v20 }
 0x4eb   : > { %v5203_v30 = vadd.f32 %v5201_v27, %v5067_v28 }
 0x4f9   : > { %v5314_v32 = vpop.f32.mrb[68].mxu1 }
 0x4fa   : > { %v5316_v29 = vpop.f32.mrb[69].mxu1 }
 0x4fb   : > { %v5323_v43 = vcombine.low %v5314_v32, %v5316_v29  ;;  %v5318_v33 = vpop.f32.mrb[70].mxu1 }
 0x4fc   : > { %v5319_v34 = vpop.f32.mrb[71].mxu1 }
 0x4fd   : > { %v5330_v35 = vrot.slane %v5323_v43, %v8064_v2 }
 0x4ff   : > { %v5337_v37 = vrot.slane %v5330_v35, %v8064_v2 }
 0x501   : > { %v5339_v38 = vadd.f32 %v5337_v37, %v5203_v30 }
 0x503   : > { %v5340_v41 = vmax.f32 %v5339_v38, 0.0 }
 0x505   : > { %v5382_v44 = vrot.slane %v5340_v41, %v5381_v39  ;;  %v5378_v45 = vrot.slane %v5340_v41, %v5377_v40 }
 0x507   : > { %v5386_v46 = vpack.c.bf16 %v5382_v44, %v5382_v44  ;;  %v5385_v48 = vpack.c.bf16 %v5378_v45, %v5378_v45 }
 0x509   : > { %5515 = vmatprep.mubr.bf16.mxu0 %v5386_v46 }
 0x50a   : > { %5516 = vmatmul.mubr.bf16.vlgmr.msra.gmra.mrb[72].mxu0 %v5385_v48 }
 0x5dd   : > { %v6160_v49 = vpop.f32.mrb[72].mxu0 }
 0x5de   : > { %v6161_v50 = vpop.f32.mrb[73].mxu0 }
 0x5df   : > { %v6162_v26 = vadd.f32 %v6161_v50, %v6160_v49  ;;  %v6163_v2 = vpop.f32.mrb[74].mxu0 }
 0x5e0   : > { %v6164_v52 = vpop.f32.mrb[75].mxu0 }
 0x5e1   : > { %v5518_v59 = vadd.f32 %v6162_v26, %v5373_v51 }
 0x5e3   : > { %v5524_v53 = vsel %vm5523_vm1, %v5518_v59, -inf }
 0x5e4   : > { %5525 = vmax.xlane.f32.xlu0 %v5524_v53 }
 0x671   : > { %v5526_v54 = vpop.xlane.xlu0 %5525 }
 0x672   : > { %v5527_v55 = vsub.f32 %v5518_v59, %v5526_v54 }
 0x674   : > { %v5528_v36 = vmul.f32 1.442695, %v5527_v55 }
 0x676   : > { %6909 = vpow2.f32 %v5528_v36 }
 0x680   : > { %v6910_v56 = vpop.eup %6909 }
 0x681   : > { %v5530_v1 = vsel %vm5523_vm1, %v6910_v56, 0.0 }
 0x682   : > { %5531 = vadd.xlane.f32.xlu1 %v5530_v1 }
 0x70f   : > { %v5532_v57 = vpop.xlane.xlu1 %5531 }
 0x710   : > { %6911 = vrcp.f32 %v5532_v57 }
 0x71a   : > { %v6912_v42 = vpop.eup %6911 }
 0x71b   : > { %v5534_v60 = vmul.f32 %v6912_v42, %v6910_v56 }
 0x71d   : > { %5535 = vst.msk [vmem:[%s324_s16] sm:$0x1] %vm5523_vm1, %v5534_v60 }
 0x71e   : > { %6926 = shalt.err (!%p6923_p3)
}
 0x71f   : > { %s6927_s28 = scalar_lea.hbm %s8653_s23, 16  ;;  %s6931_s16 = scalar_lea.hbm %s8705_s9, 32 }
 0x720   : > { %p6928_p4 = scmp.ne.s32.totalorder %s8653_s23, %s6927_s28  ;;  %p6932_p9 = scmp.lt.u32.totalorder %s8653_s23, %s8705_s9 }
 0x721   : > { %p6933_p10 = scmp.lt.u32.totalorder %s6931_s16, %s6927_s28  ;;  %p6935_p12 = scmp.lt.u32.totalorder %s6927_s28, %s8653_s23 }
 0x722   : > { %p6929_p7 = pnand %p6928_p4, %p7071_p5 }
 0x723   : > { %p6934_p11 = por %p6933_p10, %p6932_p9 }
 0x724   : > { %p6930_p8 = pneg %p6929_p7 }
 0x725   : > { %p6936_p13 = por %p6935_p12, %p6934_p11 }
 0x727   : > { %p6937_p0 = pnand %p6936_p13, %p6930_p8 }
 0x729   : > { %6940 = shalt.err (!%p6937_p0)
}
 0x72a   : > { %6166 = dma.vmem_to_hbm [thread:$0]  (%p7071_p5), %s8655_s17, 16, %s8653_s23, %s5537_s25  }
 0x72b PF: > { %p6172_p1 = scmp.ge.s32.totalorder %s6975_s12, 2  ;;  %s5561_s26 = sand.u32 1, %s6963_s30  }
 0x72c   : > { %s5562_s13 = scalar_lea.sflag [#allocation3], %s5561_s26 }
 0x72d   : > { %p6169_p2 = pnand %p6172_p1, %p7075_p6 }
 0x72f   : > { %6958 = dma.done.wait (!%p6169_p2), %s5562_s13, 16  }
 0x730   : > { %6960 = vsyncadd (!%p6169_p2), %s5562_s13, 4294967280  ;;  %p19_p3 = scmp.ge.s32.totalorder %s7058_s15, 4   ;;  %s8708_s30 = smov %s6967_s10 }
 0x731   : > { %s8709_s10 = smov %s6971_s11  ;;  %s8710_s11 = smov %s7069_s18 }
 0x732   : > { %s8711_s12 = smov %s7058_s15  ;;  %21 = sbr.rel (!%p19_p3) target bundleno = 3 (0x3), region = 91 }
 0x739   :  { %5566 = vsyncpa [#allocation3], 1 }
 0x73a   :  { %5568 = vsyncpa [#allocation3 + $0x1], 1 }

</bundles_post_ra>
